<compile_context>
chip_gen: v7x
topology: tpu7x:2x2x1
jax: 0.10.0
libtpu: 0.0.40
codegen_flags: <defaults>
</compile_context>

<pallas_src>
import jax
import jax.numpy as jnp
from jax import lax
from jax.experimental import pallas as pl
from jax.experimental.pallas import tpu as pltpu

H = W = 8
N_SPATIAL = H * W              # 64
C_IN = 256
C_POL = 128
C_COMB = 256                   # 128 policy + 1 value + zero pad (sublane/MXU friendly)
POL_FEAT = N_SPATIAL * C_POL   # 8192, feature order (c, h, w)
POL_OUT = N_SPATIAL * 73       # 4672
POL_PAD = 5120                 # padded up to a multiple of TN (5 x 1024 tiles)
V_HID = 64
BN_EPS = 1e-5
NEG_BIG = -1e30                # bias of padded policy columns -> softmax prob 0

TN = 1024                      # policy-FC column tile
K_CHUNK = 2048                 # in-kernel dequant / matmul K chunk


# ---------------------------------------------------------------------------
# Kernel A: fused 1x1 convs (policy + value in ONE matmul) + folded BN + ReLU.
#   x block:  (TB*256, 64) bf16 — NCHW flattened, rows ordered (sample, channel)
#   outputs:  p (TB*128, 64) bf16  [policy activations, features (c,h,w)]
#             v (TB, 64)     f32   [value spatial vector, lane-dense]
# ---------------------------------------------------------------------------
def _head_conv_kernel(x_ref, w_ref, b_ref, p_ref, v_ref):
    w = w_ref[...]                 # (256, 256) bf16: rows = [policy(128)|value(1)|0-pad]
    bias = b_ref[...]              # (256, 1)   f32  (conv bias + eval-mode BN folded)
    nb = x_ref.shape[0] // C_IN    # samples in this batch tile (static)

    def body(b, carry):
        xrow = pl.multiple_of(b * C_IN, C_IN)
        xb = x_ref[pl.ds(xrow, C_IN), :]                            # (256, 64) bf16
        h = jnp.dot(w, xb, preferred_element_type=jnp.float32)      # (256, 64) f32
        h = jnp.maximum(h + bias, 0.0)
        prow = pl.multiple_of(b * C_POL, C_POL)
        p_ref[pl.ds(prow, C_POL), :] = h[:C_POL, :].astype(p_ref.dtype)
        v_ref[pl.ds(b, 1), :] = h[C_POL:C_POL + 1, :]
        return carry

    lax.fori_loop(0, nb, body, 0, unroll=True)


# ---------------------------------------------------------------------------
# Kernel B: policy FC (8192 -> 5120 padded), row x column tiled.
#   Streams int8 weight tiles, dequantises to bf16 in K chunks on the VPU
#   (works on v5e/v6e/v7x — no int MXU dependence), bf16 MXU dot, f32
#   accumulator rescaled with the per-output-column scale, + bias.
# ---------------------------------------------------------------------------
def _policy_fc_kernel(x_ref, w_ref, scale_ref, b_ref, out_ref, acc_ref):
    acc_ref[...] = jnp.zeros_like(acc_ref)

    def body(k, carry):
        ks = pl.multiple_of(k * K_CHUNK, K_CHUNK)
        w_i8 = w_ref[pl.ds(ks, K_CHUNK), :]                    # (K_CHUNK, TN) int8
        w_bf = w_i8.astype(jnp.float32).astype(jnp.bfloat16)   # VPU dequant
        x_bf = x_ref[:, pl.ds(ks, K_CHUNK)]                    # (TM, K_CHUNK) bf16
        acc_ref[...] += jnp.dot(x_bf, w_bf, preferred_element_type=jnp.float32)
        return carry

    lax.fori_loop(0, POL_FEAT // K_CHUNK, body, 0)
    out_ref[...] = acc_ref[...] * scale_ref[...] + b_ref[...]


# ---------------------------------------------------------------------------
# Kernel C: row-tiled epilogue — softmax of the (padded) logits fused with the
#           tiny value MLP (relu(fc1) -> tanh(fc2)).  Padded columns carry bias
#           -1e30, so exp() underflows to 0 and real columns normalise exactly.
# ---------------------------------------------------------------------------
def _softmax_value_kernel(logits_ref, vsp_ref, w1_ref, b1_ref, w2_ref, b2_ref,
                          p_ref, v_ref):
    z = logits_ref[...]
    z = z - jnp.max(z, axis=-1, keepdims=True)
    e = jnp.exp(z)
    p_ref[...] = e / jnp.sum(e, axis=-1, keepdims=True)

    hh = jnp.dot(vsp_ref[...], w1_ref[...],
                 preferred_element_type=jnp.float32) + b1_ref[...]
    hh = jnp.maximum(hh, 0.0)
    vv = jnp.dot(hh, w2_ref[...],
                 preferred_element_type=jnp.float32) + b2_ref[...]
    v_ref[...] = jnp.tanh(vv)


# ---------------------------------------------------------------------------
# Parameter construction (deterministic, synthetic)
# ---------------------------------------------------------------------------
def make_params(key):
    ks = jax.random.split(key, 16)
    r = lambda k, shape, s=0.05: (s * jax.random.normal(k, shape)).astype(jnp.float32)

    # policy FC (8192 -> 4672); input features ordered (c, h, w).
    # Stored int8 with per-output-column f32 scale; columns padded to POL_PAD.
    w_fc = (0.02 * jax.random.normal(jax.random.fold_in(key, 99),
                                     (POL_FEAT, POL_OUT))).astype(jnp.float32)
    scale = jnp.maximum(jnp.max(jnp.abs(w_fc), axis=0, keepdims=True) / 127.0, 1e-8)
    w_q = jnp.clip(jnp.round(w_fc / scale), -127.0, 127.0).astype(jnp.int8)
    w_q = jnp.pad(w_q, ((0, 0), (0, POL_PAD - POL_OUT)))                   # zero cols
    scale = jnp.pad(scale, ((0, 0), (0, POL_PAD - POL_OUT)), constant_values=1.0)
    fc_b = jnp.concatenate(
        [r(jax.random.fold_in(key, 100), (POL_OUT,), 0.02),
         jnp.full((POL_PAD - POL_OUT,), NEG_BIG, jnp.float32)])

    return dict(
        # value head 1x1 conv (256 -> 1), PyTorch layout (out, in), + BN(1)
        conv_w=r(ks[0], (1, C_IN)),
        conv_b=r(ks[1], (1,)),
        bn_gamma=1.0 + r(ks[2], (1,)),
        bn_beta=r(ks[3], (1,)),
        bn_mean=r(ks[4], (1,)),
        bn_var=jnp.abs(1.0 + r(ks[5], (1,))),
        # policy head 1x1 conv (256 -> 128), (out, in), + BN(128)
        conv1_w=r(ks[6], (C_POL, C_IN)),
        conv1_b=r(ks[7], (C_POL,)),
        bn1_gamma=1.0 + r(ks[8], (C_POL,)),
        bn1_beta=r(ks[9], (C_POL,)),
        bn1_mean=r(ks[10], (C_POL,)),
        bn1_var=jnp.abs(1.0 + r(ks[11], (C_POL,))),
        # value MLP
        fc1_w=r(ks[12], (N_SPATIAL, V_HID)),
        fc1_b=r(ks[13], (V_HID,)),
        fc2_w=r(ks[14], (V_HID, 1)),
        fc2_b=jnp.zeros((1,), jnp.float32),
        # quantized policy FC
        fc_w_q=w_q,        # (8192, 5120) int8
        fc_scale=scale,    # (1, 5120) f32 per-output-column dequant scale
        fc_b=fc_b,         # (5120,) f32, padded columns = -1e30
    )


# ---------------------------------------------------------------------------
# Forward wrapper (OutBlock.forward): s (N,256,8,8) -> (policy (N,4672), value (N,1))
# ---------------------------------------------------------------------------
def out_block_forward(s_nchw, params):
    n = s_nchw.shape[0]
    # NCHW flattened directly (pure reshape, no transpose): (N*256, 64), bf16
    # activations (the full net's trunk would hand bf16 straight to this head).
    x = s_nchw.reshape(n * C_IN, N_SPATIAL).astype(jnp.bfloat16)

    # Fold eval-mode BN (+ conv bias) into one combined 1x1-conv weight/bias.
    sp = params["bn1_gamma"] / jnp.sqrt(params["bn1_var"] + BN_EPS)
    bp = params["conv1_b"] * sp + params["bn1_beta"] - params["bn1_mean"] * sp
    sv = params["bn_gamma"] / jnp.sqrt(params["bn_var"] + BN_EPS)
    bv = params["conv_b"] * sv + params["bn_beta"] - params["bn_mean"] * sv
    pad = C_COMB - C_POL - 1
    w_comb = jnp.concatenate(
        [params["conv1_w"] * sp[:, None],
         params["conv_w"] * sv[:, None],
         jnp.zeros((pad, C_IN), jnp.float32)], axis=0).astype(jnp.bfloat16)  # (256,256)
    b_comb = jnp.concatenate(
        [bp, bv, jnp.zeros((pad,), jnp.float32)])[:, None]                    # (256,1)

    # ---- Kernel A: fused conv+BN+ReLU head, parallel batch grid ----
    TB = min(32, n)
    grid_a = (pl.cdiv(n, TB),)
    p_act, v_sp = pl.pallas_call(
        _head_conv_kernel,
        out_shape=(jax.ShapeDtypeStruct((n * C_POL, N_SPATIAL), jnp.bfloat16),
                   jax.ShapeDtypeStruct((n, N_SPATIAL), jnp.float32)),
        grid_spec=pltpu.PrefetchScalarGridSpec(
            num_scalar_prefetch=0,
            grid=grid_a,
            in_specs=[pl.BlockSpec((TB * C_IN, N_SPATIAL), lambda i: (i, 0)),
                      pl.BlockSpec((C_COMB, C_IN), lambda i: (0, 0)),
                      pl.BlockSpec((C_COMB, 1), lambda i: (0, 0))],
            out_specs=[pl.BlockSpec((TB * C_POL, N_SPATIAL), lambda i: (i, 0)),
                       pl.BlockSpec((TB, N_SPATIAL), lambda i: (i, 0))]),
        compiler_params=pltpu.CompilerParams(
            dimension_semantics=("parallel",)),
    )(x, w_comb, b_comb)
    # TODO(synk): at large batch, Kernel A's output round-trips HBM before the
    # fc_w stream starts; a cross-pallas_call DMA future could hide that latency.

    # ---- Kernel B: policy FC, (rows x columns) grid, int8 weights ----
    x_pol = p_act.reshape(n, POL_FEAT)       # pure reshape: features (c,h,w), bf16
    TM = min(n, 128)
    grid_b = (pl.cdiv(n, TM), POL_PAD // TN)  # 5 full column tiles, no masked tail
    logits = pl.pallas_call(
        _policy_fc_kernel,
        out_shape=jax.ShapeDtypeStruct((n, POL_PAD), jnp.float32),
        grid_spec=pltpu.PrefetchScalarGridSpec(
            num_scalar_prefetch=0,
            grid=grid_b,
            in_specs=[pl.BlockSpec((TM, POL_FEAT), lambda i, j: (i, 0)),
                      pl.BlockSpec((POL_FEAT, TN), lambda i, j: (0, j)),
                      pl.BlockSpec((1, TN), lambda i, j: (0, j)),
                      pl.BlockSpec((1, TN), lambda i, j: (0, j))],
            out_specs=pl.BlockSpec((TM, TN), lambda i, j: (i, j)),
            scratch_shapes=[pltpu.VMEM((TM, TN), jnp.float32)]),
        compiler_params=pltpu.CompilerParams(
            dimension_semantics=("parallel", "parallel"),
            vmem_limit_bytes=48 * 1024 * 1024),
    )(x_pol, params["fc_w_q"], params["fc_scale"],
      params["fc_b"].reshape(1, POL_PAD))

    # ---- Kernel C: row-tiled softmax + fused value MLP epilogue ----
    TR = min(n, 128)
    grid_c = (pl.cdiv(n, TR),)
    p_pad, v_out = pl.pallas_call(
        _softmax_value_kernel,
        out_shape=(jax.ShapeDtypeStruct((n, POL_PAD), jnp.float32),
                   jax.ShapeDtypeStruct((n, 1), jnp.float32)),
        grid_spec=pltpu.PrefetchScalarGridSpec(
            num_scalar_prefetch=0,
            grid=grid_c,
            in_specs=[pl.BlockSpec((TR, POL_PAD), lambda i: (i, 0)),
                      pl.BlockSpec((TR, N_SPATIAL), lambda i: (i, 0)),
                      pl.BlockSpec((N_SPATIAL, V_HID), lambda i: (0, 0)),
                      pl.BlockSpec((1, V_HID), lambda i: (0, 0)),
                      pl.BlockSpec((V_HID, 1), lambda i: (0, 0)),
                      pl.BlockSpec((1, 1), lambda i: (0, 0))],
            out_specs=[pl.BlockSpec((TR, POL_PAD), lambda i: (i, 0)),
                       pl.BlockSpec((TR, 1), lambda i: (i, 0))]),
        compiler_params=pltpu.CompilerParams(
            dimension_semantics=("parallel",),
            vmem_limit_bytes=32 * 1024 * 1024),
    )(logits, v_sp,
      params["fc1_w"], params["fc1_b"].reshape(1, V_HID),
      params["fc2_w"], params["fc2_b"].reshape(1, 1))

    # Drop the padded (prob == 0) policy columns.
    return p_pad[:, :POL_OUT], v_out


if __name__ == "__main__":
    key = jax.random.PRNGKey(0)
    k_x, k_p = jax.random.split(key)

    # OutBlock input: (N, 256, 8, 8) — spatial/channels are fixed by the module.
    batch = 2
    s = jax.random.normal(k_x, (batch, C_IN, H, W), dtype=jnp.float32)
    params = make_params(k_p)

    fwd = jax.jit(out_block_forward)
    p, v = fwd(s, params)
    p, v = jax.block_until_ready((p, v))

    assert p.shape == (batch, POL_OUT) and v.shape == (batch, 1)
    # policy rows must be valid probability distributions (softmax output)
    assert bool(jnp.all(jnp.abs(jnp.sum(p, axis=-1) - 1.0) < 1e-3))
    assert bool(jnp.all(jnp.abs(v) <= 1.0))

    print("KERNEL_OK")
</pallas_src>

<mosaic_0001>
module attributes {stable_mosaic.version = 11 : i64} {
  func.func @_head_conv_kernel(%arg0: i32, %arg1: memref<512x64xbf16, #tpu.memory_space<vmem>>, %arg2: memref<256x256xbf16, #tpu.memory_space<vmem>>, %arg3: memref<256x1xf32, #tpu.memory_space<vmem>>, %arg4: memref<256x64xbf16, #tpu.memory_space<vmem>>, %arg5: memref<2x64xf32, #tpu.memory_space<vmem>>) attributes {dimension_semantics = [#tpu.dimension_semantics<parallel>], iteration_bounds = array<i64: 1>, scalar_prefetch = 0 : i64, scratch_operands = 0 : i64, tpu.core_type = #tpu.core_type<tc>, window_params = [{transform_indices = @transform_0, window_bounds = array<i64: 512, 64>}, {pipeline_mode = #tpu.pipeline_mode<synchronous>, transform_indices = @transform_1, window_bounds = array<i64: 256, 256>}, {pipeline_mode = #tpu.pipeline_mode<synchronous>, transform_indices = @transform_2, window_bounds = array<i64: 256, 1>}, {transform_indices = @transform_3, window_bounds = array<i64: 256, 64>}, {transform_indices = @transform_4, window_bounds = array<i64: 2, 64>}]} {
    %c0 = arith.constant 0 : index
    %c0_0 = arith.constant 0 : index
    %0 = vector.load %arg2[%c0, %c0_0] : memref<256x256xbf16, #tpu.memory_space<vmem>>, vector<256x256xbf16>
    %c0_1 = arith.constant 0 : index
    %c0_2 = arith.constant 0 : index
    %1 = vector.load %arg3[%c0_1, %c0_2] : memref<256x1xf32, #tpu.memory_space<vmem>>, vector<256x1xf32>
    %c0_i32 = arith.constant 0 : i32
    %c256_i32 = arith.constant 256 : i32
    %2 = arith.muli %c0_i32, %c256_i32 : i32
    %3 = tpu.assume_multiple %2, 256 : i32
    %4 = arith.index_cast %3 : i32 to index
    %c0_3 = arith.constant 0 : index
    %5 = vector.load %arg1[%4, %c0_3] : memref<512x64xbf16, #tpu.memory_space<vmem>>, vector<256x64xbf16>
    %cst = arith.constant dense<0.000000e+00> : vector<256x64xf32>
    %6 = tpu.matmul %0, %5, %cst {dimension_numbers = #tpu.dot_dimension_numbers<[1], [0], [0], [1], [0, 0, 1, 1], [], []>} : vector<256x256xbf16>, vector<256x64xbf16>, vector<256x64xf32> -> vector<256x64xf32>
    %7 = vector.broadcast %1 : vector<256x1xf32> to vector<256x64xf32>
    %8 = arith.addf %6, %7 : vector<256x64xf32>
    %cst_4 = arith.constant 0.000000e+00 : f32
    %9 = vector.broadcast %cst_4 : f32 to vector<256x64xf32>
    %10 = arith.maximumf %8, %9 : vector<256x64xf32>
    %c128_i32 = arith.constant 128 : i32
    %11 = arith.muli %c0_i32, %c128_i32 : i32
    %12 = tpu.assume_multiple %11, 128 : i32
    %13 = vector.extract_strided_slice %10 {offsets = [0, 0], sizes = [128, 64], strides = [1, 1]} : vector<256x64xf32> to vector<128x64xf32>
    %14 = arith.truncf %13 : vector<128x64xf32> to vector<128x64xbf16>
    %15 = arith.index_cast %12 : i32 to index
    %c0_5 = arith.constant 0 : index
    %16 = vector.load %arg4[%15, %c0_5] : memref<256x64xbf16, #tpu.memory_space<vmem>>, vector<128x64xbf16>
    tpu.vector_store %arg4[%15, %c0_5], %14 {strides = array<i32>} : memref<256x64xbf16, #tpu.memory_space<vmem>>, vector<128x64xbf16>,
    %17 = vector.extract_strided_slice %10 {offsets = [128, 0], sizes = [1, 64], strides = [1, 1]} : vector<256x64xf32> to vector<1x64xf32>
    %18 = arith.index_cast %c0_i32 : i32 to index
    %c0_6 = arith.constant 0 : index
    %19 = vector.load %arg5[%18, %c0_6] : memref<2x64xf32, #tpu.memory_space<vmem>>, vector<1x64xf32>
    tpu.vector_store %arg5[%18, %c0_6], %17 {strides = array<i32>} : memref<2x64xf32, #tpu.memory_space<vmem>>, vector<1x64xf32>,
    %c1_i32 = arith.constant 1 : i32
    %c256_i32_7 = arith.constant 256 : i32
    %20 = arith.muli %c1_i32, %c256_i32_7 : i32
    %21 = tpu.assume_multiple %20, 256 : i32
    %22 = arith.index_cast %21 : i32 to index
    %c0_8 = arith.constant 0 : index
    %23 = vector.load %arg1[%22, %c0_8] : memref<512x64xbf16, #tpu.memory_space<vmem>>, vector<256x64xbf16>
    %cst_9 = arith.constant dense<0.000000e+00> : vector<256x64xf32>
    %24 = tpu.matmul %0, %23, %cst_9 {dimension_numbers = #tpu.dot_dimension_numbers<[1], [0], [0], [1], [0, 0, 1, 1], [], []>} : vector<256x256xbf16>, vector<256x64xbf16>, vector<256x64xf32> -> vector<256x64xf32>
    %25 = vector.broadcast %1 : vector<256x1xf32> to vector<256x64xf32>
    %26 = arith.addf %24, %25 : vector<256x64xf32>
    %cst_10 = arith.constant 0.000000e+00 : f32
    %27 = vector.broadcast %cst_10 : f32 to vector<256x64xf32>
    %28 = arith.maximumf %26, %27 : vector<256x64xf32>
    %c128_i32_11 = arith.constant 128 : i32
    %29 = arith.muli %c1_i32, %c128_i32_11 : i32
    %30 = tpu.assume_multiple %29, 128 : i32
    %31 = vector.extract_strided_slice %28 {offsets = [0, 0], sizes = [128, 64], strides = [1, 1]} : vector<256x64xf32> to vector<128x64xf32>
    %32 = arith.truncf %31 : vector<128x64xf32> to vector<128x64xbf16>
    %33 = arith.index_cast %30 : i32 to index
    %c0_12 = arith.constant 0 : index
    %34 = vector.load %arg4[%33, %c0_12] : memref<256x64xbf16, #tpu.memory_space<vmem>>, vector<128x64xbf16>
    tpu.vector_store %arg4[%33, %c0_12], %32 {strides = array<i32>} : memref<256x64xbf16, #tpu.memory_space<vmem>>, vector<128x64xbf16>,
    %35 = vector.extract_strided_slice %28 {offsets = [128, 0], sizes = [1, 64], strides = [1, 1]} : vector<256x64xf32> to vector<1x64xf32>
    %36 = arith.index_cast %c1_i32 : i32 to index
    %c0_13 = arith.constant 0 : index
    %37 = vector.load %arg5[%36, %c0_13] : memref<2x64xf32, #tpu.memory_space<vmem>>, vector<1x64xf32>
    tpu.vector_store %arg5[%36, %c0_13], %35 {strides = array<i32>} : memref<2x64xf32, #tpu.memory_space<vmem>>, vector<1x64xf32>,
    %c2_i32 = arith.constant 2 : i32
    return
  }
  func.func @transform_0(%arg0: i32) -> (i32, i32) {
    %c0_i32 = arith.constant 0 : i32
    %c0_i32_0 = arith.constant 0 : i32
    return %arg0, %c0_i32 : i32, i32
  }
  func.func @transform_1(%arg0: i32) -> (i32, i32) {
    %c0_i32 = arith.constant 0 : i32
    %c0_i32_0 = arith.constant 0 : i32
    %c0_i32_1 = arith.constant 0 : i32
    return %c0_i32, %c0_i32_0 : i32, i32
  }
  func.func @transform_2(%arg0: i32) -> (i32, i32) {
    %c0_i32 = arith.constant 0 : i32
    %c0_i32_0 = arith.constant 0 : i32
    %c0_i32_1 = arith.constant 0 : i32
    return %c0_i32, %c0_i32_0 : i32, i32
  }
  func.func @transform_3(%arg0: i32) -> (i32, i32) {
    %c0_i32 = arith.constant 0 : i32
    %c0_i32_0 = arith.constant 0 : i32
    return %arg0, %c0_i32 : i32, i32
  }
  func.func @transform_4(%arg0: i32) -> (i32, i32) {
    %c0_i32 = arith.constant 0 : i32
    %c0_i32_0 = arith.constant 0 : i32
    return %arg0, %c0_i32 : i32, i32
  }
}

module attributes {stable_mosaic.version = 11 : i64} {
  func.func @_policy_fc_kernel(%arg0: i32, %arg1: i32, %arg2: memref<2x8192xbf16, #tpu.memory_space<vmem>>, %arg3: memref<8192x1024xi8, #tpu.memory_space<vmem>>, %arg4: memref<1x1024xf32, #tpu.memory_space<vmem>>, %arg5: memref<1x1024xf32, #tpu.memory_space<vmem>>, %arg6: memref<2x1024xf32, #tpu.memory_space<vmem>>, %arg7: memref<2x1024xf32, #tpu.memory_space<vmem>>) attributes {dimension_semantics = [#tpu.dimension_semantics<parallel>, #tpu.dimension_semantics<parallel>], iteration_bounds = array<i64: 1, 5>, scalar_prefetch = 0 : i64, scratch_operands = 1 : i64, tpu.core_type = #tpu.core_type<tc>, window_params = [{transform_indices = @transform_0, window_bounds = array<i64: 2, 8192>}, {transform_indices = @transform_1, window_bounds = array<i64: 8192, 1024>}, {transform_indices = @transform_2, window_bounds = array<i64: 1, 1024>}, {transform_indices = @transform_3, window_bounds = array<i64: 1, 1024>}, {transform_indices = @transform_4, window_bounds = array<i64: 2, 1024>}]} {
    %cst = arith.constant 0.000000e+00 : f32
    %0 = vector.broadcast %cst : f32 to vector<2x1024xf32>
    %c0 = arith.constant 0 : index
    %c0_0 = arith.constant 0 : index
    %1 = vector.load %arg7[%c0, %c0_0] : memref<2x1024xf32, #tpu.memory_space<vmem>>, vector<2x1024xf32>
    tpu.vector_store %arg7[%c0, %c0_0], %0 {strides = array<i32>} : memref<2x1024xf32, #tpu.memory_space<vmem>>, vector<2x1024xf32>,
    %c0_i32 = arith.constant 0 : i32
    %c4_i32 = arith.constant 4 : i32
    %2 = arith.addi %c0_i32, %c4_i32 : i32
    %c1_i32 = arith.constant 1 : i32
    scf.for %arg8 = %c0_i32 to %2 step %c1_i32  : i32 {
      %c2048_i32 = arith.constant 2048 : i32
      %11 = arith.muli %arg8, %c2048_i32 : i32
      %12 = tpu.assume_multiple %11, 2048 : i32
      %13 = arith.index_cast %12 : i32 to index
      %c0_10 = arith.constant 0 : index
      %14 = vector.load %arg3[%13, %c0_10] : memref<8192x1024xi8, #tpu.memory_space<vmem>>, vector<2048x1024xi8>
      %15 = arith.sitofp %14 : vector<2048x1024xi8> to vector<2048x1024xf32>
      %16 = arith.truncf %15 : vector<2048x1024xf32> to vector<2048x1024xbf16>
      %c0_11 = arith.constant 0 : index
      %17 = arith.index_cast %12 : i32 to index
      %18 = vector.load %arg2[%c0_11, %17] : memref<2x8192xbf16, #tpu.memory_space<vmem>>, vector<2x2048xbf16>
      %c0_12 = arith.constant 0 : index
      %c0_13 = arith.constant 0 : index
      %19 = vector.load %arg7[%c0_12, %c0_13] : memref<2x1024xf32, #tpu.memory_space<vmem>>, vector<2x1024xf32>
      %cst_14 = arith.constant dense<0.000000e+00> : vector<2x1024xf32>
      %20 = tpu.matmul %18, %16, %cst_14 {dimension_numbers = #tpu.dot_dimension_numbers<[1], [0], [0], [1], [0, 0, 1, 1], [], []>} : vector<2x2048xbf16>, vector<2048x1024xbf16>, vector<2x1024xf32> -> vector<2x1024xf32>
      %21 = arith.addf %19, %20 : vector<2x1024xf32>
      %c0_15 = arith.constant 0 : index
      %c0_16 = arith.constant 0 : index
      %22 = vector.load %arg7[%c0_15, %c0_16] : memref<2x1024xf32, #tpu.memory_space<vmem>>, vector<2x1024xf32>
      tpu.vector_store %arg7[%c0_15, %c0_16], %21 {strides = array<i32>} : memref<2x1024xf32, #tpu.memory_space<vmem>>, vector<2x1024xf32>,
    }
    %c4_i32_1 = arith.constant 4 : i32
    %c0_2 = arith.constant 0 : index
    %c0_3 = arith.constant 0 : index
    %3 = vector.load %arg7[%c0_2, %c0_3] : memref<2x1024xf32, #tpu.memory_space<vmem>>, vector<2x1024xf32>
    %c0_4 = arith.constant 0 : index
    %c0_5 = arith.constant 0 : index
    %4 = vector.load %arg4[%c0_4, %c0_5] : memref<1x1024xf32, #tpu.memory_space<vmem>>, vector<1x1024xf32>
    %5 = vector.broadcast %4 : vector<1x1024xf32> to vector<2x1024xf32>
    %6 = arith.mulf %3, %5 : vector<2x1024xf32>
    %c0_6 = arith.constant 0 : index
    %c0_7 = arith.constant 0 : index
    %7 = vector.load %arg5[%c0_6, %c0_7] : memref<1x1024xf32, #tpu.memory_space<vmem>>, vector<1x1024xf32>
    %8 = vector.broadcast %7 : vector<1x1024xf32> to vector<2x1024xf32>
    %9 = arith.addf %6, %8 : vector<2x1024xf32>
    %c0_8 = arith.constant 0 : index
    %c0_9 = arith.constant 0 : index
    %10 = vector.load %arg6[%c0_8, %c0_9] : memref<2x1024xf32, #tpu.memory_space<vmem>>, vector<2x1024xf32>
    tpu.vector_store %arg6[%c0_8, %c0_9], %9 {strides = array<i32>} : memref<2x1024xf32, #tpu.memory_space<vmem>>, vector<2x1024xf32>,
    return
  }
  func.func @transform_0(%arg0: i32, %arg1: i32) -> (i32, i32) {
    %c0_i32 = arith.constant 0 : i32
    %c0_i32_0 = arith.constant 0 : i32
    return %arg0, %c0_i32 : i32, i32
  }
  func.func @transform_1(%arg0: i32, %arg1: i32) -> (i32, i32) {
    %c0_i32 = arith.constant 0 : i32
    %c0_i32_0 = arith.constant 0 : i32
    return %c0_i32, %arg1 : i32, i32
  }
  func.func @transform_2(%arg0: i32, %arg1: i32) -> (i32, i32) {
    %c0_i32 = arith.constant 0 : i32
    %c0_i32_0 = arith.constant 0 : i32
    return %c0_i32, %arg1 : i32, i32
  }
  func.func @transform_3(%arg0: i32, %arg1: i32) -> (i32, i32) {
    %c0_i32 = arith.constant 0 : i32
    %c0_i32_0 = arith.constant 0 : i32
    return %c0_i32, %arg1 : i32, i32
  }
  func.func @transform_4(%arg0: i32, %arg1: i32) -> (i32, i32) {
    %c0_i32 = arith.constant 0 : i32
    return %arg0, %arg1 : i32, i32
  }
}

module attributes {stable_mosaic.version = 11 : i64} {
  func.func @_softmax_value_kernel(%arg0: i32, %arg1: memref<2x5120xf32, #tpu.memory_space<vmem>>, %arg2: memref<2x64xf32, #tpu.memory_space<vmem>>, %arg3: memref<64x64xf32, #tpu.memory_space<vmem>>, %arg4: memref<1x64xf32, #tpu.memory_space<vmem>>, %arg5: memref<64x1xf32, #tpu.memory_space<vmem>>, %arg6: memref<1x1xf32, #tpu.memory_space<vmem>>, %arg7: memref<2x5120xf32, #tpu.memory_space<vmem>>, %arg8: memref<2x1xf32, #tpu.memory_space<vmem>>) attributes {dimension_semantics = [#tpu.dimension_semantics<parallel>], iteration_bounds = array<i64: 1>, scalar_prefetch = 0 : i64, scratch_operands = 0 : i64, tpu.core_type = #tpu.core_type<tc>, window_params = [{transform_indices = @transform_0, window_bounds = array<i64: 2, 5120>}, {transform_indices = @transform_1, window_bounds = array<i64: 2, 64>}, {pipeline_mode = #tpu.pipeline_mode<synchronous>, transform_indices = @transform_2, window_bounds = array<i64: 64, 64>}, {pipeline_mode = #tpu.pipeline_mode<synchronous>, transform_indices = @transform_3, window_bounds = array<i64: 1, 64>}, {pipeline_mode = #tpu.pipeline_mode<synchronous>, transform_indices = @transform_4, window_bounds = array<i64: 64, 1>}, {pipeline_mode = #tpu.pipeline_mode<synchronous>, transform_indices = @transform_5, window_bounds = array<i64: 1, 1>}, {transform_indices = @transform_6, window_bounds = array<i64: 2, 5120>}, {transform_indices = @transform_7, window_bounds = array<i64: 2, 1>}]} {
    %c0 = arith.constant 0 : index
    %c0_0 = arith.constant 0 : index
    %0 = vector.load %arg1[%c0, %c0_0] : memref<2x5120xf32, #tpu.memory_space<vmem>>, vector<2x5120xf32>
    %cst = arith.constant dense<0xFF800000> : vector<2xf32>
    %1 = vector.multi_reduction <maximumf>, %0, %cst [1] : vector<2x5120xf32> to vector<2xf32>
    %2 = vector.shape_cast %1 : vector<2xf32> to vector<2x1xf32>
    %3 = vector.broadcast %2 : vector<2x1xf32> to vector<2x5120xf32>
    %4 = arith.subf %0, %3 : vector<2x5120xf32>
    %5 = math.exp %4 : vector<2x5120xf32>
    %cst_1 = arith.constant dense<0.000000e+00> : vector<2xf32>
    %6 = vector.multi_reduction <add>, %5, %cst_1 [1] : vector<2x5120xf32> to vector<2xf32>
    %7 = vector.shape_cast %6 : vector<2xf32> to vector<2x1xf32>
    %8 = vector.broadcast %7 : vector<2x1xf32> to vector<2x5120xf32>
    %9 = arith.divf %5, %8 : vector<2x5120xf32>
    %c0_2 = arith.constant 0 : index
    %c0_3 = arith.constant 0 : index
    %10 = vector.load %arg7[%c0_2, %c0_3] : memref<2x5120xf32, #tpu.memory_space<vmem>>, vector<2x5120xf32>
    tpu.vector_store %arg7[%c0_2, %c0_3], %9 {strides = array<i32>} : memref<2x5120xf32, #tpu.memory_space<vmem>>, vector<2x5120xf32>,
    %c0_4 = arith.constant 0 : index
    %c0_5 = arith.constant 0 : index
    %11 = vector.load %arg2[%c0_4, %c0_5] : memref<2x64xf32, #tpu.memory_space<vmem>>, vector<2x64xf32>
    %c0_6 = arith.constant 0 : index
    %c0_7 = arith.constant 0 : index
    %12 = vector.load %arg3[%c0_6, %c0_7] : memref<64x64xf32, #tpu.memory_space<vmem>>, vector<64x64xf32>
    %cst_8 = arith.constant dense<0.000000e+00> : vector<2x64xf32>
    %13 = tpu.matmul %11, %12, %cst_8 {dimension_numbers = #tpu.dot_dimension_numbers<[1], [0], [0], [1], [0, 0, 1, 1], [], []>} : vector<2x64xf32>, vector<64x64xf32>, vector<2x64xf32> -> vector<2x64xf32>
    %c0_9 = arith.constant 0 : index
    %c0_10 = arith.constant 0 : index
    %14 = vector.load %arg4[%c0_9, %c0_10] : memref<1x64xf32, #tpu.memory_space<vmem>>, vector<1x64xf32>
    %15 = vector.broadcast %14 : vector<1x64xf32> to vector<2x64xf32>
    %16 = arith.addf %13, %15 : vector<2x64xf32>
    %cst_11 = arith.constant 0.000000e+00 : f32
    %17 = vector.broadcast %cst_11 : f32 to vector<2x64xf32>
    %18 = arith.maximumf %16, %17 : vector<2x64xf32>
    %c0_12 = arith.constant 0 : index
    %c0_13 = arith.constant 0 : index
    %19 = vector.load %arg5[%c0_12, %c0_13] : memref<64x1xf32, #tpu.memory_space<vmem>>, vector<64x1xf32>
    %cst_14 = arith.constant dense<0.000000e+00> : vector<2x1xf32>
    %20 = tpu.matmul %18, %19, %cst_14 {dimension_numbers = #tpu.dot_dimension_numbers<[1], [0], [0], [1], [0, 0, 1, 1], [], []>} : vector<2x64xf32>, vector<64x1xf32>, vector<2x1xf32> -> vector<2x1xf32>
    %c0_15 = arith.constant 0 : index
    %c0_16 = arith.constant 0 : index
    %21 = vector.load %arg6[%c0_15, %c0_16] : memref<1x1xf32, #tpu.memory_space<vmem>>, vector<1x1xf32>
    %22 = vector.broadcast %21 : vector<1x1xf32> to vector<2x1xf32>
    %23 = arith.addf %20, %22 : vector<2x1xf32>
    %24 = math.tanh %23 : vector<2x1xf32>
    %c0_17 = arith.constant 0 : index
    %c0_18 = arith.constant 0 : index
    %25 = vector.load %arg8[%c0_17, %c0_18] : memref<2x1xf32, #tpu.memory_space<vmem>>, vector<2x1xf32>
    tpu.vector_store %arg8[%c0_17, %c0_18], %24 {strides = array<i32>} : memref<2x1xf32, #tpu.memory_space<vmem>>, vector<2x1xf32>,
    return
  }
  func.func @transform_0(%arg0: i32) -> (i32, i32) {
    %c0_i32 = arith.constant 0 : i32
    %c0_i32_0 = arith.constant 0 : i32
    return %arg0, %c0_i32 : i32, i32
  }
  func.func @transform_1(%arg0: i32) -> (i32, i32) {
    %c0_i32 = arith.constant 0 : i32
    %c0_i32_0 = arith.constant 0 : i32
    return %arg0, %c0_i32 : i32, i32
  }
  func.func @transform_2(%arg0: i32) -> (i32, i32) {
    %c0_i32 = arith.constant 0 : i32
    %c0_i32_0 = arith.constant 0 : i32
    %c0_i32_1 = arith.constant 0 : i32
    return %c0_i32, %c0_i32_0 : i32, i32
  }
  func.func @transform_3(%arg0: i32) -> (i32, i32) {
    %c0_i32 = arith.constant 0 : i32
    %c0_i32_0 = arith.constant 0 : i32
    %c0_i32_1 = arith.constant 0 : i32
    return %c0_i32, %c0_i32_0 : i32, i32
  }
  func.func @transform_4(%arg0: i32) -> (i32, i32) {
    %c0_i32 = arith.constant 0 : i32
    %c0_i32_0 = arith.constant 0 : i32
    %c0_i32_1 = arith.constant 0 : i32
    return %c0_i32, %c0_i32_0 : i32, i32
  }
  func.func @transform_5(%arg0: i32) -> (i32, i32) {
    %c0_i32 = arith.constant 0 : i32
    %c0_i32_0 = arith.constant 0 : i32
    %c0_i32_1 = arith.constant 0 : i32
    return %c0_i32, %c0_i32_0 : i32, i32
  }
  func.func @transform_6(%arg0: i32) -> (i32, i32) {
    %c0_i32 = arith.constant 0 : i32
    %c0_i32_0 = arith.constant 0 : i32
    return %arg0, %c0_i32 : i32, i32
  }
  func.func @transform_7(%arg0: i32) -> (i32, i32) {
    %c0_i32 = arith.constant 0 : i32
    %c0_i32_0 = arith.constant 0 : i32
    return %arg0, %c0_i32 : i32, i32
  }
}

</mosaic_0001>

<bundles_post_ra>
// kernel: out_block_forward.3
= control target key start
LH: loop header
LB: loop body
LE: loop exit
PB: predicated region body
PF: predicated region fallthrough
CT: control target
= control target key end

     0   :  { %v1625_v1 = vmov 0   ;;  %vm741_vm0 = vcmask 519168   ;;  %vm758_vm1 = vcmask 516096   ;;  %s2028_s0 = inlined_call_operand.vmem [shape: bf16[512,64], index: 0, kind: input, shape index: {}]   ;;  %s2029_s1 = inlined_call_operand.vmem [shape: bf16[256,256], index: 1, kind: input, shape index: {}]   ;;  %s2030_s2 = inlined_call_operand.vmem [shape: f32[256,1], index: 2, kind: input, shape index: {}]   ;;  %s2031_s3 = inlined_call_operand.vmem [shape: bf16[256,64], index: 3, kind: output, shape index: {0}]   ;;  %s2032_s4 = inlined_call_operand.vmem [shape: f32[2,64], index: 4, kind: output, shape index: {1}]  }
   0x1   :  { %v1545_v0 = vld [vmem:[%s2028_s0 + $0x40] sm:$0xff]   ;;  %1543 = vset.pattern.permute.xlu0 %v1625_v1  ;;  %1544 = vset.pattern.permute.xlu1 %v1625_v1  ;;  %v1549_v5 = vld [vmem:[%s2028_s0 + $0x48] sm:$0xff]   ;;  %v1553_v9 = vld [vmem:[%s2028_s0 + $0x50] sm:$0xff]  }
   0x2   :  { %v1546_v2 = vld [vmem:[%s2028_s0 + $0xc0] sm:$0xff]   ;;  %1318 = vmatprep.subr.bf16.mxu0 %v1545_v0  ;;  %v1550_v6 = vld [vmem:[%s2028_s0 + $0xc8] sm:$0xff]   ;;  %v1554_v10 = vld [vmem:[%s2028_s0 + $0xd0] sm:$0xff]  }
   0x3   :  { %v1547_v3 = vld [vmem:[%s2028_s0] sm:$0xff]   ;;  %1430 = vmatprep.subr.bf16.mxu1 %v1546_v2  ;;  %v1551_v7 = vld [vmem:[%s2028_s0 + $0x8] sm:$0xff]   ;;  %v1555_v11 = vld [vmem:[%s2028_s0 + $0x10] sm:$0xff]  }
   0x4   :  { %v1548_v4 = vld [vmem:[%s2028_s0 + $0x80] sm:$0xff]   ;;  %1319 = vmatpush3.bf16.msra.mxu0 %v1547_v3  ;;  %v1552_v8 = vld [vmem:[%s2028_s0 + $0x88] sm:$0xff]   ;;  %v1556_v12 = vld [vmem:[%s2028_s0 + $0x90] sm:$0xff]  }
   0x5   :  { %1431 = vmatpush3.bf16.msra.mxu1 %v1548_v4  ;;  %1320 = vmatprep.subr.bf16.mxu0 %v1549_v5  ;;  %v1557_v13 = vld [vmem:[%s2028_s0 + $0x58] sm:$0xff]   ;;  %v1561_v17 = vld [vmem:[%s2028_s0 + $0x60] sm:$0xff]   ;;  %v1565_v21 = vld [vmem:[%s2028_s0 + $0x68] sm:$0xff]  }
   0x6   :  { %1432 = vmatprep.subr.bf16.mxu1 %v1550_v6  ;;  %v1558_v14 = vld [vmem:[%s2028_s0 + $0xd8] sm:$0xff]   ;;  %v1562_v18 = vld [vmem:[%s2028_s0 + $0xe0] sm:$0xff]   ;;  %v1566_v22 = vld [vmem:[%s2028_s0 + $0xe8] sm:$0xff]  }
   0x7   :  { %v1559_v15 = vld [vmem:[%s2028_s0 + $0x18] sm:$0xff]   ;;  %v1563_v19 = vld [vmem:[%s2028_s0 + $0x20] sm:$0xff]   ;;  %v1567_v23 = vld [vmem:[%s2028_s0 + $0x28] sm:$0xff]  }
   0x8   :  { %1321 = vmatpush3.bf16.msra.mxu0 %v1551_v7  ;;  %v1560_v16 = vld [vmem:[%s2028_s0 + $0x98] sm:$0xff]   ;;  %v1564_v20 = vld [vmem:[%s2028_s0 + $0xa0] sm:$0xff]   ;;  %v1568_v24 = vld [vmem:[%s2028_s0 + $0xa8] sm:$0xff]  }
   0x9   :  { %1433 = vmatpush3.bf16.msra.mxu1 %v1552_v8  ;;  %1322 = vmatprep.subr.bf16.mxu0 %v1553_v9  ;;  %v1569_v25 = vld [vmem:[%s2028_s0 + $0x70] sm:$0xff]   ;;  %v1573_v29 = vld [vmem:[%s2028_s0 + $0x78] sm:$0xff]   ;;  %v1577_v33 = vld [vmem:[%s2029_s1] ss:$8 sps:$4 sm:$0xff]  }
   0xa   :  { %1434 = vmatprep.subr.bf16.mxu1 %v1554_v10  ;;  %v1570_v26 = vld [vmem:[%s2028_s0 + $0xf0] sm:$0xff]   ;;  %v1574_v30 = vld [vmem:[%s2028_s0 + $0xf8] sm:$0xff]   ;;  %v1579_v34 = vld [vmem:[%s2029_s1 + $0x4] ss:$8 sps:$4 sm:$0xff]  }
   0xb   :  { %v1571_v27 = vld [vmem:[%s2028_s0 + $0x30] sm:$0xff]   ;;  %v1575_v31 = vld [vmem:[%s2028_s0 + $0x38] sm:$0xff]   ;;  %546 = vmatprep.mubr.bf16.mxu0 %v1579_v34  ;;  %921 = vmatprep.mubr.bf16.mxu1 %v1579_v34  ;;  %v1583_v37 = vld [vmem:[%s2029_s1 + $0x24] ss:$8 sps:$4 sm:$0xff]  }
   0xc   :  { %1323 = vmatpush3.bf16.msra.mxu0 %v1555_v11  ;;  %v1572_v28 = vld [vmem:[%s2028_s0 + $0xb0] sm:$0xff]   ;;  %v1576_v32 = vld [vmem:[%s2028_s0 + $0xb8] sm:$0xff]   ;;  %v49_v38 = vld [vmem:[%s2030_s2] sm:$0xff] }
   0xd   :  { %1435 = vmatpush3.bf16.msra.mxu1 %v1556_v12  ;;  %1324 = vmatprep.subr.bf16.mxu0 %v1557_v13  ;;  %v1580_v35 = vld [vmem:[%s2029_s1 + $0x14] ss:$8 sps:$4 sm:$0xff]   ;;  %v1582_v36 = vld [vmem:[%s2029_s1 + $0x10] ss:$8 sps:$4 sm:$0xff]   ;;  %v1585_v39 = vld [vmem:[%s2029_s1 + $0x20] ss:$8 sps:$4 sm:$0xff]  }
   0xe   :  { %1436 = vmatprep.subr.bf16.mxu1 %v1558_v14  ;;  %115 = vperm.xlu0 %1543, %v49_v38   ;;  %v50_v40 = vld [vmem:[%s2030_s2 + $0x8] sm:$0xff]  ;;  %v51_v41 = vld [vmem:[%s2030_s2 + $0x10] sm:$0xff]  ;;  %v52_v43 = vld [vmem:[%s2030_s2 + $0x18] sm:$0xff] }
   0xf   :  { %v1586_v42 = vld [vmem:[%s2029_s1 + $0x34] ss:$8 sps:$4 sm:$0xff]   ;;  %125 = vperm.xlu1 %1544, %v51_v41   ;;  %v53_v44 = vld [vmem:[%s2030_s2 + $0x20] sm:$0xff]  ;;  %v54_v45 = vld [vmem:[%s2030_s2 + $0x28] sm:$0xff] }
  0x10   :  { %1325 = vmatpush3.bf16.msra.mxu0 %v1559_v15  ;;  %v1588_v46 = vld [vmem:[%s2029_s1 + $0x30] ss:$8 sps:$4 sm:$0xff]   ;;  %v1589_v48 = vld [vmem:[%s2029_s1 + $0x44] ss:$8 sps:$4 sm:$0xff]   ;;  %v1591_v52 = vld [vmem:[%s2029_s1 + $0x40] ss:$8 sps:$4 sm:$0xff]  }
  0x11   :  { %1437 = vmatpush3.bf16.msra.mxu1 %v1560_v16  ;;  %1326 = vmatprep.subr.bf16.mxu0 %v1561_v17  ;;  %v55_v47 = vld [vmem:[%s2030_s2 + $0x30] sm:$0xff]  ;;  %v56_v49 = vld [vmem:[%s2030_s2 + $0x38] sm:$0xff]  ;;  %v57_v50 = vld [vmem:[%s2030_s2 + $0x40] sm:$0xff] }
  0x12   :  { %1438 = vmatprep.subr.bf16.mxu1 %v1562_v18  ;;  %120 = vperm.xlu0 %1543, %v50_v40   ;;  %v58_v51 = vld [vmem:[%s2030_s2 + $0x48] sm:$0xff]  ;;  %v59_v53 = vld [vmem:[%s2030_s2 + $0x50] sm:$0xff]  ;;  %v60_v55 = vld [vmem:[%s2030_s2 + $0x58] sm:$0xff] }
  0x13   :  { %130 = vperm.xlu1 %1544, %v52_v43   ;;  %v1592_v54 = vld [vmem:[%s2029_s1 + $0x54] ss:$8 sps:$4 sm:$0xff]   ;;  %v61_v56 = vld [vmem:[%s2030_s2 + $0x60] sm:$0xff]  ;;  %v62_v57 = vld [vmem:[%s2030_s2 + $0x68] sm:$0xff] }
  0x14   :  { %1327 = vmatpush3.bf16.msra.mxu0 %v1563_v19  ;;  %v1594_v58 = vld [vmem:[%s2029_s1 + $0x50] ss:$8 sps:$4 sm:$0xff]   ;;  %v1595_v60 = vld [vmem:[%s2029_s1 + $0x64] ss:$8 sps:$4 sm:$0xff]   ;;  %v1597_v63 = vld [vmem:[%s2029_s1 + $0x60] ss:$8 sps:$4 sm:$0xff]  }
  0x15   :  { %1439 = vmatpush3.bf16.msra.mxu1 %v1564_v20  ;;  %1328 = vmatprep.subr.bf16.mxu0 %v1565_v21  ;;  %v63_v59 = vld [vmem:[%s2030_s2 + $0x70] sm:$0xff]  ;;  %v64_v61 = vld [vmem:[%s2030_s2 + $0x78] sm:$0xff]  ;;  %v65_v62 = vld [vmem:[%s2030_s2 + $0x80] sm:$0xff] }
  0x16   :  { %1440 = vmatprep.subr.bf16.mxu1 %v1566_v22  ;;  %135 = vperm.xlu0 %1543, %v53_v44   ;;  %v1598_v0 = vld [vmem:[%s2029_s1 + $0x74] ss:$8 sps:$4 sm:$0xff]   ;;  %v1600_v1 = vld [vmem:[%s2029_s1 + $0x70] ss:$8 sps:$4 sm:$0xff]   ;;  %v1601_v2 = vld [vmem:[%s2029_s1 + $0x84] ss:$8 sps:$4 sm:$0xff]  }
  0x17   :  { %140 = vperm.xlu1 %1544, %v54_v45   ;;  %v1603_v3 = vld [vmem:[%s2029_s1 + $0x80] ss:$8 sps:$4 sm:$0xff]   ;;  %v1604_v4 = vld [vmem:[%s2029_s1 + $0x94] ss:$8 sps:$4 sm:$0xff]   ;;  %v1606_v5 = vld [vmem:[%s2029_s1 + $0x90] ss:$8 sps:$4 sm:$0xff]  }
  0x18   :  { %1329 = vmatpush3.bf16.msra.mxu0 %v1567_v23  ;;  %v1607_v6 = vld [vmem:[%s2029_s1 + $0xa4] ss:$8 sps:$4 sm:$0xff]   ;;  %v1609_v7 = vld [vmem:[%s2029_s1 + $0xa0] ss:$8 sps:$4 sm:$0xff]   ;;  %v1610_v8 = vld [vmem:[%s2029_s1 + $0xb4] ss:$8 sps:$4 sm:$0xff]  }
  0x19   :  { %1441 = vmatpush3.bf16.msra.mxu1 %v1568_v24  ;;  %1330 = vmatprep.subr.bf16.mxu0 %v1569_v25  ;;  %v1612_v9 = vld [vmem:[%s2029_s1 + $0xb0] ss:$8 sps:$4 sm:$0xff]   ;;  %v1613_v10 = vld [vmem:[%s2029_s1 + $0xc4] ss:$8 sps:$4 sm:$0xff]   ;;  %v1615_v11 = vld [vmem:[%s2029_s1 + $0xc0] ss:$8 sps:$4 sm:$0xff]  }
  0x1a   :  { %1442 = vmatprep.subr.bf16.mxu1 %v1570_v26  ;;  %145 = vperm.xlu0 %1543, %v55_v47   ;;  %v1616_v12 = vld [vmem:[%s2029_s1 + $0xd4] ss:$8 sps:$4 sm:$0xff]   ;;  %v1618_v13 = vld [vmem:[%s2029_s1 + $0xd0] ss:$8 sps:$4 sm:$0xff]   ;;  %v1619_v14 = vld [vmem:[%s2029_s1 + $0xe4] ss:$8 sps:$4 sm:$0xff]  }
  0x1b   :  { %150 = vperm.xlu1 %1544, %v56_v49   ;;  %v1621_v15 = vld [vmem:[%s2029_s1 + $0xe0] ss:$8 sps:$4 sm:$0xff]   ;;  %v1622_v16 = vld [vmem:[%s2029_s1 + $0xf4] ss:$8 sps:$4 sm:$0xff]   ;;  %v1624_v17 = vld [vmem:[%s2029_s1 + $0xf0] ss:$8 sps:$4 sm:$0xff]  }
  0x1c   :  { %1331 = vmatpush3.bf16.msra.mxu0 %v1571_v27 }
  0x1d   :  { %1443 = vmatpush3.bf16.msra.mxu1 %v1572_v28  ;;  %1332 = vmatprep.subr.bf16.mxu0 %v1573_v29 }
  0x1e   :  { %1444 = vmatprep.subr.bf16.mxu1 %v1574_v30  ;;  %155 = vperm.xlu0 %1543, %v57_v50  }
  0x1f   :  { %160 = vperm.xlu1 %1544, %v58_v51  }
  0x20   :  { %1333 = vmatpush3.bf16.msra.mxu0 %v1575_v31 }
  0x21   :  { %1445 = vmatpush3.bf16.msra.mxu1 %v1576_v32 }
  0x22   :  { %165 = vperm.xlu0 %1543, %v59_v53  }
  0x23   :  { %547 = vmatmul.mubr.bf16.vlgmr.msra.gmra.mrb[0].mxu0 %v1577_v33  ;;  %170 = vperm.xlu1 %1544, %v60_v55  }
  0x24   :  { %922 = vmatmul.mubr.bf16.vlgmr.msra.gmra.mrb[0].mxu1 %v1577_v33  ;;  %554 = vmatprep.mubr.bf16.mxu0 %v1580_v35 }
  0x25   :  { %929 = vmatprep.mubr.bf16.mxu1 %v1580_v35 }
  0x26   :  { %175 = vperm.xlu0 %1543, %v61_v56  }
  0x27   :  { %180 = vperm.xlu1 %1544, %v62_v57  }
  0x2a   :  { %185 = vperm.xlu0 %1543, %v63_v59  }
  0x2b   :  { %555 = vmatmul.mubr.bf16.gmra.mrb[4].mxu0 %v1582_v36  ;;  %190 = vperm.xlu1 %1544, %v64_v61  }
  0x2c   :  { %930 = vmatmul.mubr.bf16.gmra.mrb[4].mxu1 %v1582_v36  ;;  %562 = vmatprep.mubr.bf16.mxu0 %v1583_v37 }
  0x2d   :  { %937 = vmatprep.mubr.bf16.mxu1 %v1583_v37 }
  0x2e   :  { %195 = vperm.xlu0 %1543, %v65_v62  }
  0x33   :  { %563 = vmatmul.mubr.bf16.gmra.mrb[8].mxu0 %v1585_v39 }
  0x34   :  { %938 = vmatmul.mubr.bf16.gmra.mrb[8].mxu1 %v1585_v39  ;;  %570 = vmatprep.mubr.bf16.mxu0 %v1586_v42 }
  0x35   :  { %945 = vmatprep.mubr.bf16.mxu1 %v1586_v42 }
  0x3b   :  { %571 = vmatmul.mubr.bf16.gmra.mrb[12].mxu0 %v1588_v46 }
  0x3c   :  { %946 = vmatmul.mubr.bf16.gmra.mrb[12].mxu1 %v1588_v46  ;;  %578 = vmatprep.mubr.bf16.mxu0 %v1589_v48 }
  0x3d   :  { %953 = vmatprep.mubr.bf16.mxu1 %v1589_v48 }
  0x43   :  { %579 = vmatmul.mubr.bf16.gmra.mrb[16].mxu0 %v1591_v52 }
  0x44   :  { %954 = vmatmul.mubr.bf16.gmra.mrb[16].mxu1 %v1591_v52  ;;  %586 = vmatprep.mubr.bf16.mxu0 %v1592_v54 }
  0x45   :  { %961 = vmatprep.mubr.bf16.mxu1 %v1592_v54 }
  0x4b   :  { %587 = vmatmul.mubr.bf16.gmra.mrb[20].mxu0 %v1594_v58 }
  0x4c   :  { %962 = vmatmul.mubr.bf16.gmra.mrb[20].mxu1 %v1594_v58  ;;  %594 = vmatprep.mubr.bf16.mxu0 %v1595_v60 }
  0x4d   :  { %969 = vmatprep.mubr.bf16.mxu1 %v1595_v60 }
  0x53   :  { %595 = vmatmul.mubr.bf16.gmra.mrb[24].mxu0 %v1597_v63 }
  0x54   :  { %970 = vmatmul.mubr.bf16.gmra.mrb[24].mxu1 %v1597_v63  ;;  %602 = vmatprep.mubr.bf16.mxu0 %v1598_v0 }
  0x55   :  { %977 = vmatprep.mubr.bf16.mxu1 %v1598_v0 }
  0x5b   :  { %603 = vmatmul.mubr.bf16.gmra.mrb[28].mxu0 %v1600_v1 }
  0x5c   :  { %978 = vmatmul.mubr.bf16.gmra.mrb[28].mxu1 %v1600_v1  ;;  %610 = vmatprep.mubr.bf16.mxu0 %v1601_v2 }
  0x5d   :  { %985 = vmatprep.mubr.bf16.mxu1 %v1601_v2 }
  0x63   :  { %611 = vmatmul.mubr.bf16.gmra.mrb[32].mxu0 %v1603_v3 }
  0x64   :  { %986 = vmatmul.mubr.bf16.gmra.mrb[32].mxu1 %v1603_v3  ;;  %617 = vmatprep.mubr.bf16.mxu0 %v1604_v4 }
  0x65   :  { %992 = vmatprep.mubr.bf16.mxu1 %v1604_v4 }
  0x6b   :  { %618 = vmatmul.mubr.bf16.gmra.mrb[36].mxu0 %v1606_v5 }
  0x6c   :  { %993 = vmatmul.mubr.bf16.gmra.mrb[36].mxu1 %v1606_v5  ;;  %623 = vmatprep.mubr.bf16.mxu0 %v1607_v6 }
  0x6d   :  { %998 = vmatprep.mubr.bf16.mxu1 %v1607_v6 }
  0x73   :  { %624 = vmatmul.mubr.bf16.gmra.mrb[40].mxu0 %v1609_v7 }
  0x74   :  { %999 = vmatmul.mubr.bf16.gmra.mrb[40].mxu1 %v1609_v7  ;;  %629 = vmatprep.mubr.bf16.mxu0 %v1610_v8 }
  0x75   :  { %1004 = vmatprep.mubr.bf16.mxu1 %v1610_v8 }
  0x7b   :  { %630 = vmatmul.mubr.bf16.gmra.mrb[44].mxu0 %v1612_v9 }
  0x7c   :  { %1005 = vmatmul.mubr.bf16.gmra.mrb[44].mxu1 %v1612_v9  ;;  %635 = vmatprep.mubr.bf16.mxu0 %v1613_v10 }
  0x7d   :  { %1010 = vmatprep.mubr.bf16.mxu1 %v1613_v10 }
  0x83   :  { %636 = vmatmul.mubr.bf16.gmra.mrb[48].mxu0 %v1615_v11 }
  0x84   :  { %1011 = vmatmul.mubr.bf16.gmra.mrb[48].mxu1 %v1615_v11  ;;  %641 = vmatprep.mubr.bf16.mxu0 %v1616_v12 }
  0x85   :  { %1016 = vmatprep.mubr.bf16.mxu1 %v1616_v12 }
  0x8b   :  { %642 = vmatmul.mubr.bf16.gmra.mrb[52].mxu0 %v1618_v13 }
  0x8c   :  { %1017 = vmatmul.mubr.bf16.gmra.mrb[52].mxu1 %v1618_v13  ;;  %647 = vmatprep.mubr.bf16.mxu0 %v1619_v14 }
  0x8d   :  { %1022 = vmatprep.mubr.bf16.mxu1 %v1619_v14  ;;  %v116_v18 = vpop.permute.xlu0 %115 }
  0x8e   :  { %v126_v20 = vpop.permute.xlu1 %125 }
  0x91   :  { %v121_v19 = vpop.permute.xlu0 %120 }
  0x92   :  { %v131_v39 = vpop.permute.xlu1 %130 }
  0x93   :  { %648 = vmatmul.mubr.bf16.gmra.mrb[56].mxu0 %v1621_v15 }
  0x94   :  { %1023 = vmatmul.mubr.bf16.gmra.mrb[56].mxu1 %v1621_v15  ;;  %653 = vmatprep.mubr.bf16.mxu0 %v1622_v16 }
  0x95   :  { %1028 = vmatprep.mubr.bf16.mxu1 %v1622_v16  ;;  %v136_v0 = vpop.permute.xlu0 %135 }
  0x96   :  { %v141_v1 = vpop.permute.xlu1 %140 }
  0x9b   :  { %654 = vmatmul.mubr.bf16.gmra.mrb[60].mxu0 %v1624_v17 }
  0x9c   :  { %1029 = vmatmul.mubr.bf16.gmra.mrb[60].mxu1 %v1624_v17 }
  0xf6   :  { %v1334_v21 = vpop.f32.mrb[0].mxu0 }
  0xf7   :  { %v1446_v22 = vpop.f32.mrb[0].mxu1  ;;  %v1335_v23 = vpop.f32.mrb[1].mxu0 }
  0xf8   :  { %v1447_v24 = vpop.f32.mrb[1].mxu1  ;;  %v1336_v25 = vadd.f32 %v1335_v23, %v1334_v21  ;;  %v1337_v27 = vpop.f32.mrb[2].mxu0 }
  0xf9   :  { %v1448_v26 = vadd.f32 %v1447_v24, %v1446_v22  ;;  %v1449_v28 = vpop.f32.mrb[2].mxu1  ;;  %v1338_v29 = vpop.f32.mrb[3].mxu0 }
  0xfa   :  { %v1450_v30 = vpop.f32.mrb[3].mxu1  ;;  %v549_v31 = vadd.f32 %v1336_v25, %v116_v18  ;;  %v1339_v33 = vadd.f32 %v1338_v29, %v1337_v27  ;;  %v151_v27 = vpop.permute.xlu1 %150 }
  0xfb   :  { %v924_v32 = vadd.f32 %v1448_v26, %v116_v18  ;;  %v1451_v34 = vadd.f32 %v1450_v30, %v1449_v28  ;;  %v146_v26 = vpop.permute.xlu0 %145 }
  0xfc   :  { %v660_v35 = vmax.f32 %v549_v31, 0.0  ;;  %v552_v37 = vadd.f32 %v1339_v33, %v121_v19 }
  0xfd   :  { %v1035_v36 = vmax.f32 %v924_v32, 0.0  ;;  %v927_v38 = vadd.f32 %v1451_v34, %v121_v19 }
  0xfe   :  { %v1286_v40 = vpack.c.bf16 %v660_v35, %v660_v35  ;;  %v661_v42 = vmax.f32 %v552_v37, 0.0  ;;  %v1340_v44 = vpop.f32.mrb[4].mxu0 }
  0xff   :  { %v1302_v41 = vpack.c.bf16 %v1035_v36, %v1035_v36  ;;  %v1036_v43 = vmax.f32 %v927_v38, 0.0  ;;  %v1452_v45 = vpop.f32.mrb[4].mxu1  ;;  %v1341_v46 = vpop.f32.mrb[5].mxu0 }
 0x100   :  { %v1453_v47 = vpop.f32.mrb[5].mxu1  ;;  %742 = vst.msk [vmem:[%s2031_s3] sm:$0xf] %vm741_vm0, %v1286_v40  ;;  %v1287_v48 = vpack.c.bf16 %v661_v42, %v661_v42  ;;  %v1342_v50 = vadd.f32 %v1341_v46, %v1340_v44  ;;  %v1343_v52 = vpop.f32.mrb[6].mxu0 }
 0x101   :  { %1270 = vst.msk [vmem:[%s2031_s3 + $0x40] sm:$0xf] %vm741_vm0, %v1302_v41  ;;  %v1303_v49 = vpack.c.bf16 %v1036_v43, %v1036_v43  ;;  %v1454_v51 = vadd.f32 %v1453_v47, %v1452_v45  ;;  %v1455_v53 = vpop.f32.mrb[6].mxu1  ;;  %v1344_v54 = vpop.f32.mrb[7].mxu0 }
 0x102   :  { %v1456_v55 = vpop.f32.mrb[7].mxu1  ;;  %743 = vst.msk [vmem:[%s2031_s3 + $0x4] sm:$0xf] %vm741_vm0, %v1287_v48  ;;  %v557_v56 = vadd.f32 %v1342_v50, %v126_v20  ;;  %v1345_v58 = vadd.f32 %v1344_v54, %v1343_v52  ;;  %v156_v52 = vpop.permute.xlu0 %155 }
 0x103   :  { %1271 = vst.msk [vmem:[%s2031_s3 + $0x44] sm:$0xf] %vm741_vm0, %v1303_v49  ;;  %v932_v57 = vadd.f32 %v1454_v51, %v126_v20  ;;  %v1457_v59 = vadd.f32 %v1456_v55, %v1455_v53  ;;  %v161_v53 = vpop.permute.xlu1 %160 }
 0x104   :  { %v662_v60 = vmax.f32 %v557_v56, 0.0  ;;  %v560_v62 = vadd.f32 %v1345_v58, %v131_v39 }
 0x105   :  { %v1037_v61 = vmax.f32 %v932_v57, 0.0  ;;  %v935_v63 = vadd.f32 %v1457_v59, %v131_v39 }
 0x106   :  { %v1288_v2 = vpack.c.bf16 %v662_v60, %v662_v60  ;;  %v663_v4 = vmax.f32 %v560_v62, 0.0  ;;  %v1346_v6 = vpop.f32.mrb[8].mxu0 }
 0x107   :  { %v1304_v3 = vpack.c.bf16 %v1037_v61, %v1037_v61  ;;  %v1038_v5 = vmax.f32 %v935_v63, 0.0  ;;  %v1458_v7 = vpop.f32.mrb[8].mxu1  ;;  %v1347_v8 = vpop.f32.mrb[9].mxu0 }
 0x108   :  { %v1459_v9 = vpop.f32.mrb[9].mxu1  ;;  %744 = vst.msk [vmem:[%s2031_s3 + $0x8] sm:$0xf] %vm741_vm0, %v1288_v2  ;;  %v1289_v10 = vpack.c.bf16 %v663_v4, %v663_v4  ;;  %v1348_v12 = vadd.f32 %v1347_v8, %v1346_v6  ;;  %v1349_v14 = vpop.f32.mrb[10].mxu0 }
 0x109   :  { %1272 = vst.msk [vmem:[%s2031_s3 + $0x48] sm:$0xf] %vm741_vm0, %v1304_v3  ;;  %v1305_v11 = vpack.c.bf16 %v1038_v5, %v1038_v5  ;;  %v1460_v13 = vadd.f32 %v1459_v9, %v1458_v7  ;;  %v1461_v15 = vpop.f32.mrb[10].mxu1  ;;  %v1350_v16 = vpop.f32.mrb[11].mxu0 }
 0x10a   :  { %v1462_v17 = vpop.f32.mrb[11].mxu1  ;;  %745 = vst.msk [vmem:[%s2031_s3 + $0xc] sm:$0xf] %vm741_vm0, %v1289_v10  ;;  %v565_v18 = vadd.f32 %v1348_v12, %v136_v0  ;;  %v1351_v20 = vadd.f32 %v1350_v16, %v1349_v14  ;;  %v166_v14 = vpop.permute.xlu0 %165 }
 0x10b   :  { %1273 = vst.msk [vmem:[%s2031_s3 + $0x4c] sm:$0xf] %vm741_vm0, %v1305_v11  ;;  %v940_v19 = vadd.f32 %v1460_v13, %v136_v0  ;;  %v1463_v21 = vadd.f32 %v1462_v17, %v1461_v15  ;;  %v171_v15 = vpop.permute.xlu1 %170 }
 0x10c   :  { %v664_v22 = vmax.f32 %v565_v18, 0.0  ;;  %v568_v24 = vadd.f32 %v1351_v20, %v141_v1 }
 0x10d   :  { %v1039_v23 = vmax.f32 %v940_v19, 0.0  ;;  %v943_v25 = vadd.f32 %v1463_v21, %v141_v1 }
 0x10e   :  { %v1290_v28 = vpack.c.bf16 %v664_v22, %v664_v22  ;;  %v665_v30 = vmax.f32 %v568_v24, 0.0  ;;  %v1352_v32 = vpop.f32.mrb[12].mxu0 }
 0x10f   :  { %v1306_v29 = vpack.c.bf16 %v1039_v23, %v1039_v23  ;;  %v1040_v31 = vmax.f32 %v943_v25, 0.0  ;;  %v1464_v33 = vpop.f32.mrb[12].mxu1  ;;  %v1353_v34 = vpop.f32.mrb[13].mxu0 }
 0x110   :  { %v1465_v35 = vpop.f32.mrb[13].mxu1  ;;  %746 = vst.msk [vmem:[%s2031_s3 + $0x10] sm:$0xf] %vm741_vm0, %v1290_v28  ;;  %v1291_v36 = vpack.c.bf16 %v665_v30, %v665_v30  ;;  %v1354_v38 = vadd.f32 %v1353_v34, %v1352_v32  ;;  %v1355_v40 = vpop.f32.mrb[14].mxu0 }
 0x111   :  { %1274 = vst.msk [vmem:[%s2031_s3 + $0x50] sm:$0xf] %vm741_vm0, %v1306_v29  ;;  %v1307_v37 = vpack.c.bf16 %v1040_v31, %v1040_v31  ;;  %v1466_v39 = vadd.f32 %v1465_v35, %v1464_v33  ;;  %v1467_v41 = vpop.f32.mrb[14].mxu1  ;;  %v1356_v42 = vpop.f32.mrb[15].mxu0 }
 0x112   :  { %v1468_v43 = vpop.f32.mrb[15].mxu1  ;;  %747 = vst.msk [vmem:[%s2031_s3 + $0x14] sm:$0xf] %vm741_vm0, %v1291_v36  ;;  %v573_v44 = vadd.f32 %v1354_v38, %v146_v26  ;;  %v1357_v46 = vadd.f32 %v1356_v42, %v1355_v40  ;;  %v176_v40 = vpop.permute.xlu0 %175 }
 0x113   :  { %1275 = vst.msk [vmem:[%s2031_s3 + $0x54] sm:$0xf] %vm741_vm0, %v1307_v37  ;;  %v948_v45 = vadd.f32 %v1466_v39, %v146_v26  ;;  %v1469_v47 = vadd.f32 %v1468_v43, %v1467_v41  ;;  %v181_v41 = vpop.permute.xlu1 %180 }
 0x114   :  { %v666_v48 = vmax.f32 %v573_v44, 0.0  ;;  %v576_v50 = vadd.f32 %v1357_v46, %v151_v27 }
 0x115   :  { %v1041_v49 = vmax.f32 %v948_v45, 0.0  ;;  %v951_v51 = vadd.f32 %v1469_v47, %v151_v27 }
 0x116   :  { %v1292_v54 = vpack.c.bf16 %v666_v48, %v666_v48  ;;  %v667_v56 = vmax.f32 %v576_v50, 0.0  ;;  %v1358_v58 = vpop.f32.mrb[16].mxu0 }
 0x117   :  { %v1308_v55 = vpack.c.bf16 %v1041_v49, %v1041_v49  ;;  %v1042_v57 = vmax.f32 %v951_v51, 0.0  ;;  %v1470_v59 = vpop.f32.mrb[16].mxu1  ;;  %v1359_v60 = vpop.f32.mrb[17].mxu0 }
 0x118   :  { %v1471_v61 = vpop.f32.mrb[17].mxu1  ;;  %748 = vst.msk [vmem:[%s2031_s3 + $0x18] sm:$0xf] %vm741_vm0, %v1292_v54  ;;  %v1293_v62 = vpack.c.bf16 %v667_v56, %v667_v56  ;;  %v1360_v0 = vadd.f32 %v1359_v60, %v1358_v58  ;;  %v1361_v2 = vpop.f32.mrb[18].mxu0 }
 0x119   :  { %1276 = vst.msk [vmem:[%s2031_s3 + $0x58] sm:$0xf] %vm741_vm0, %v1308_v55  ;;  %v1309_v63 = vpack.c.bf16 %v1042_v57, %v1042_v57  ;;  %v1472_v1 = vadd.f32 %v1471_v61, %v1470_v59  ;;  %v1473_v3 = vpop.f32.mrb[18].mxu1  ;;  %v1362_v4 = vpop.f32.mrb[19].mxu0 }
 0x11a   :  { %v1474_v5 = vpop.f32.mrb[19].mxu1  ;;  %749 = vst.msk [vmem:[%s2031_s3 + $0x1c] sm:$0xf] %vm741_vm0, %v1293_v62  ;;  %v581_v6 = vadd.f32 %v1360_v0, %v156_v52  ;;  %v1363_v8 = vadd.f32 %v1362_v4, %v1361_v2  ;;  %v186_v2 = vpop.permute.xlu0 %185 }
 0x11b   :  { %1277 = vst.msk [vmem:[%s2031_s3 + $0x5c] sm:$0xf] %vm741_vm0, %v1309_v63  ;;  %v956_v7 = vadd.f32 %v1472_v1, %v156_v52  ;;  %v1475_v9 = vadd.f32 %v1474_v5, %v1473_v3  ;;  %v191_v3 = vpop.permute.xlu1 %190 }
 0x11c   :  { %v668_v10 = vmax.f32 %v581_v6, 0.0  ;;  %v584_v12 = vadd.f32 %v1363_v8, %v161_v53 }
 0x11d   :  { %v1043_v11 = vmax.f32 %v956_v7, 0.0  ;;  %v959_v13 = vadd.f32 %v1475_v9, %v161_v53 }
 0x11e   :  { %v1294_v16 = vpack.c.bf16 %v668_v10, %v668_v10  ;;  %v669_v18 = vmax.f32 %v584_v12, 0.0  ;;  %v1364_v20 = vpop.f32.mrb[20].mxu0 }
 0x11f   :  { %v1310_v17 = vpack.c.bf16 %v1043_v11, %v1043_v11  ;;  %v1044_v19 = vmax.f32 %v959_v13, 0.0  ;;  %v1476_v21 = vpop.f32.mrb[20].mxu1  ;;  %v1365_v22 = vpop.f32.mrb[21].mxu0 }
 0x120   :  { %v1477_v23 = vpop.f32.mrb[21].mxu1  ;;  %750 = vst.msk [vmem:[%s2031_s3 + $0x20] sm:$0xf] %vm741_vm0, %v1294_v16  ;;  %v1295_v24 = vpack.c.bf16 %v669_v18, %v669_v18  ;;  %v1366_v26 = vadd.f32 %v1365_v22, %v1364_v20  ;;  %v1367_v28 = vpop.f32.mrb[22].mxu0 }
 0x121   :  { %1278 = vst.msk [vmem:[%s2031_s3 + $0x60] sm:$0xf] %vm741_vm0, %v1310_v17  ;;  %v1311_v25 = vpack.c.bf16 %v1044_v19, %v1044_v19  ;;  %v1478_v27 = vadd.f32 %v1477_v23, %v1476_v21  ;;  %v1479_v29 = vpop.f32.mrb[22].mxu1  ;;  %v1368_v30 = vpop.f32.mrb[23].mxu0 }
 0x122   :  { %v1480_v31 = vpop.f32.mrb[23].mxu1  ;;  %751 = vst.msk [vmem:[%s2031_s3 + $0x24] sm:$0xf] %vm741_vm0, %v1295_v24  ;;  %v589_v32 = vadd.f32 %v1366_v26, %v166_v14  ;;  %v1369_v34 = vadd.f32 %v1368_v30, %v1367_v28  ;;  %v196_v28 = vpop.permute.xlu0 %195 }
 0x123   :  { %1279 = vst.msk [vmem:[%s2031_s3 + $0x64] sm:$0xf] %vm741_vm0, %v1311_v25  ;;  %v964_v33 = vadd.f32 %v1478_v27, %v166_v14  ;;  %v1481_v35 = vadd.f32 %v1480_v31, %v1479_v29 }
 0x124   :  { %v670_v36 = vmax.f32 %v589_v32, 0.0  ;;  %v592_v38 = vadd.f32 %v1369_v34, %v171_v15 }
 0x125   :  { %v1045_v37 = vmax.f32 %v964_v33, 0.0  ;;  %v967_v39 = vadd.f32 %v1481_v35, %v171_v15 }
 0x126   :  { %v1296_v42 = vpack.c.bf16 %v670_v36, %v670_v36  ;;  %v671_v44 = vmax.f32 %v592_v38, 0.0  ;;  %v1370_v46 = vpop.f32.mrb[24].mxu0 }
 0x127   :  { %v1312_v43 = vpack.c.bf16 %v1045_v37, %v1045_v37  ;;  %v1046_v45 = vmax.f32 %v967_v39, 0.0  ;;  %v1482_v47 = vpop.f32.mrb[24].mxu1  ;;  %v1371_v48 = vpop.f32.mrb[25].mxu0 }
 0x128   :  { %v1483_v49 = vpop.f32.mrb[25].mxu1  ;;  %752 = vst.msk [vmem:[%s2031_s3 + $0x28] sm:$0xf] %vm741_vm0, %v1296_v42  ;;  %v1297_v50 = vpack.c.bf16 %v671_v44, %v671_v44  ;;  %v1372_v52 = vadd.f32 %v1371_v48, %v1370_v46  ;;  %v1373_v54 = vpop.f32.mrb[26].mxu0 }
 0x129   :  { %1280 = vst.msk [vmem:[%s2031_s3 + $0x68] sm:$0xf] %vm741_vm0, %v1312_v43  ;;  %v1313_v51 = vpack.c.bf16 %v1046_v45, %v1046_v45  ;;  %v1484_v53 = vadd.f32 %v1483_v49, %v1482_v47  ;;  %v1485_v55 = vpop.f32.mrb[26].mxu1  ;;  %v1374_v56 = vpop.f32.mrb[27].mxu0 }
 0x12a   :  { %v1486_v57 = vpop.f32.mrb[27].mxu1  ;;  %753 = vst.msk [vmem:[%s2031_s3 + $0x2c] sm:$0xf] %vm741_vm0, %v1297_v50  ;;  %v597_v58 = vadd.f32 %v1372_v52, %v176_v40  ;;  %v1375_v60 = vadd.f32 %v1374_v56, %v1373_v54 }
 0x12b   :  { %1281 = vst.msk [vmem:[%s2031_s3 + $0x6c] sm:$0xf] %vm741_vm0, %v1313_v51  ;;  %v972_v59 = vadd.f32 %v1484_v53, %v176_v40  ;;  %v1487_v61 = vadd.f32 %v1486_v57, %v1485_v55 }
 0x12c   :  { %v672_v62 = vmax.f32 %v597_v58, 0.0  ;;  %v600_v0 = vadd.f32 %v1375_v60, %v181_v41 }
 0x12d   :  { %v1047_v63 = vmax.f32 %v972_v59, 0.0  ;;  %v975_v1 = vadd.f32 %v1487_v61, %v181_v41 }
 0x12e   :  { %v1298_v4 = vpack.c.bf16 %v672_v62, %v672_v62  ;;  %v673_v6 = vmax.f32 %v600_v0, 0.0  ;;  %v1376_v8 = vpop.f32.mrb[28].mxu0 }
 0x12f   :  { %v1314_v5 = vpack.c.bf16 %v1047_v63, %v1047_v63  ;;  %v1048_v7 = vmax.f32 %v975_v1, 0.0  ;;  %v1488_v9 = vpop.f32.mrb[28].mxu1  ;;  %v1377_v10 = vpop.f32.mrb[29].mxu0 }
 0x130   :  { %v1489_v11 = vpop.f32.mrb[29].mxu1  ;;  %754 = vst.msk [vmem:[%s2031_s3 + $0x30] sm:$0xf] %vm741_vm0, %v1298_v4  ;;  %v1299_v12 = vpack.c.bf16 %v673_v6, %v673_v6  ;;  %v1378_v14 = vadd.f32 %v1377_v10, %v1376_v8  ;;  %v1379_v16 = vpop.f32.mrb[30].mxu0 }
 0x131   :  { %1282 = vst.msk [vmem:[%s2031_s3 + $0x70] sm:$0xf] %vm741_vm0, %v1314_v5  ;;  %v1315_v13 = vpack.c.bf16 %v1048_v7, %v1048_v7  ;;  %v1490_v15 = vadd.f32 %v1489_v11, %v1488_v9  ;;  %v1491_v17 = vpop.f32.mrb[30].mxu1  ;;  %v1380_v18 = vpop.f32.mrb[31].mxu0 }
 0x132   :  { %v1492_v19 = vpop.f32.mrb[31].mxu1  ;;  %755 = vst.msk [vmem:[%s2031_s3 + $0x34] sm:$0xf] %vm741_vm0, %v1299_v12  ;;  %v605_v20 = vadd.f32 %v1378_v14, %v186_v2  ;;  %v1381_v22 = vadd.f32 %v1380_v18, %v1379_v16 }
 0x133   :  { %1283 = vst.msk [vmem:[%s2031_s3 + $0x74] sm:$0xf] %vm741_vm0, %v1315_v13  ;;  %v980_v21 = vadd.f32 %v1490_v15, %v186_v2  ;;  %v1493_v23 = vadd.f32 %v1492_v19, %v1491_v17 }
 0x134   :  { %v674_v24 = vmax.f32 %v605_v20, 0.0  ;;  %v608_v26 = vadd.f32 %v1381_v22, %v191_v3 }
 0x135   :  { %v1049_v25 = vmax.f32 %v980_v21, 0.0  ;;  %v983_v27 = vadd.f32 %v1493_v23, %v191_v3 }
 0x136   :  { %v1300_v29 = vpack.c.bf16 %v674_v24, %v674_v24  ;;  %v675_v31 = vmax.f32 %v608_v26, 0.0  ;;  %v1382_v33 = vpop.f32.mrb[32].mxu0 }
 0x137   :  { %v1316_v30 = vpack.c.bf16 %v1049_v25, %v1049_v25  ;;  %v1050_v32 = vmax.f32 %v983_v27, 0.0  ;;  %v1494_v34 = vpop.f32.mrb[32].mxu1  ;;  %v1383_v35 = vpop.f32.mrb[33].mxu0 }
 0x138   :  { %v1495_v36 = vpop.f32.mrb[33].mxu1  ;;  %756 = vst.msk [vmem:[%s2031_s3 + $0x38] sm:$0xf] %vm741_vm0, %v1300_v29  ;;  %v1301_v37 = vpack.c.bf16 %v675_v31, %v675_v31  ;;  %v1384_v39 = vadd.f32 %v1383_v35, %v1382_v33  ;;  %v1385_v41 = vpop.f32.mrb[34].mxu0 }
 0x139   :  { %1284 = vst.msk [vmem:[%s2031_s3 + $0x78] sm:$0xf] %vm741_vm0, %v1316_v30  ;;  %v1317_v38 = vpack.c.bf16 %v1050_v32, %v1050_v32  ;;  %v1496_v40 = vadd.f32 %v1495_v36, %v1494_v34  ;;  %v1497_v42 = vpop.f32.mrb[34].mxu1  ;;  %v1386_v43 = vpop.f32.mrb[35].mxu0 }
 0x13a   :  { %v1498_v44 = vpop.f32.mrb[35].mxu1  ;;  %757 = vst.msk [vmem:[%s2031_s3 + $0x3c] sm:$0xf] %vm741_vm0, %v1301_v37  ;;  %v613_v45 = vadd.f32 %v1384_v39, %v196_v28 }
 0x13b   :  { %1285 = vst.msk [vmem:[%s2031_s3 + $0x7c] sm:$0xf] %vm741_vm0, %v1317_v38  ;;  %v988_v46 = vadd.f32 %v1496_v40, %v196_v28 }
 0x13c   :  { %v676_v47 = vmax.f32 %v613_v45, 0.0 }
 0x13d   :  { %v1051_v48 = vmax.f32 %v988_v46, 0.0 }
 0x13e   :  { %759 = vst.msk [vmem:[%s2032_s4] sm:$0x1] %vm758_vm1, %v676_v47  ;;  %v1388_v49 = vpop.f32.mrb[36].mxu0 }
 0x13f   :  { %1133 = vst.msk [vmem:[%s2032_s4 + $0x1] sm:$0x1] %vm758_vm1, %v1051_v48  ;;  %v1500_v50 = vpop.f32.mrb[36].mxu1  ;;  %v1389_v51 = vpop.f32.mrb[37].mxu0 }
 0x140   :  { %v1501_v52 = vpop.f32.mrb[37].mxu1  ;;  %v1391_v53 = vpop.f32.mrb[38].mxu0 }
 0x141   :  { %v1503_v54 = vpop.f32.mrb[38].mxu1  ;;  %v1392_v55 = vpop.f32.mrb[39].mxu0 }
 0x142   :  { %v1504_v56 = vpop.f32.mrb[39].mxu1 }
 0x146   :  { %v1394_v57 = vpop.f32.mrb[40].mxu0 }
 0x147   :  { %v1506_v58 = vpop.f32.mrb[40].mxu1  ;;  %v1395_v59 = vpop.f32.mrb[41].mxu0 }
 0x148   :  { %v1507_v60 = vpop.f32.mrb[41].mxu1  ;;  %v1397_v61 = vpop.f32.mrb[42].mxu0 }
 0x149   :  { %v1509_v62 = vpop.f32.mrb[42].mxu1  ;;  %v1398_v63 = vpop.f32.mrb[43].mxu0 }
 0x14a   :  { %v1510_v0 = vpop.f32.mrb[43].mxu1 }
 0x14e   :  { %v1400_v1 = vpop.f32.mrb[44].mxu0 }
 0x14f   :  { %v1512_v2 = vpop.f32.mrb[44].mxu1  ;;  %v1401_v3 = vpop.f32.mrb[45].mxu0 }
 0x150   :  { %v1513_v4 = vpop.f32.mrb[45].mxu1  ;;  %v1403_v5 = vpop.f32.mrb[46].mxu0 }
 0x151   :  { %v1515_v6 = vpop.f32.mrb[46].mxu1  ;;  %v1404_v7 = vpop.f32.mrb[47].mxu0 }
 0x152   :  { %v1516_v8 = vpop.f32.mrb[47].mxu1 }
 0x156   :  { %v1406_v9 = vpop.f32.mrb[48].mxu0 }
 0x157   :  { %v1518_v10 = vpop.f32.mrb[48].mxu1  ;;  %v1407_v11 = vpop.f32.mrb[49].mxu0 }
 0x158   :  { %v1519_v12 = vpop.f32.mrb[49].mxu1  ;;  %v1409_v13 = vpop.f32.mrb[50].mxu0 }
 0x159   :  { %v1521_v14 = vpop.f32.mrb[50].mxu1  ;;  %v1410_v15 = vpop.f32.mrb[51].mxu0 }
 0x15a   :  { %v1522_v16 = vpop.f32.mrb[51].mxu1 }
 0x15e   :  { %v1412_v17 = vpop.f32.mrb[52].mxu0 }
 0x15f   :  { %v1524_v18 = vpop.f32.mrb[52].mxu1  ;;  %v1413_v19 = vpop.f32.mrb[53].mxu0 }
 0x160   :  { %v1525_v20 = vpop.f32.mrb[53].mxu1  ;;  %v1415_v21 = vpop.f32.mrb[54].mxu0 }
 0x161   :  { %v1527_v22 = vpop.f32.mrb[54].mxu1  ;;  %v1416_v23 = vpop.f32.mrb[55].mxu0 }
 0x162   :  { %v1528_v24 = vpop.f32.mrb[55].mxu1 }
 0x166   :  { %v1418_v25 = vpop.f32.mrb[56].mxu0 }
 0x167   :  { %v1530_v26 = vpop.f32.mrb[56].mxu1  ;;  %v1419_v27 = vpop.f32.mrb[57].mxu0 }
 0x168   :  { %v1531_v28 = vpop.f32.mrb[57].mxu1  ;;  %v1421_v29 = vpop.f32.mrb[58].mxu0 }
 0x169   :  { %v1533_v30 = vpop.f32.mrb[58].mxu1  ;;  %v1422_v31 = vpop.f32.mrb[59].mxu0 }
 0x16a   :  { %v1534_v32 = vpop.f32.mrb[59].mxu1 }
 0x16e   :  { %v1424_v33 = vpop.f32.mrb[60].mxu0 }
 0x16f   :  { %v1536_v34 = vpop.f32.mrb[60].mxu1  ;;  %v1425_v35 = vpop.f32.mrb[61].mxu0 }
 0x170   :  { %v1537_v36 = vpop.f32.mrb[61].mxu1  ;;  %v1427_v37 = vpop.f32.mrb[62].mxu0 }
 0x171   :  { %v1539_v38 = vpop.f32.mrb[62].mxu1  ;;  %v1428_v39 = vpop.f32.mrb[63].mxu0 }
 0x172   :  { %v1540_v40 = vpop.f32.mrb[63].mxu1 }

// kernel: out_block_forward.5
= control target key start
LH: loop header
LB: loop body
LE: loop exit
PB: predicated region body
PF: predicated region fallthrough
CT: control target
= control target key end

     0   :  { %v1547_v0 = vmov 0.0|0.0   ;;  %vm1023_vm0 = vmmov 0   ;;  %v1024_v4 = vmov 0.0   ;;  %v51_v5 = vlaneseq  ;;  %s1539_s2 = inlined_call_operand.vmem [shape: f32[64,64], index: 2, kind: input, shape index: {}]   ;;  %s1540_s0 = inlined_call_operand.vmem [shape: f32[2,5120], index: 0, kind: input, shape index: {}]   ;;  %s1541_s1 = inlined_call_operand.vmem [shape: f32[2,64], index: 1, kind: input, shape index: {}]   ;;  %s1542_s4 = inlined_call_operand.vmem [shape: f32[64,1], index: 4, kind: input, shape index: {}]   ;;  %s1543_s3 = inlined_call_operand.vmem [shape: f32[1,64], index: 3, kind: input, shape index: {}]   ;;  %s1544_s5 = inlined_call_operand.<no memory space> [shape: f32[1,1], index: 5, kind: input, shape index: {}]   ;;  %s1545_s6 = inlined_call_operand.vmem [shape: f32[2,5120], index: 6, kind: output, shape index: {0}]   ;;  %s1546_s7 = inlined_call_operand.vmem [shape: f32[2,1], index: 7, kind: output, shape index: {1}]  }
   0x1   :  { %959 = vmatprep.subr.bf16.mxu0 %v1547_v0  ;;  %v710_v1 = vld [vmem:[%s1539_s2] sm:$0xff]  ;;  %v711_v2 = vld [vmem:[%s1539_s2 + $0x8] sm:$0xff]  ;;  %v712_v3 = vld [vmem:[%s1539_s2 + $0x10] sm:$0xff]  ;;  %937 = vmatprep.mubr.msk.f32.mxu0 %vm1023_vm0, %v1024_v4  ;;  %v1025_v10 = vmov 1983009808   ;;  %vm257_vm1 = vcmask 1041408  }
   0x2   :  { %v960_v6 = vpack.c.bf16 %v711_v2, %v710_v1  ;;  %v713_v7 = vld [vmem:[%s1539_s2 + $0x18] sm:$0xff]  ;;  %v714_v8 = vld [vmem:[%s1539_s2 + $0x20] sm:$0xff]  ;;  %v715_v9 = vld [vmem:[%s1539_s2 + $0x28] sm:$0xff]  ;;  %v49_v11 = vunpack.c.l.s4 %v1025_v10  ;;  %971 = vmatprep.subr.bf16.mxu1 %v1547_v0  ;;  %956 = vmatprep.mubr.msk.f32.mxu1 %vm1023_vm0, %v1024_v4  ;;  %v1097_v14 = vshrl.u32 %v51_v5, 7  ;;  %vm725_vm2 = vcmask 523264  }
   0x3   :  { %v1090_v12 = vld [vmem:[%s1539_s2 + $0x30] sm:$0xff]  ;;  %v1095_v13 = vld [vmem:[%s1539_s2 + $0x38] sm:$0xff]  ;;  %v963_v15 = vpack.c.bf16 %v713_v7, %v712_v3  ;;  %v1102_v16 = vld [vmem:[%s1540_s0] sm:$0xff]  ;;  %v966_v20 = vpack.c.bf16 %v715_v9, %v714_v8  ;;  %vm889_vm3 = vcmask 1024  }
   0x4   :  { %961 = vmatpush3.bf16.msra.mxu0 %v960_v6  ;;  %v1107_v17 = vld [vmem:[%s1540_s0 + $0x8] sm:$0xff]  ;;  %v1112_v18 = vld [vmem:[%s1540_s0 + $0x10] sm:$0xff]  ;;  %v50_v19 = vunpack.c.0.s8 %v49_v11  ;;  %v1118_v21 = vld [vmem:[%s1540_s0 + $0x18] sm:$0xff]  ;;  %v47_v24 = vcombine.high %v1102_v16, %v1102_v16  ;;  %v969_v27 = vpack.c.bf16 %v1095_v13, %v1090_v12 }
   0x5   :  { %962 = vmatprep.subr.bf16.mxu0 %v1547_v0  ;;  %v1123_v22 = vld [vmem:[%s1540_s0 + $0x20] sm:$0xff]  ;;  %v1128_v23 = vld [vmem:[%s1540_s0 + $0x28] sm:$0xff]  ;;  %v64_v25 = vcombine.high %v1107_v17, %v1107_v17  ;;  %v81_v26 = vcombine.high %v1112_v18, %v1112_v18  ;;  %v1141_v28 = vld [vmem:[%s1540_s0 + $0x30] sm:$0xff]  ;;  %v98_v32 = vcombine.high %v1118_v21, %v1118_v21 }
   0x6   :  { %v1146_v29 = vld [vmem:[%s1540_s0 + $0x38] sm:$0xff]  ;;  %v1151_v30 = vld [vmem:[%s1540_s0 + $0x40] sm:$0xff]  ;;  %v1154_v31 = vsub.s32 %v50_v19, %v1097_v14  ;;  %v115_v33 = vcombine.high %v1123_v22, %v1123_v22  ;;  %v132_v34 = vcombine.high %v1128_v23, %v1128_v23  ;;  %v149_v35 = vcombine.high %v1141_v28, %v1141_v28  ;;  %v1205_v58 = vld [vmem:[%s1540_s0 + $0x48] sm:$0xff] }
   0x7   :  { %v166_v36 = vcombine.high %v1146_v29, %v1146_v29  ;;  %v183_v37 = vcombine.high %v1151_v30, %v1151_v30  ;;  %v709_v8 = vld [vmem:[%s1541_s1] sm:$0x3]  ;;  %v200_v11 = vcombine.high %v1205_v58, %v1205_v58 }
   0x8   :  { %964 = vmatpush3.bf16.msra.mxu0 %v963_v15  ;;  %v54_v38 = vrot.slane %v1102_v16, %v1154_v31  ;;  %v61_v39 = vrot.slane %v47_v24, %v1154_v31  ;;  %v71_v40 = vrot.slane %v1107_v17, %v1154_v31  ;;  %v78_v41 = vrot.slane %v64_v25, %v1154_v31 }
   0x9   :  { %965 = vmatprep.subr.bf16.mxu0 %v1547_v0  ;;  %v88_v42 = vrot.slane %v1112_v18, %v1154_v31  ;;  %v95_v43 = vrot.slane %v81_v26, %v1154_v31  ;;  %v1180_v44 = vrot.slane %v1118_v21, %v1154_v31  ;;  %v1183_v45 = vrot.slane %v98_v32, %v1154_v31 }
   0xa   :  { %v62_v46 = vcombine.high %v54_v38, %v54_v38  ;;  %v63_v47 = vcombine.high %v61_v39, %v61_v39  ;;  %v79_v48 = vcombine.high %v71_v40, %v71_v40  ;;  %v80_v49 = vcombine.high %v78_v41, %v78_v41 }
   0xb   :  { %v96_v50 = vcombine.high %v88_v42, %v88_v42  ;;  %v97_v51 = vcombine.high %v95_v43, %v95_v43  ;;  %v113_v52 = vcombine.high %v1180_v44, %v1180_v44  ;;  %v114_v53 = vcombine.high %v1183_v45, %v1183_v45 }
   0xc   :  { %967 = vmatpush3.bf16.msra.mxu0 %v966_v20  ;;  %v122_v54 = vrot.slane %v1123_v22, %v1154_v31  ;;  %v1192_v55 = vrot.slane %v115_v33, %v1154_v31  ;;  %v1196_v56 = vrot.slane %v1128_v23, %v1154_v31  ;;  %v1199_v57 = vrot.slane %v132_v34, %v1154_v31 }
   0xd   :  { %968 = vmatprep.subr.bf16.mxu0 %v1547_v0  ;;  %v1209_v59 = vrot.slane %v1141_v28, %v1154_v31  ;;  %v1212_v60 = vrot.slane %v149_v35, %v1154_v31  ;;  %v1216_v61 = vrot.slane %v1146_v29, %v1154_v31  ;;  %v1219_v62 = vrot.slane %v166_v36, %v1154_v31 }
   0xe   :  { %v130_v63 = vcombine.high %v122_v54, %v122_v54  ;;  %v131_v1 = vcombine.high %v1192_v55, %v1192_v55  ;;  %v147_v2 = vcombine.high %v1196_v56, %v1196_v56  ;;  %v148_v3 = vcombine.high %v1199_v57, %v1199_v57 }
   0xf   :  { %v164_v4 = vcombine.high %v1209_v59, %v1209_v59  ;;  %v165_v5 = vcombine.high %v1212_v60, %v1212_v60  ;;  %v181_v6 = vcombine.high %v1216_v61, %v1216_v61  ;;  %v182_v7 = vcombine.high %v1219_v62, %v1219_v62 }
  0x10   :  { %970 = vmatpush3.bf16.msra.mxu0 %v969_v27  ;;  %v1240_v9 = vrot.slane %v1151_v30, %v1154_v31  ;;  %v1243_v10 = vrot.slane %v183_v37, %v1154_v31  ;;  %v1249_v12 = vrot.slane %v1205_v58, %v1154_v31  ;;  %v258_v13 = vsel %vm257_vm1, %v54_v38, -inf }
  0x11   :  { %v259_v15 = vsel %vm257_vm1, %v62_v46, -inf  ;;  %v260_v19 = vsel %vm257_vm1, %v61_v39, -inf  ;;  %v261_v20 = vsel %vm257_vm1, %v63_v47, -inf  ;;  %v1260_v26 = vrot.slane %v200_v11, %v1154_v31 }
  0x12   :  { %v198_v24 = vcombine.high %v1240_v9, %v1240_v9  ;;  %v199_v25 = vcombine.high %v1243_v10, %v1243_v10  ;;  %v262_v32 = vsel %vm257_vm1, %v71_v40, -inf  ;;  %v264_v33 = vsel %vm257_vm1, %v79_v48, -inf }
  0x13   :  { %938 = vmatmul.mubr.msk.f32.vlgmr.msra.gmra.mrb[0].mxu0 %vm725_vm2, %v709_v8  ;;  %v266_v34 = vsel %vm257_vm1, %v78_v41, -inf  ;;  %v268_v35 = vsel %vm257_vm1, %v80_v49, -inf  ;;  %v216_v36 = vcombine.high %v1260_v26, %v1260_v26  ;;  %v263_v37 = vmax.f32 %v258_v13, %v262_v32 }
  0x14   :  { %v265_v38 = vmax.f32 %v259_v15, %v264_v33  ;;  %v267_v39 = vmax.f32 %v260_v19, %v266_v34  ;;  %v269_v46 = vmax.f32 %v261_v20, %v268_v35  ;;  %v270_v47 = vsel %vm257_vm1, %v88_v42, -inf }
  0x15   :  { %v272_v11 = vsel %vm257_vm1, %v96_v50, -inf  ;;  %v274_v8 = vsel %vm257_vm1, %v95_v43, -inf  ;;  %v271_v40 = vmax.f32 %v263_v37, %v270_v47  ;;  %v276_v41 = vsel %vm257_vm1, %v97_v51, -inf }
  0x16   :  { %v273_v0 = vmax.f32 %v265_v38, %v272_v11  ;;  %v275_v48 = vmax.f32 %v267_v39, %v274_v8  ;;  %v277_v27 = vmax.f32 %v269_v46, %v276_v41  ;;  %v278_v49 = vsel %vm257_vm1, %v1180_v44, -inf }
  0x17   :  { %v280_v13 = vsel %vm257_vm1, %v113_v52, -inf  ;;  %v282_v15 = vsel %vm257_vm1, %v1183_v45, -inf  ;;  %v279_v19 = vmax.f32 %v271_v40, %v278_v49  ;;  %v284_v50 = vsel %vm257_vm1, %v114_v53, -inf }
  0x18   :  { %v281_v42 = vmax.f32 %v273_v0, %v280_v13  ;;  %v283_v20 = vmax.f32 %v275_v48, %v282_v15  ;;  %v285_v43 = vmax.f32 %v277_v27, %v284_v50  ;;  %v286_v32 = vsel %vm257_vm1, %v122_v54, -inf }
  0x19   :  { %v288_v33 = vsel %vm257_vm1, %v130_v63, -inf  ;;  %v290_v51 = vsel %vm257_vm1, %v1192_v55, -inf  ;;  %v287_v34 = vmax.f32 %v279_v19, %v286_v32  ;;  %v292_v52 = vsel %vm257_vm1, %v131_v1, -inf }
  0x1a   :  { %v289_v44 = vmax.f32 %v281_v42, %v288_v33  ;;  %v291_v35 = vmax.f32 %v283_v20, %v290_v51  ;;  %v293_v37 = vmax.f32 %v285_v43, %v292_v52  ;;  %v294_v0 = vsel %vm257_vm1, %v1196_v56, -inf }
  0x1b   :  { %v296_v45 = vsel %vm257_vm1, %v147_v2, -inf  ;;  %v298_v53 = vsel %vm257_vm1, %v1199_v57, -inf  ;;  %v295_v54 = vmax.f32 %v287_v34, %v294_v0  ;;  %v300_v38 = vsel %vm257_vm1, %v148_v3, -inf  ;;  %v801_v34 = vld [vmem:[%s1542_s4 + $0x8] sm:$0xff] }
  0x1c   :  { %v297_v27 = vmax.f32 %v289_v44, %v296_v45  ;;  %v299_v63 = vmax.f32 %v291_v35, %v298_v53  ;;  %v301_v55 = vmax.f32 %v293_v37, %v300_v38  ;;  %v302_v39 = vsel %vm257_vm1, %v1209_v59, -inf  ;;  %v802_v44 = vld [vmem:[%s1542_s4 + $0x10] sm:$0xff]  ;;  %v804_v37 = vld [vmem:[%s1542_s4 + $0x20] sm:$0xff]  ;;  %v805_v0 = vld [vmem:[%s1542_s4 + $0x28] sm:$0xff] }
  0x1d   :  { %v304_v1 = vsel %vm257_vm1, %v164_v4, -inf  ;;  %v306_v46 = vsel %vm257_vm1, %v1212_v60, -inf  ;;  %v303_v56 = vmax.f32 %v295_v54, %v302_v39  ;;  %v308_v57 = vsel %vm257_vm1, %v165_v5, -inf  ;;  %v806_v53 = vld [vmem:[%s1542_s4 + $0x30] sm:$0xff]  ;;  %v807_v54 = vld [vmem:[%s1542_s4 + $0x38] sm:$0xff] }
  0x1e   :  { %v305_v47 = vmax.f32 %v297_v27, %v304_v1  ;;  %v307_v2 = vmax.f32 %v299_v63, %v306_v46  ;;  %v309_v11 = vmax.f32 %v301_v55, %v308_v57  ;;  %v310_v3 = vsel %vm257_vm1, %v1216_v61, -inf }
  0x1f   :  { %v312_v59 = vsel %vm257_vm1, %v181_v6, -inf  ;;  %v314_v4 = vsel %vm257_vm1, %v1219_v62, -inf  ;;  %v311_v8 = vmax.f32 %v303_v56, %v310_v3  ;;  %v316_v60 = vsel %vm257_vm1, %v182_v7, -inf }
  0x20   :  { %v313_v40 = vmax.f32 %v305_v47, %v312_v59  ;;  %v315_v48 = vmax.f32 %v307_v2, %v314_v4  ;;  %v317_v5 = vmax.f32 %v309_v11, %v316_v60  ;;  %v318_v41 = vsel %vm257_vm1, %v1240_v9, -inf }
  0x21   :  { %v320_v61 = vsel %vm257_vm1, %v198_v24, -inf  ;;  %v322_v6 = vsel %vm257_vm1, %v1243_v10, -inf  ;;  %v319_v49 = vmax.f32 %v311_v8, %v318_v41  ;;  %v324_v62 = vsel %vm257_vm1, %v199_v25, -inf }
  0x22   :  { %v321_v13 = vmax.f32 %v313_v40, %v320_v61  ;;  %v323_v15 = vmax.f32 %v315_v48, %v322_v6  ;;  %v325_v7 = vmax.f32 %v317_v5, %v324_v62  ;;  %v326_v19 = vsel %vm257_vm1, %v1249_v12, -inf }
  0x23   :  { %v1549_v9 = vcombine.high %v1249_v12, %v1249_v12  ;;  %v330_v42 = vsel %vm257_vm1, %v1260_v26, -inf  ;;  %v327_v20 = vmax.f32 %v319_v49, %v326_v19  ;;  %v332_v10 = vsel %vm257_vm1, %v216_v36, -inf  ;;  %v800_v12 = vld [vmem:[%s1542_s4] sm:$0xff]  ;;  %v803_v36 = vld [vmem:[%s1542_s4 + $0x18] sm:$0xff] }
  0x24   :  { %v331_v43 = vmax.f32 %v323_v15, %v330_v42  ;;  %v333_v25 = vmax.f32 %v325_v7, %v332_v10  ;;  %v972_v26 = vpack.c.bf16 %v801_v34, %v800_v12  ;;  %v975_v35 = vpack.c.bf16 %v803_v36, %v802_v44 }
  0x25   :  { %v328_v24 = vsel %vm257_vm1, %v1549_v9, -inf  ;;  %v1550_v52 = vmov 0.0|0.0   ;;  %v978_v45 = vpack.c.bf16 %v805_v0, %v804_v37  ;;  %v981_v27 = vpack.c.bf16 %v807_v54, %v806_v53 }
  0x26   :  { %v329_v50 = vmax.f32 %v321_v13, %v328_v24  ;;  %v335_v33 = vmax.f32 %v331_v43, %v333_v25  ;;  %973 = vmatpush3.bf16.msra.mxu1 %v972_v26  ;;  %v1026_v63 = vmov 269488144  }
  0x27   :  { %974 = vmatprep.subr.bf16.mxu1 %v1550_v52  ;;  %v341_v38 = vunpack.c.l.s4 %v1026_v63 }
  0x28   :  { %v334_v32 = vmax.f32 %v327_v20, %v329_v50 }
  0x29   :  { %v342_v55 = vunpack.c.0.s8 %v341_v38 }
  0x2a   :  { %v336_v51 = vmax.f32 %v334_v32, %v335_v33  ;;  %976 = vmatpush3.bf16.msra.mxu1 %v975_v35 }
  0x2b   :  { %977 = vmatprep.subr.bf16.mxu1 %v1550_v52  ;;  %v1365_v39 = vsub.s32 %v342_v55, %v1097_v14 }
  0x2c   :  { %337 = vmax.xlane.f32.xlu0 %v336_v51 }
  0x2e   :  { %979 = vmatpush3.bf16.msra.mxu1 %v978_v45 }
  0x2f   :  { %980 = vmatprep.subr.bf16.mxu1 %v1550_v52  ;;  %v899_v52 = vld [vmem:[%s1543_s3] ss:$0 sm:$0xff] }
  0x32   :  { %982 = vmatpush3.bf16.msra.mxu1 %v981_v27 }
  0xb9   :  { %v338_v1 = vpop.xlane.xlu0 %337 }
  0xba   :  { %v1368_v46 = vrot.slane %v338_v1, %v1365_v39 }
  0xbc   :  { %v348_v56 = vsub.f32 %v1102_v16, %v1368_v46  ;;  %v349_v2 = vsub.f32 %v1107_v17, %v1368_v46  ;;  %v350_v11 = vsub.f32 %v1112_v18, %v1368_v46  ;;  %v351_v16 = vsub.f32 %v1118_v21, %v1368_v46 }
  0xbd   :  { %v352_v7 = vsub.f32 %v1123_v22, %v1368_v46  ;;  %v353_v44 = vsub.f32 %v1128_v23, %v1368_v46 }
  0xbe   :  { %v358_v47 = vmul.f32 1.442695, %v348_v56  ;;  %v360_v57 = vmul.f32 1.442695, %v349_v2  ;;  %v362_v14 = vmul.f32 1.442695, %v350_v11 }
  0xbf   :  { %v364_v18 = vmul.f32 1.442695, %v351_v16  ;;  %v366_v10 = vmul.f32 1.442695, %v352_v7  ;;  %v368_v54 = vmul.f32 1.442695, %v353_v44 }
  0xc0   :  { %998 = vpow2.f32 %v358_v47 }
  0xc1   :  { %1000 = vpow2.f32 %v360_v57  ;;  %v354_v57 = vsub.f32 %v1141_v28, %v1368_v46 }
  0xc2   :  { %1002 = vpow2.f32 %v362_v14 }
  0xc3   :  { %1004 = vpow2.f32 %v364_v18  ;;  %v370_v18 = vmul.f32 1.442695, %v354_v57 }
  0xc4   :  { %1006 = vpow2.f32 %v366_v10 }
  0xc5   :  { %1008 = vpow2.f32 %v368_v54  ;;  %v357_v54 = vsub.f32 %v1205_v58, %v1368_v46 }
  0xc6   :  { %1010 = vpow2.f32 %v370_v18 }
  0xca   :  { %v1376_v3 = vpop.eup %998 }
  0xcb   :  { %v388_v59 = vcombine.high %v1376_v3, %v1376_v3  ;;  %v395_v4 = vrot.slane %v1376_v3, %v1154_v31  ;;  %v1385_v8 = vpop.eup %1000 }
  0xcc   :  { %v405_v5 = vcombine.high %v1385_v8, %v1385_v8  ;;  %v412_v41 = vrot.slane %v1385_v8, %v1154_v31  ;;  %v1396_v62 = vpop.eup %1002 }
  0xcd   :  { %v402_v17 = vrot.slane %v388_v59, %v1154_v31  ;;  %v403_v40 = vcombine.high %v395_v4, %v395_v4  ;;  %v598_v48 = vsel %vm257_vm1, %v395_v4, 0.0  ;;  %v422_v20 = vcombine.high %v1396_v62, %v1396_v62  ;;  %v1409_v34 = vpop.eup %1004 }
  0xce   :  { %v419_v49 = vrot.slane %v405_v5, %v1154_v31  ;;  %v420_v13 = vcombine.high %v412_v41, %v412_v41  ;;  %v605_v9 = vsel %vm257_vm1, %v412_v41, 0.0  ;;  %v429_v50 = vrot.slane %v1396_v62, %v1154_v31  ;;  %v1428_v4 = vpop.eup %1006 }
  0xcf   :  { %v404_v60 = vcombine.high %v402_v17, %v402_v17  ;;  %v599_v61 = vsel %vm257_vm1, %v403_v40, 0.0  ;;  %v601_v6 = vsel %vm257_vm1, %v402_v17, 0.0  ;;  %v436_v22 = vrot.slane %v422_v20, %v1154_v31 }
  0xd0   :  { %v600_v21 = vadd.f32 %v599_v61, %v598_v48  ;;  %v421_v42 = vcombine.high %v419_v49, %v419_v49  ;;  %v607_v43 = vsel %vm257_vm1, %v420_v13, 0.0  ;;  %v609_v32 = vsel %vm257_vm1, %v419_v49, 0.0 }
  0xd1   :  { %v603_v15 = vsel %vm257_vm1, %v404_v60, 0.0  ;;  %v437_v51 = vcombine.high %v429_v50, %v429_v50  ;;  %v613_v36 = vsel %vm257_vm1, %v429_v50, 0.0  ;;  %v438_v37 = vcombine.high %v436_v22, %v436_v22 }
  0xd2   :  { %v602_v19 = vadd.f32 %v601_v6, %v600_v21  ;;  %v611_v12 = vsel %vm257_vm1, %v421_v42, 0.0  ;;  %v439_v0 = vcombine.high %v1409_v34, %v1409_v34  ;;  %v446_v45 = vrot.slane %v1409_v34, %v1154_v31 }
  0xd3   :  { %v615_v53 = vsel %vm257_vm1, %v437_v51, 0.0  ;;  %v617_v63 = vsel %vm257_vm1, %v436_v22, 0.0  ;;  %v619_v2 = vsel %vm257_vm1, %v438_v37, 0.0  ;;  %v456_v60 = vcombine.high %v1428_v4, %v1428_v4 }
  0xd4   :  { %v604_v24 = vadd.f32 %v603_v15, %v602_v19  ;;  %v453_v56 = vrot.slane %v439_v0, %v1154_v31  ;;  %v454_v47 = vcombine.high %v446_v45, %v446_v45  ;;  %v621_v59 = vsel %vm257_vm1, %v446_v45, 0.0  ;;  %v1441_v15 = vpop.eup %1008 }
  0xd5   :  { %v463_v28 = vrot.slane %v1428_v4, %v1154_v31  ;;  %v355_v21 = vsub.f32 %v1146_v29, %v1368_v46  ;;  %v470_v49 = vrot.slane %v456_v60, %v1154_v31  ;;  %v473_v20 = vcombine.high %v1441_v15, %v1441_v15 }
  0xd6   :  { %v606_v25 = vadd.f32 %v605_v9, %v604_v24  ;;  %v455_v17 = vcombine.high %v453_v56, %v453_v56  ;;  %v623_v40 = vsel %vm257_vm1, %v454_v47, 0.0  ;;  %v625_v5 = vsel %vm257_vm1, %v453_v56, 0.0 }
  0xd7   :  { %v471_v13 = vcombine.high %v463_v28, %v463_v28  ;;  %v629_v19 = vsel %vm257_vm1, %v463_v28, 0.0  ;;  %v372_v9 = vmul.f32 1.442695, %v355_v21  ;;  %v472_v42 = vcombine.high %v470_v49, %v470_v49 }
  0xd8   :  { %v608_v33 = vadd.f32 %v607_v43, %v606_v25  ;;  %v627_v61 = vsel %vm257_vm1, %v455_v17, 0.0  ;;  %v480_v50 = vrot.slane %v1441_v15, %v1154_v31  ;;  %v633_v10 = vsel %vm257_vm1, %v470_v49, 0.0 }
  0xd9   :  { %v631_v29 = vsel %vm257_vm1, %v471_v13, 0.0  ;;  %v356_v25 = vsub.f32 %v1151_v30, %v1368_v46  ;;  %1012 = vpow2.f32 %v372_v9  ;;  %v635_v51 = vsel %vm257_vm1, %v472_v42, 0.0 }
  0xda   :  { %v610_v26 = vadd.f32 %v609_v32, %v608_v33  ;;  %v487_v33 = vrot.slane %v473_v20, %v1154_v31  ;;  %v488_v22 = vcombine.high %v480_v50, %v480_v50  ;;  %v376_v47 = vmul.f32 1.442695, %v357_v54 }
  0xdc   :  { %v612_v35 = vadd.f32 %v611_v12, %v610_v26  ;;  %v1454_v12 = vpop.eup %1010  ;;  %v637_v26 = vsel %vm257_vm1, %v480_v50, 0.0  ;;  %v639_v0 = vsel %vm257_vm1, %v488_v22, 0.0 }
  0xdd   :  { %v490_v37 = vcombine.high %v1454_v12, %v1454_v12  ;;  %v497_v30 = vrot.slane %v1454_v12, %v1154_v31 }
  0xde   :  { %v614_v23 = vadd.f32 %v613_v36, %v612_v35  ;;  %v374_v36 = vmul.f32 1.442695, %v356_v25 }
  0xdf   :  { %v645_v56 = vsel %vm257_vm1, %v497_v30, 0.0 }
  0xe0   :  { %v616_v1 = vadd.f32 %v615_v53, %v614_v23  ;;  %v641_v53 = vsel %vm257_vm1, %v487_v33, 0.0  ;;  %1014 = vpow2.f32 %v374_v36 }
  0xe1   :  { %1016 = vpow2.f32 %v376_v47 }
  0xe2   :  { %v618_v14 = vadd.f32 %v617_v63, %v616_v1  ;;  %v505_v63 = vcombine.high %v497_v30, %v497_v30 }
  0xe4   :  { %v620_v16 = vadd.f32 %v619_v2, %v618_v14  ;;  %v647_v46 = vsel %vm257_vm1, %v505_v63, 0.0 }
  0xe6   :  { %v795_v27 = vpop.f32.mrb[0].mxu0  ;;  %v622_v48 = vadd.f32 %v621_v59, %v620_v16 }
  0xe7   :  { %v796_v38 = vadd.f32 %v899_v52, %v795_v27  ;;  %v939_v55 = vpop.f32.mrb[1].mxu0  ;;  %v489_v52 = vcombine.high %v487_v33, %v487_v33  ;;  %v504_v27 = vrot.slane %v490_v37, %v1154_v31 }
  0xe8   :  { %v624_v41 = vadd.f32 %v623_v40, %v622_v48  ;;  %v1467_v55 = vpop.eup %1012 }
  0xe9   :  { %v799_v11 = vmax.f32 %v796_v38, 0.0  ;;  %v643_v38 = vsel %vm257_vm1, %v489_v52, 0.0  ;;  %v506_v57 = vcombine.high %v504_v27, %v504_v27  ;;  %v514_v58 = vrot.slane %v1467_v55, %v1154_v31 }
  0xea   :  { %v626_v6 = vadd.f32 %v625_v5, %v624_v41  ;;  %v649_v59 = vsel %vm257_vm1, %v504_v27, 0.0  ;;  %v1015_v48 = vpop.eup %1014 }
  0xeb   :  { %957 = vmatmul.mubr.msk.f32.vlgmr.msra.gmra.mrb[0].mxu1 %vm725_vm2, %v799_v11  ;;  %v507_v11 = vcombine.high %v1467_v55, %v1467_v55  ;;  %v522_v40 = vcombine.high %v514_v58, %v514_v58  ;;  %v651_v18 = vsel %vm257_vm1, %v506_v57, 0.0  ;;  %v653_v28 = vsel %vm257_vm1, %v514_v58, 0.0  ;;  %v1017_v42 = vpop.eup %1016 }
  0xec   :  { %v628_v7 = vadd.f32 %v627_v61, %v626_v6  ;;  %v524_v61 = vcombine.high %v1015_v48, %v1015_v48  ;;  %v531_v21 = vrot.slane %v1015_v48, %v1154_v31  ;;  %v548_v25 = vrot.slane %v1017_v42, %v1154_v31 }
  0xed   :  { %v521_v17 = vrot.slane %v507_v11, %v1154_v31  ;;  %v655_v6 = vsel %vm257_vm1, %v522_v40, 0.0 }
  0xee   :  { %v630_v24 = vadd.f32 %v629_v19, %v628_v7  ;;  %v538_v19 = vrot.slane %v524_v61, %v1154_v31  ;;  %v539_v9 = vcombine.high %v531_v21, %v531_v21  ;;  %v661_v50 = vsel %vm257_vm1, %v531_v21, 0.0 }
  0xef   :  { %v523_v41 = vcombine.high %v521_v17, %v521_v17  ;;  %v657_v13 = vsel %vm257_vm1, %v521_v17, 0.0  ;;  %v669_v52 = vsel %vm257_vm1, %v548_v25, 0.0 }
  0xf0   :  { %v632_v43 = vadd.f32 %v631_v29, %v630_v24  ;;  %v665_v22 = vsel %vm257_vm1, %v538_v19, 0.0 }
  0xf1   :  { %v659_v24 = vsel %vm257_vm1, %v523_v41, 0.0 }
  0xf2   :  { %v634_v32 = vadd.f32 %v633_v10, %v632_v43  ;;  %v540_v43 = vcombine.high %v538_v19, %v538_v19  ;;  %v541_v10 = vcombine.high %v1017_v42, %v1017_v42 }
  0xf4   :  { %v636_v44 = vadd.f32 %v635_v51, %v634_v32  ;;  %v663_v32 = vsel %vm257_vm1, %v539_v9, 0.0  ;;  %v667_v36 = vsel %vm257_vm1, %v540_v43, 0.0 }
  0xf6   :  { %v638_v35 = vadd.f32 %v637_v26, %v636_v44  ;;  %v555_v44 = vrot.slane %v541_v10, %v1154_v31  ;;  %v556_v26 = vcombine.high %v548_v25, %v548_v25  ;;  %v13_v31 = vstv %s1544_s5 }
  0xf7   :  { %14 = vst [vmem:[#allocation2] sm:$0x1] %v13_v31 }
  0xf8   :  { %v640_v45 = vadd.f32 %v639_v0, %v638_v35  ;;  %v557_v30 = vcombine.high %v555_v44, %v555_v44  ;;  %v671_v0 = vsel %vm257_vm1, %v556_v26, 0.0 }
  0xfa   :  { %v642_v23 = vadd.f32 %v641_v53, %v640_v45  ;;  %v673_v53 = vsel %vm257_vm1, %v555_v44, 0.0 }
  0xfc   :  { %v644_v1 = vadd.f32 %v643_v38, %v642_v23  ;;  %v675_v23 = vsel %vm257_vm1, %v557_v30, 0.0 }
  0xfe   :  { %v646_v2 = vadd.f32 %v645_v56, %v644_v1  ;;  %v901_v1 = vld [vmem:[#allocation2] ss:$0 sm:$0xff] }
 0x100   :  { %v648_v14 = vadd.f32 %v647_v46, %v646_v2 }
 0x102   :  { %v650_v16 = vadd.f32 %v649_v59, %v648_v14 }
 0x104   :  { %v652_v60 = vadd.f32 %v651_v18, %v650_v16 }
 0x106   :  { %v654_v5 = vadd.f32 %v653_v28, %v652_v60 }
 0x108   :  { %v656_v49 = vadd.f32 %v655_v6, %v654_v5 }
 0x10a   :  { %v658_v7 = vadd.f32 %v657_v13, %v656_v49 }
 0x10c   :  { %v660_v20 = vadd.f32 %v659_v24, %v658_v7 }
 0x10e   :  { %v662_v29 = vadd.f32 %v661_v50, %v660_v20 }
 0x110   :  { %v664_v33 = vadd.f32 %v663_v32, %v662_v29 }
 0x112   :  { %v666_v51 = vadd.f32 %v665_v22, %v664_v33 }
 0x114   :  { %v668_v35 = vadd.f32 %v667_v36, %v666_v51 }
 0x116   :  { %v670_v37 = vadd.f32 %v669_v52, %v668_v35 }
 0x118   :  { %v672_v45 = vadd.f32 %v671_v0, %v670_v37 }
 0x11a   :  { %v674_v54 = vadd.f32 %v673_v53, %v672_v45 }
 0x11c   :  { %v676_v27 = vadd.f32 %v675_v23, %v674_v54 }
 0x11e   :  { %677 = vadd.xlane.f32.xlu0 %v676_v27 }
 0x1ab   :  { %v678_v63 = vpop.xlane.xlu0 %677 }
 0x1ac   :  { %v686_v38 = vrot.slane %v678_v63, %v1365_v39 }
 0x1ae   :  { %1018 = vrcp.f32 %v686_v38 }
 0x1b8   :  { %v1019_v47 = vpop.eup %1018 }
 0x1b9   :  { %v689_v11 = vmul.f32 %v1019_v47, %v1376_v3  ;;  %v690_v58 = vmul.f32 %v1019_v47, %v1385_v8  ;;  %v691_v46 = vmul.f32 %v1019_v47, %v1396_v62  ;;  %v692_v14 = vmul.f32 %v1019_v47, %v1409_v34 }
 0x1ba   :  { %v693_v59 = vmul.f32 %v1019_v47, %v1428_v4  ;;  %v694_v16 = vmul.f32 %v1019_v47, %v1441_v15  ;;  %v695_v39 = vmul.f32 %v1019_v47, %v1454_v12  ;;  %v696_v17 = vmul.f32 %v1019_v47, %v1467_v55 }
 0x1bb   :  { %v697_v40 = vmul.f32 %v1019_v47, %v1015_v48  ;;  %v698_v18 = vmul.f32 %v1019_v47, %v1017_v42  ;;  %699 = vst [vmem:[%s1545_s6] sm:$0xff] %v689_v11  ;;  %700 = vst [vmem:[%s1545_s6 + $0x8] sm:$0xff] %v690_v58 }
 0x1bc   :  { %701 = vst [vmem:[%s1545_s6 + $0x10] sm:$0xff] %v691_v46  ;;  %702 = vst [vmem:[%s1545_s6 + $0x18] sm:$0xff] %v692_v14 }
 0x1bd   :  { %703 = vst [vmem:[%s1545_s6 + $0x20] sm:$0xff] %v693_v59  ;;  %704 = vst [vmem:[%s1545_s6 + $0x28] sm:$0xff] %v694_v16 }
 0x1be   :  { %v884_v56 = vpop.f32.mrb[0].mxu1  ;;  %705 = vst [vmem:[%s1545_s6 + $0x30] sm:$0xff] %v695_v39  ;;  %706 = vst [vmem:[%s1545_s6 + $0x38] sm:$0xff] %v696_v17 }
 0x1bf   :  { %v885_v2 = vadd.f32 %v901_v1, %v884_v56  ;;  %v958_v57 = vpop.f32.mrb[1].mxu1  ;;  %707 = vst [vmem:[%s1545_s6 + $0x40] sm:$0xff] %v697_v40  ;;  %708 = vst [vmem:[%s1545_s6 + $0x48] sm:$0xff] %v698_v18 }
 0x1c1   :  { %1020 = vtanh.f32 %v885_v2 }
 0x1cb   :  { %v1021_v3 = vpop.eup %1020 }
 0x1cc   :  { %890 = vst.msk [vmem:[%s1546_s7] sm:$0x3] %vm889_vm3, %v1021_v3 }

// kernel: out_block_forward.4
= control target key start
LH: loop header
LB: loop body
LE: loop exit
PB: predicated region body
PF: predicated region fallthrough
CT: control target
= control target key end

     0   :  { %s5009_s0 = inlined_call_operand.vmem [shape: bf16[2,8192], index: 0, kind: input, shape index: {}]   ;;  %s5010_s1 = inlined_call_operand.hbm [shape: s8[8192,5120], index: 1, kind: input, shape index: {}]   ;;  %s5011_s2 = inlined_call_operand.hbm [shape: f32[1,5120], index: 2, kind: input, shape index: {}]   ;;  %s5012_s3 = inlined_call_operand.hbm [shape: f32[1,5120], index: 3, kind: input, shape index: {}]   ;;  %s5013_s4 = inlined_call_operand.vmem [shape: f32[2,5120], index: 4, kind: output, shape index: {}]  }
   0x1   :  { %5019 = sst [smem:[#allocation11_spill]] %s5010_s1 }
   0x2   :  { %5020 = sst [smem:[#allocation12_spill]] %s5011_s2 }
   0x3   :  { %9 = vsyncpa [#allocation4], 0 }
   0x4   :  { %11 = vsyncpa [#allocation4 + $0x1], 0 }
   0x5   :  { %12 = vsyncpa [#allocation6], 0 }
   0x6   :  { %14 = vsyncpa [#allocation6 + $0x1], 0  ;;  %s4083_s15 = smov 0   ;;  %s4085_s16 = smov 0  }
   0x7   :  { %s4087_s17 = smov 0   ;;  %s4089_s18 = smov 0  }
   0x8   :  { %s4091_s19 = smov 0   ;;  %s4093_s20 = smov 0  }
   0x9 LB: > { %s5015_s21 = sadd.s32 4294967295, %s4043_s20   ;;  %s29_s22 = sadd.s32 1, %s4039_s19  ;;  %s4043_s20 = sphi %s4093_s20, %s20_s20   ;;  %s4039_s19 = sphi %s4091_s19, %s5038_s19   ;;  %s4035_s18 = sphi %s4089_s18, %s5037_s18   ;;  %s4031_s17 = sphi %s4087_s17, %s5036_s17   ;;  %s4027_s16 = sphi %s4085_s16, %s5035_s16   ;;  %s4023_s15 = sphi %s4083_s15, %s5034_s15  }
   0xa   : > { %p30_p0 = scmp.ge.s32.totalorder %s29_s22, 5  ;;  %s65_s23 = sadd.s32 1, %s4031_s17 }
   0xb   : > { %p72_p1 = scmp.ne.s32.totalorder %s4031_s17, %s4027_s16  ;;  %p73_p2 = scmp.eq.s32.totalorder %s4043_s20, 0 }
   0xc   : > { %s5040_s22 = smov (%p30_p0, %s29_s22), 0  ;;  %p78_p4 = scmp.ne.s32.totalorder %s4027_s16, %s4023_s15 }
   0xd   : > { %5021 = sst [smem:[#allocation10_spill]] %s5040_s22  ;;  %p74_p3 = por %p73_p2, %p72_p1 }
   0xe   : > { %s62_s24 = ssub.s32 %s4039_s19, %s5040_s22  ;;  %p79_p5 = scmp.eq.s32.totalorder %s5015_s21, 0 }
   0xf   : > { %p63_p6 = scmp.eq.s32.totalorder %s62_s24, 0  ;;  %p3830_p8 = scmp.lt.s32.totalorder %s4043_s20, 5 }
  0x10   : > { %p4124_p7 = por %p79_p5, %p78_p4  ;;  %s4133_s27 = sand.u32 1, %s4031_s17  }
  0x11   : > { %s4130_s26 = scalar_select %p63_p6, %s4031_s17, %s65_s23  }
  0x12   : > { %s5022_s25 = scalar_select %p4124_p7, 1, 0 }
  0x13   : > { %p4135_p9 = pnand %p3830_p8, %p74_p3  ;;  %s3678_s29 = sshll.u32 %s4133_s27, 14 }
  0x14   : > { %s193_s30 = scalar_lea.vmem [#allocation3], %s3678_s29  ;;  %s210_s6 = sand.u32 1, %s4043_s20  }
  0x15   : > { %s5023_s28 = scalar_select %p4135_p9, 1, 0 }
  0x16   : > { %s200_s5 = sshll.u32 %s193_s30, 4  ;;  %s5016_s7 = sshll.u32 %s4133_s27, 3  ;;  %s4141_s5 = int_to_ptr.vmem [resolvable:$true] %s200_s5 }
  0x17   : > { %s3699_s8 = sshll.u32 %s4039_s19, 7  ;;  %s5024_s2 = sld [smem:[#allocation12_spill]] }
  0x18   : > { %s214_s12 = scalar_lea.vmem [#allocation5], %s5016_s7  ;;  %s4157_s23 = scalar_lea.hbm %s5012_s3, %s3699_s8 }
  0x19   : > { %s222_s13 = sshll.u32 %s214_s12, 4  ;;  %s4159_s24 = scalar_lea.sflag [#allocation6], %s210_s6  ;;  %s4152_s13 = int_to_ptr.vmem [resolvable:$true] %s222_s13 }
  0x1a   : > { %p4165_p11 = pneg %p4135_p9 }
  0x1d   : > { %s4148_s11 = scalar_lea.hbm %s5024_s2, %s3699_s8  ;;  %s3900_s12 = scalar_lea.hbm %s5024_s2, 640 }
  0x1e   : > { %s3895_s29 = scalar_lea.hbm %s4148_s11, 128  ;;  %p3901_p0 = scmp.lt.u32.totalorder %s4148_s11, %s5024_s2 }
  0x1f   : > { %p3896_p10 = scmp.ne.s32.totalorder %s4148_s11, %s3895_s29  ;;  %p3902_p1 = scmp.lt.u32.totalorder %s3900_s12, %s3895_s29 }
  0x20   : > { %p3904_p3 = scmp.lt.u32.totalorder %s3895_s29, %s4148_s11 }
  0x21   : > { %p3898_p12 = pnand %p4165_p11, %p3896_p10  ;;  %p3903_p2 = por %p3902_p1, %p3901_p0 }
  0x23   : > { %p3899_p13 = pneg %p3898_p12  ;;  %p3905_p4 = por %p3904_p3, %p3903_p2 }
  0x25   : > { %p3906_p5 = pnand %p3905_p4, %p3899_p13 }
  0x27   : > { %3909 = shalt.err (!%p3906_p5)
}
  0x28   : > { %s3910_s6 = scalar_lea.vmem %s4152_s13, 128  ;;  %s4049_s15 = smov [#allocation5]  }
  0x29   : > { %p3911_p6 = scmp.ne.s32.totalorder %s4152_s13, %s3910_s6  ;;  %s3915_s9 = sshll.u32 %s4049_s15, 4  ;;  %s3916_s9 = int_to_ptr.vmem [resolvable:$false] %s3915_s9 }
  0x2a   : > { %s3917_s10 = scalar_lea.vmem %s3916_s9, 256  ;;  %p3918_p12 = scmp.lt.s32.totalorder %s4152_s13, %s3916_s9 }
  0x2b   : > { %p3913_p8 = pnand %p3911_p6, %p4165_p11  ;;  %p3919_p7 = scmp.lt.s32.totalorder %s3917_s10, %s3910_s6 }
  0x2d   : > { %p3914_p10 = pneg %p3913_p8  ;;  %p3920_p0 = por %p3919_p7, %p3918_p12 }
  0x2f   : > { %p3921_p1 = pnand %p3920_p0, %p3914_p10 }
  0x31   : > { %3924 = shalt.err (!%p3921_p1)
}
  0x32   : > { %3826 = dma.hbm_to_vmem [thread:$0]  (!%p4135_p9), %s4148_s11, 128, %s4152_s13, %s4159_s24  }
  0x33   : > { %p3687_p13 = scmp.ge.s32.totalorder %s4043_s20, 1  ;;  %p246_p2 = scmp.lt.s32.totalorder %s4043_s20, 6 }
  0x34   : > { %s3698_s29 = sshll.u32 %s4039_s19, 10  ;;  %s5027_s1 = sld [smem:[#allocation11_spill]] }
  0x35   : > { %p4192_p3 = pnand %p3687_p13, %p246_p2  ;;  %s190_s15 = scalar_lea.sflag [#allocation4], %s4133_s27 }
  0x37   : > { %s5026_s12 = scalar_select %p4192_p3, 1, 0 }
  0x3a   : > { %s4199_s6 = scalar_lea.hbm %s5027_s1, %s3698_s29  ;;  %s3930_s10 = scalar_lea.hbm %s5027_s1, 1310720 }
  0x3b   : > { %s3925_s9 = scalar_lea.hbm %s4199_s6, 262144  ;;  %p3931_p6 = scmp.lt.u32.totalorder %s4199_s6, %s5027_s1 }
  0x3c   : > { %p3926_p7 = scmp.ne.s32.totalorder %s4199_s6, %s3925_s9  ;;  %p3932_p8 = scmp.lt.u32.totalorder %s3930_s10, %s3925_s9 }
  0x3d   : > { %p3934_p12 = scmp.lt.u32.totalorder %s3925_s9, %s4199_s6 }
  0x3e   : > { %p3928_p4 = pnand %p3926_p7, %p4165_p11  ;;  %p3933_p10 = por %p3932_p8, %p3931_p6 }
  0x40   : > { %p3929_p5 = pneg %p3928_p4  ;;  %p3935_p0 = por %p3934_p12, %p3933_p10 }
  0x42   : > { %p3936_p1 = pnand %p3935_p0, %p3929_p5 }
  0x44   : > { %3939 = shalt.err (!%p3936_p1)
}
  0x45   : > { %s3940_s29 = scalar_lea.vmem %s4141_s5, 262144  ;;  %s4050_s14 = smov [#allocation3]  }
  0x46   : > { %p3941_p13 = scmp.ne.s32.totalorder %s4141_s5, %s3940_s29  ;;  %s3945_s8 = sshll.u32 %s4050_s14, 4  ;;  %s3946_s8 = int_to_ptr.vmem [resolvable:$false] %s3945_s8 }
  0x47   : > { %s3947_s21 = scalar_lea.vmem %s3946_s8, 524288  ;;  %p3948_p4 = scmp.lt.s32.totalorder %s4141_s5, %s3946_s8 }
  0x48   : > { %p3943_p2 = pnand %p3941_p13, %p4165_p11  ;;  %p3949_p3 = scmp.lt.s32.totalorder %s3947_s21, %s3940_s29 }
  0x4a   : > { %p3944_p7 = pneg %p3943_p2  ;;  %p3950_p6 = por %p3949_p3, %p3948_p4 }
  0x4c   : > { %p3951_p8 = pnand %p3950_p6, %p3944_p7 }
  0x4e   : > { %3954 = shalt.err (!%p3951_p8)
}
  0x4f   : > { %s4051_s7 = smov 5120   ;;  %s4052_s9 = smov 1024  }
  0x50   : > { %s4053_s11 = smov 64   ;;  %s5028_s13 = sshll.u32 %s4133_s27, 3 }
  0x51   : > { %3823 = dma.hbm_to_vmem [thread:$0]  (!%p4135_p9), %s4199_s6, 262144, %s4141_s5, %s190_s15, %s4051_s7, %s4052_s9, %s4053_s11  }
  0x52   : > { %s233_s10 = scalar_lea.vmem [#allocation7], %s5028_s13  ;;  %s3955_s14 = scalar_lea.hbm %s4157_s23, 128 }
  0x53   : > { %s241_s29 = sshll.u32 %s233_s10, 4  ;;  %p3956_p3 = scmp.ne.s32.totalorder %s4157_s23, %s3955_s14  ;;  %s242_s29 = int_to_ptr.vmem [resolvable:$true] %s241_s29 }
  0x54   : > { %s3960_s1 = scalar_lea.hbm %s5012_s3, 640  ;;  %p3961_p12 = scmp.lt.u32.totalorder %s4157_s23, %s5012_s3 }
  0x55   : > { %p3958_p5 = pnand %p3956_p3, %p4165_p11  ;;  %p3962_p0 = scmp.lt.u32.totalorder %s3960_s1, %s3955_s14 }
  0x56   : > { %p3964_p13 = scmp.lt.u32.totalorder %s3955_s14, %s4157_s23 }
  0x57   : > { %p3959_p10 = pneg %p3958_p5  ;;  %p3963_p1 = por %p3962_p0, %p3961_p12 }
  0x59   : > { %p3965_p2 = por %p3964_p13, %p3963_p1 }
  0x5b   : > { %p3966_p7 = pnand %p3965_p2, %p3959_p10 }
  0x5d   : > { %3969 = shalt.err (!%p3966_p7)
}
  0x5e   : > { %s3970_s27 = scalar_lea.vmem %s242_s29, 128  ;;  %s4054_s5 = smov [#allocation7]  }
  0x5f   : > { %p3971_p4 = scmp.ne.s32.totalorder %s242_s29, %s3970_s27  ;;  %s3975_s6 = sshll.u32 %s4054_s5, 4  ;;  %s3976_s6 = int_to_ptr.vmem [resolvable:$false] %s3975_s6 }
  0x60   : > { %s3977_s15 = scalar_lea.vmem %s3976_s6, 256  ;;  %p3978_p3 = scmp.lt.s32.totalorder %s242_s29, %s3976_s6 }
  0x61   : > { %p3973_p6 = pnand %p3971_p4, %p4165_p11  ;;  %p3979_p5 = scmp.lt.s32.totalorder %s3977_s15, %s3970_s27 }
  0x63   : > { %p3974_p8 = pneg %p3973_p6  ;;  %p3980_p9 = por %p3979_p5, %p3978_p3 }
  0x65   : > { %p3981_p0 = pnand %p3980_p9, %p3974_p8 }
  0x67   : > { %3984 = shalt.err (!%p3981_p0)
}
  0x68   : > { %p5029_p12 = scmp.ne.s32.totalorder %s5023_s28, 0  ;;  %p5030_p10 = scmp.ne.s32.totalorder %s5026_s12, 0 }
  0x69   : > { %s252_s1 = sand.u32 (!%p5030_p10), 1, %s4027_s16   ;;  %p5031_p11 = scmp.ne.s32.totalorder (!%p5030_p10), %s5022_s25, 0 }
  0x6a   : > { %3829 = dma.hbm_to_vmem [thread:$0]  (!%p5029_p12), %s4157_s23, 128, %s242_s29, %s4159_s24  }
  0x6b   : > { %250 = sbr.rel (%p5030_p10) target bundleno = 1390 (0x56e), region = 36  ;;  %s3688_s2 = sshll.u32 (!%p5030_p10), %s252_s1, 14 }
  0x6c   : > { %s253_s22 = scalar_lea.sflag (!%p5030_p10), [#allocation4], %s252_s1  ;;  %s4248_s30 = scalar_lea.vmem (!%p5030_p10), [#allocation3], %s3688_s2 }
  0x72   : > { %4014 = dma.done.wait (%p5031_p11), %s253_s22, 262144  }
  0x73   : > { %4016 = vsyncadd (%p5031_p11), %s253_s22, 4294705152  ;;  %s5032_s28 = sadd.s32 4294967295, %s4043_s20   ;;  %s3689_s23 = sshll.u32 %s252_s1, 3 }
  0x74   : > { %s261_s7 = sand.u32 1, %s5032_s28   ;;  %s4256_s12 = scalar_lea.vmem [#allocation5], %s3689_s23 }
  0x75   : > { %s262_s24 = scalar_lea.sflag [#allocation6], %s261_s7 }
  0x76   : > { %4018 = dma.done.wait (%p5031_p11), %s262_s24, 256  }
  0x77   : > { %4020 = vsyncadd (%p5031_p11), %s262_s24, 4294967040  ;;  %s3691_s9 = sshll.u32 %s4035_s18, 3  ;;  %v4055_v0 = vmov 0.0   ;;  %s4268_s14 = scalar_lea.vmem [#allocation7], %s3689_s23 }
  0x78   : > { %p327_p9 = scmp.lt.s32.totalorder %s3691_s9, 39  ;;  %334 = vst [vmem:[#allocation2] sm:$0xff] %v4055_v0  ;;  %335 = vst [vmem:[#allocation2 + $0x8] sm:$0xff] %v4055_v0  ;;  %s4270_s8 = smov 0  }
  0x7a   : > { %s5042_s9 = smov (!%p327_p9, %s3691_s9), 39 }
  0x7b   : > { %s3692_s11 = sshll.u32 %s5042_s9, 1 }
  0x7c   : > { %s4266_s29 = scalar_lea.vmem %s5013_s4, %s3692_s11 }
  0x7d LB: >> { %s3693_s18 = sshll.u32 %s4047_s8, 11  ;;  %v4056_v19 = vmov 1966171168   ;;  %v1897_v21 = vlaneseq  ;;  %s341_s8 = sadd.s32 1, %s4047_s8   ;;  %s4047_s8 = sphi %s4270_s8, %s341_s8  }
  0x7e   : >> { %s343_s25 = sshra.s32 %s3693_s18, 5  ;;  %v1895_v20 = vunpack.c.l.s4 %v4056_v19  ;;  %s1884_s5 = sshra.s32 %s3693_s18, 7 }
  0x7f   : >> { %s3701_s21 = sshll.u32 %s343_s25, 6  ;;  %v4291_v27 = vshrl.u32 %v1897_v21, 7  ;;  %s4298_s1 = scalar_lea.vmem %s5009_s0, %s1884_s5 }
  0x80   : >> { %s4279_s27 = scalar_lea.vmem %s4248_s30, %s3701_s21 [#allocation3]  ;;  %v1896_v26 = vunpack.c.0.s8 %v1895_v20  ;;  %v4306_v37 = vld [vmem:[%s4298_s1] sm:$0xff]  ;;  %p338_p1 = scmp.ge.s32.totalorder %s341_s8, 4  }
  0x81   : >> { %v349_v1 = vld [vmem:[%s4279_s27 + $0x8] sm:$0xff]  ;;  %v351_v2 = vld [vmem:[%s4279_s27 + $0x18] sm:$0xff]  ;;  %v348_v3 = vld [vmem:[%s4279_s27] sm:$0xff] }
  0x82   : >> { %v861_v4 = vunpack.c.l.s8.bf16 %v349_v1  ;;  %v869_v5 = vunpack.c.h.s8.bf16 %v349_v1  ;;  %v863_v6 = vunpack.c.l.s8.bf16 %v351_v2  ;;  %v871_v7 = vunpack.c.h.s8.bf16 %v351_v2  ;;  %v350_v8 = vld [vmem:[%s4279_s27 + $0x10] sm:$0xff]  ;;  %v357_v11 = vld [vmem:[%s4279_s27 + $0x48] sm:$0xff]  ;;  %v359_v12 = vld [vmem:[%s4279_s27 + $0x58] sm:$0xff] }
  0x83   : >> { %v860_v9 = vunpack.c.l.s8.bf16 %v348_v3  ;;  %v862_v10 = vunpack.c.l.s8.bf16 %v350_v8  ;;  %v868_v13 = vunpack.c.h.s8.bf16 %v348_v3  ;;  %v870_v14 = vunpack.c.h.s8.bf16 %v350_v8  ;;  %v356_v17 = vld [vmem:[%s4279_s27 + $0x40] sm:$0xff]  ;;  %v358_v18 = vld [vmem:[%s4279_s27 + $0x50] sm:$0xff]  ;;  %v365_v28 = vld [vmem:[%s4279_s27 + $0x88] sm:$0xff] }
  0x84   : >> { %2007 = vmatprep.subr.bf16.mxu0 %v861_v4  ;;  %2335 = vmatprep.subr.bf16.mxu1 %v863_v6  ;;  %v877_v15 = vunpack.c.l.s8.bf16 %v357_v11  ;;  %v879_v16 = vunpack.c.l.s8.bf16 %v359_v12  ;;  %v876_v22 = vunpack.c.l.s8.bf16 %v356_v17  ;;  %v878_v23 = vunpack.c.l.s8.bf16 %v358_v18  ;;  %v367_v29 = vld [vmem:[%s4279_s27 + $0x98] sm:$0xff]  ;;  %v364_v34 = vld [vmem:[%s4279_s27 + $0x80] sm:$0xff]  ;;  %v366_v35 = vld [vmem:[%s4279_s27 + $0x90] sm:$0xff] }
  0x85   : >> { %2008 = vmatpush1.bf16.msra.mxu0 %v860_v9  ;;  %2336 = vmatpush1.bf16.msra.mxu1 %v862_v10  ;;  %v885_v24 = vunpack.c.h.s8.bf16 %v357_v11  ;;  %v887_v25 = vunpack.c.h.s8.bf16 %v359_v12  ;;  %v884_v30 = vunpack.c.h.s8.bf16 %v356_v17  ;;  %v886_v31 = vunpack.c.h.s8.bf16 %v358_v18  ;;  %v373_v43 = vld [vmem:[%s4279_s27 + $0xc8] sm:$0xff]  ;;  %v375_v44 = vld [vmem:[%s4279_s27 + $0xd8] sm:$0xff]  ;;  %v372_v50 = vld [vmem:[%s4279_s27 + $0xc0] sm:$0xff] }
  0x86   : >> { %2009 = vmatprep.subr.bf16.mxu0 %v869_v5  ;;  %2337 = vmatprep.subr.bf16.mxu1 %v871_v7  ;;  %v893_v32 = vunpack.c.l.s8.bf16 %v365_v28  ;;  %v895_v33 = vunpack.c.l.s8.bf16 %v367_v29  ;;  %v4303_v36 = vsub.s32 %v1896_v26, %v4291_v27  ;;  %v892_v38 = vunpack.c.l.s8.bf16 %v364_v34  ;;  %v374_v51 = vld [vmem:[%s4279_s27 + $0xd0] sm:$0xff]  ;;  %v381_v57 = vld [vmem:[%s4279_s27 + $0x108] sm:$0xff]  ;;  %v383_v58 = vld [vmem:[%s4279_s27 + $0x118] sm:$0xff] }
  0x87   : >> { %v894_v39 = vunpack.c.l.s8.bf16 %v366_v35  ;;  %v901_v40 = vunpack.c.h.s8.bf16 %v365_v28  ;;  %v903_v41 = vunpack.c.h.s8.bf16 %v367_v29  ;;  %v900_v46 = vunpack.c.h.s8.bf16 %v364_v34  ;;  %v380_v63 = vld [vmem:[%s4279_s27 + $0x100] sm:$0xff]  ;;  %v382_v0 = vld [vmem:[%s4279_s27 + $0x110] sm:$0xff]  ;;  %v389_v5 = vld [vmem:[%s4279_s27 + $0x148] sm:$0xff] }
  0x88   : >> { %v4310_v42 = vrot.slane %v4306_v37, %v4303_v36  ;;  %v902_v47 = vunpack.c.h.s8.bf16 %v366_v35  ;;  %v909_v48 = vunpack.c.l.s8.bf16 %v373_v43  ;;  %v911_v49 = vunpack.c.l.s8.bf16 %v375_v44  ;;  %v391_v6 = vld [vmem:[%s4279_s27 + $0x158] sm:$0xff]  ;;  %v388_v11 = vld [vmem:[%s4279_s27 + $0x140] sm:$0xff]  ;;  %v390_v12 = vld [vmem:[%s4279_s27 + $0x150] sm:$0xff] }
  0x89   : >> { %2010 = vmatpush1.bf16.msra.mxu0 %v868_v13  ;;  %2338 = vmatpush1.bf16.msra.mxu1 %v870_v14  ;;  %v908_v53 = vunpack.c.l.s8.bf16 %v372_v50  ;;  %v910_v54 = vunpack.c.l.s8.bf16 %v374_v51  ;;  %v917_v55 = vunpack.c.h.s8.bf16 %v373_v43  ;;  %v919_v56 = vunpack.c.h.s8.bf16 %v375_v44  ;;  %v397_v17 = vld [vmem:[%s4279_s27 + $0x188] sm:$0xff]  ;;  %v399_v18 = vld [vmem:[%s4279_s27 + $0x198] sm:$0xff] }
  0x8a   : >> { %2011 = vmatprep.subr.bf16.mxu0 %v877_v15  ;;  %2339 = vmatprep.subr.bf16.mxu1 %v879_v16  ;;  %v1908_v45 = vcombine.high %v4310_v42, %v4310_v42  ;;  %v916_v59 = vunpack.c.h.s8.bf16 %v372_v50  ;;  %v918_v60 = vunpack.c.h.s8.bf16 %v374_v51  ;;  %v925_v61 = vunpack.c.l.s8.bf16 %v381_v57  ;;  %v412_v51 = vld [vmem:[%s4279_s27 + $0x200] sm:$0xff] }
  0x8b   : >> { %v927_v62 = vunpack.c.l.s8.bf16 %v383_v58  ;;  %v924_v1 = vunpack.c.l.s8.bf16 %v380_v63  ;;  %v926_v2 = vunpack.c.l.s8.bf16 %v382_v0  ;;  %v933_v3 = vunpack.c.h.s8.bf16 %v381_v57 }
  0x8c   : >> { %v4319_v52 = vrot.slane %v1908_v45, %v4303_v36  ;;  %v935_v4 = vunpack.c.h.s8.bf16 %v383_v58  ;;  %v932_v7 = vunpack.c.h.s8.bf16 %v380_v63  ;;  %v934_v8 = vunpack.c.h.s8.bf16 %v382_v0  ;;  %v413_v45 = vld [vmem:[%s4279_s27 + $0x208] sm:$0xff] }
  0x8d   : >> { %2012 = vmatpush1.bf16.msra.mxu0 %v876_v22  ;;  %2340 = vmatpush1.bf16.msra.mxu1 %v878_v23  ;;  %v941_v9 = vunpack.c.l.s8.bf16 %v389_v5  ;;  %v943_v10 = vunpack.c.l.s8.bf16 %v391_v6  ;;  %v940_v13 = vunpack.c.l.s8.bf16 %v388_v11  ;;  %v942_v14 = vunpack.c.l.s8.bf16 %v390_v12  ;;  %v396_v23 = vld [vmem:[%s4279_s27 + $0x180] sm:$0xff] }
  0x8e   : >> { %2013 = vmatprep.subr.bf16.mxu0 %v885_v24  ;;  %2341 = vmatprep.subr.bf16.mxu1 %v887_v25  ;;  %v949_v15 = vunpack.c.h.s8.bf16 %v389_v5  ;;  %v951_v16 = vunpack.c.h.s8.bf16 %v391_v6  ;;  %v948_v19 = vunpack.c.h.s8.bf16 %v388_v11  ;;  %v950_v20 = vunpack.c.h.s8.bf16 %v390_v12  ;;  %v398_v24 = vld [vmem:[%s4279_s27 + $0x190] sm:$0xff] }
  0x8f   : >> { %2039 = vmatprep.mubr.bf16.mxu0 %v4319_v52  ;;  %2367 = vmatprep.mubr.bf16.mxu1 %v4319_v52  ;;  %v957_v21 = vunpack.c.l.s8.bf16 %v397_v17  ;;  %v959_v22 = vunpack.c.l.s8.bf16 %v399_v18  ;;  %v956_v25 = vunpack.c.l.s8.bf16 %v396_v23  ;;  %v958_v26 = vunpack.c.l.s8.bf16 %v398_v24 }
  0x90   : >> { %v965_v28 = vunpack.c.h.s8.bf16 %v397_v17  ;;  %v967_v29 = vunpack.c.h.s8.bf16 %v399_v18  ;;  %v997_v57 = vunpack.c.h.s8.bf16 %v413_v45 }
  0x91   : >> { %2014 = vmatpush1.bf16.msra.mxu0 %v884_v30  ;;  %2342 = vmatpush1.bf16.msra.mxu1 %v886_v31  ;;  %v405_v30 = vld [vmem:[%s4279_s27 + $0x1c8] sm:$0xff]  ;;  %v407_v31 = vld [vmem:[%s4279_s27 + $0x1d8] sm:$0xff] }
  0x92   : >> { %2015 = vmatprep.subr.bf16.mxu0 %v893_v32  ;;  %2343 = vmatprep.subr.bf16.mxu1 %v895_v33  ;;  %v964_v32 = vunpack.c.h.s8.bf16 %v396_v23  ;;  %v966_v33 = vunpack.c.h.s8.bf16 %v398_v24  ;;  %v973_v34 = vunpack.c.l.s8.bf16 %v405_v30  ;;  %v975_v35 = vunpack.c.l.s8.bf16 %v407_v31 }
  0x93   : >> { %v981_v43 = vunpack.c.h.s8.bf16 %v405_v30  ;;  %v983_v44 = vunpack.c.h.s8.bf16 %v407_v31 }
  0x95   : >> { %2016 = vmatpush1.bf16.msra.mxu0 %v892_v38  ;;  %2344 = vmatpush1.bf16.msra.mxu1 %v894_v39  ;;  %v404_v38 = vld [vmem:[%s4279_s27 + $0x1c0] sm:$0xff]  ;;  %v406_v39 = vld [vmem:[%s4279_s27 + $0x1d0] sm:$0xff] }
  0x96   : >> { %2017 = vmatprep.subr.bf16.mxu0 %v901_v40  ;;  %2345 = vmatprep.subr.bf16.mxu1 %v903_v41  ;;  %v972_v40 = vunpack.c.l.s8.bf16 %v404_v38  ;;  %v974_v41 = vunpack.c.l.s8.bf16 %v406_v39 }
  0x99   : >> { %2018 = vmatpush1.bf16.msra.mxu0 %v900_v46  ;;  %2346 = vmatpush1.bf16.msra.mxu1 %v902_v47  ;;  %v415_v46 = vld [vmem:[%s4279_s27 + $0x218] sm:$0xff]  ;;  %v980_v47 = vunpack.c.h.s8.bf16 %v404_v38 }
  0x9a   : >> { %2019 = vmatprep.subr.bf16.mxu0 %v909_v48  ;;  %2347 = vmatprep.subr.bf16.mxu1 %v911_v49  ;;  %v982_v48 = vunpack.c.h.s8.bf16 %v406_v39  ;;  %v989_v49 = vunpack.c.l.s8.bf16 %v413_v45  ;;  %v991_v50 = vunpack.c.l.s8.bf16 %v415_v46  ;;  %v999_v58 = vunpack.c.h.s8.bf16 %v415_v46 }
  0x9d   : >> { %2020 = vmatpush1.bf16.msra.mxu0 %v908_v53  ;;  %2348 = vmatpush1.bf16.msra.mxu1 %v910_v54  ;;  %v414_v53 = vld [vmem:[%s4279_s27 + $0x210] sm:$0xff]  ;;  %v4345_v54 = vrot.slane %v4310_v42, %v4303_v36  ;;  %v996_v42 = vunpack.c.h.s8.bf16 %v412_v51 }
  0x9e   : >> { %2021 = vmatprep.subr.bf16.mxu0 %v917_v55  ;;  %2349 = vmatprep.subr.bf16.mxu1 %v919_v56  ;;  %v988_v55 = vunpack.c.l.s8.bf16 %v412_v51  ;;  %v990_v56 = vunpack.c.l.s8.bf16 %v414_v53 }
  0xa1   : >> { %2022 = vmatpush1.bf16.msra.mxu0 %v916_v59  ;;  %2350 = vmatpush1.bf16.msra.mxu1 %v918_v60  ;;  %v421_v59 = vld [vmem:[%s4279_s27 + $0x248] sm:$0xff]  ;;  %v423_v60 = vld [vmem:[%s4279_s27 + $0x258] sm:$0xff] }
  0xa2   : >> { %2023 = vmatprep.subr.bf16.mxu0 %v925_v61  ;;  %2351 = vmatprep.subr.bf16.mxu1 %v927_v62  ;;  %v4351_v61 = vcombine.high %v4319_v52, %v4319_v52  ;;  %v998_v62 = vunpack.c.h.s8.bf16 %v414_v53  ;;  %v1005_v63 = vunpack.c.l.s8.bf16 %v421_v59  ;;  %v1007_v0 = vunpack.c.l.s8.bf16 %v423_v60 }
  0xa3   : >> { %v1013_v5 = vunpack.c.h.s8.bf16 %v421_v59  ;;  %v1015_v6 = vunpack.c.h.s8.bf16 %v423_v60 }
  0xa5   : >> { %2024 = vmatpush1.bf16.msra.mxu0 %v924_v1  ;;  %2352 = vmatpush1.bf16.msra.mxu1 %v926_v2  ;;  %v420_v1 = vld [vmem:[%s4279_s27 + $0x240] sm:$0xff]  ;;  %v422_v2 = vld [vmem:[%s4279_s27 + $0x250] sm:$0xff] }
  0xa6   : >> { %2025 = vmatprep.subr.bf16.mxu0 %v933_v3  ;;  %2353 = vmatprep.subr.bf16.mxu1 %v935_v4  ;;  %v1004_v3 = vunpack.c.l.s8.bf16 %v420_v1  ;;  %v1006_v4 = vunpack.c.l.s8.bf16 %v422_v2 }
  0xa9   : >> { %2026 = vmatpush1.bf16.msra.mxu0 %v932_v7  ;;  %2354 = vmatpush1.bf16.msra.mxu1 %v934_v8  ;;  %v429_v7 = vld [vmem:[%s4279_s27 + $0x288] sm:$0xff]  ;;  %v431_v8 = vld [vmem:[%s4279_s27 + $0x298] sm:$0xff] }
  0xaa   : >> { %2027 = vmatprep.subr.bf16.mxu0 %v941_v9  ;;  %2355 = vmatprep.subr.bf16.mxu1 %v943_v10  ;;  %v1012_v9 = vunpack.c.h.s8.bf16 %v420_v1  ;;  %v1014_v10 = vunpack.c.h.s8.bf16 %v422_v2  ;;  %v1021_v11 = vunpack.c.l.s8.bf16 %v429_v7  ;;  %v1023_v12 = vunpack.c.l.s8.bf16 %v431_v8 }
  0xab   : >> { %v1029_v17 = vunpack.c.h.s8.bf16 %v429_v7  ;;  %v1031_v18 = vunpack.c.h.s8.bf16 %v431_v8 }
  0xad   : >> { %2028 = vmatpush1.bf16.msra.mxu0 %v940_v13  ;;  %2356 = vmatpush1.bf16.msra.mxu1 %v942_v14  ;;  %v428_v13 = vld [vmem:[%s4279_s27 + $0x280] sm:$0xff]  ;;  %v430_v14 = vld [vmem:[%s4279_s27 + $0x290] sm:$0xff] }
  0xae   : >> { %2029 = vmatprep.subr.bf16.mxu0 %v949_v15  ;;  %2357 = vmatprep.subr.bf16.mxu1 %v951_v16  ;;  %v1020_v15 = vunpack.c.l.s8.bf16 %v428_v13  ;;  %v1022_v16 = vunpack.c.l.s8.bf16 %v430_v14 }
  0xb1   : >> { %2030 = vmatpush1.bf16.msra.mxu0 %v948_v19  ;;  %2358 = vmatpush1.bf16.msra.mxu1 %v950_v20  ;;  %v437_v19 = vld [vmem:[%s4279_s27 + $0x2c8] sm:$0xff]  ;;  %v439_v20 = vld [vmem:[%s4279_s27 + $0x2d8] sm:$0xff] }
  0xb2   : >> { %2031 = vmatprep.subr.bf16.mxu0 %v957_v21  ;;  %2359 = vmatprep.subr.bf16.mxu1 %v959_v22  ;;  %v1028_v21 = vunpack.c.h.s8.bf16 %v428_v13  ;;  %v1030_v22 = vunpack.c.h.s8.bf16 %v430_v14  ;;  %v1037_v23 = vunpack.c.l.s8.bf16 %v437_v19  ;;  %v1039_v24 = vunpack.c.l.s8.bf16 %v439_v20 }
  0xb3   : >> { %v1045_v30 = vunpack.c.h.s8.bf16 %v437_v19  ;;  %v1047_v31 = vunpack.c.h.s8.bf16 %v439_v20 }
  0xb5   : >> { %2032 = vmatpush1.bf16.msra.mxu0 %v956_v25  ;;  %2360 = vmatpush1.bf16.msra.mxu1 %v958_v26  ;;  %v436_v25 = vld [vmem:[%s4279_s27 + $0x2c0] sm:$0xff]  ;;  %v438_v26 = vld [vmem:[%s4279_s27 + $0x2d0] sm:$0xff] }
  0xb6   : >> { %2033 = vmatprep.subr.bf16.mxu0 %v965_v28  ;;  %2361 = vmatprep.subr.bf16.mxu1 %v967_v29  ;;  %v1036_v28 = vunpack.c.l.s8.bf16 %v436_v25  ;;  %v1038_v29 = vunpack.c.l.s8.bf16 %v438_v26 }
  0xb9   : >> { %2034 = vmatpush1.bf16.msra.mxu0 %v964_v32  ;;  %2362 = vmatpush1.bf16.msra.mxu1 %v966_v33  ;;  %v445_v32 = vld [vmem:[%s4279_s27 + $0x308] sm:$0xff]  ;;  %v447_v33 = vld [vmem:[%s4279_s27 + $0x318] sm:$0xff] }
  0xba   : >> { %2035 = vmatprep.subr.bf16.mxu0 %v973_v34  ;;  %2363 = vmatprep.subr.bf16.mxu1 %v975_v35  ;;  %v1044_v34 = vunpack.c.h.s8.bf16 %v436_v25  ;;  %v1046_v35 = vunpack.c.h.s8.bf16 %v438_v26  ;;  %v1053_v38 = vunpack.c.l.s8.bf16 %v445_v32  ;;  %v1055_v39 = vunpack.c.l.s8.bf16 %v447_v33 }
  0xbb   : >> { %v1061_v45 = vunpack.c.h.s8.bf16 %v445_v32  ;;  %v1063_v46 = vunpack.c.h.s8.bf16 %v447_v33  ;;  %v4396_v32 = vcombine.high %v4345_v54, %v4345_v54 }
  0xbd   : >> { %2036 = vmatpush1.bf16.msra.mxu0 %v972_v40  ;;  %2364 = vmatpush1.bf16.msra.mxu1 %v974_v41  ;;  %v444_v40 = vld [vmem:[%s4279_s27 + $0x300] sm:$0xff]  ;;  %v446_v41 = vld [vmem:[%s4279_s27 + $0x310] sm:$0xff] }
  0xbe   : >> { %2037 = vmatprep.subr.bf16.mxu0 %v981_v43  ;;  %2365 = vmatprep.subr.bf16.mxu1 %v983_v44  ;;  %v1052_v43 = vunpack.c.l.s8.bf16 %v444_v40  ;;  %v1054_v44 = vunpack.c.l.s8.bf16 %v446_v41 }
  0xc1   : >> { %2038 = vmatpush1.bf16.msra.mxu0 %v980_v47  ;;  %2366 = vmatpush1.bf16.msra.mxu1 %v982_v48  ;;  %v453_v47 = vld [vmem:[%s4279_s27 + $0x348] sm:$0xff]  ;;  %v455_v48 = vld [vmem:[%s4279_s27 + $0x358] sm:$0xff] }
  0xc2   : >> { %2048 = vmatprep.subr.bf16.mxu0 %v989_v49  ;;  %2376 = vmatprep.subr.bf16.mxu1 %v991_v50  ;;  %v1060_v49 = vunpack.c.h.s8.bf16 %v444_v40  ;;  %v1062_v50 = vunpack.c.h.s8.bf16 %v446_v41  ;;  %v1069_v51 = vunpack.c.l.s8.bf16 %v453_v47  ;;  %v1071_v53 = vunpack.c.l.s8.bf16 %v455_v48  ;;  %v487_v40 = vld [vmem:[%s4279_s27 + $0x458] sm:$0xff] }
  0xc3   : >> { %v1077_v59 = vunpack.c.h.s8.bf16 %v453_v47  ;;  %v1079_v60 = vunpack.c.h.s8.bf16 %v455_v48  ;;  %v484_v47 = vld [vmem:[%s4279_s27 + $0x440] sm:$0xff]  ;;  %v486_v48 = vld [vmem:[%s4279_s27 + $0x450] sm:$0xff] }
  0xc4   : >> { %2040 = vmatmul.mubr.bf16.vlgmr.msra.gmra.mrb[0].mxu0 %v4345_v54  ;;  %2368 = vmatmul.mubr.bf16.vlgmr.msra.gmra.mrb[0].mxu1 %v4345_v54 }
  0xc5   : >> { %2049 = vmatpush1.bf16.msra.mxu0 %v988_v55  ;;  %2377 = vmatpush1.bf16.msra.mxu1 %v990_v56  ;;  %v452_v55 = vld [vmem:[%s4279_s27 + $0x340] sm:$0xff]  ;;  %v454_v56 = vld [vmem:[%s4279_s27 + $0x350] sm:$0xff] }
  0xc6   : >> { %2050 = vmatprep.subr.bf16.mxu0 %v997_v57  ;;  %2378 = vmatprep.subr.bf16.mxu1 %v999_v58  ;;  %v1068_v57 = vunpack.c.l.s8.bf16 %v452_v55  ;;  %v1070_v58 = vunpack.c.l.s8.bf16 %v454_v56 }
  0xc7   : >> { %2080 = vmatprep.mubr.bf16.mxu0 %v4351_v61  ;;  %2408 = vmatprep.mubr.bf16.mxu1 %v4351_v61 }
  0xc9   : >> { %2051 = vmatpush1.bf16.msra.mxu0 %v996_v42  ;;  %2379 = vmatpush1.bf16.msra.mxu1 %v998_v62  ;;  %v461_v42 = vld [vmem:[%s4279_s27 + $0x388] sm:$0xff]  ;;  %v463_v62 = vld [vmem:[%s4279_s27 + $0x398] sm:$0xff] }
  0xca   : >> { %2052 = vmatprep.subr.bf16.mxu0 %v1005_v63  ;;  %2380 = vmatprep.subr.bf16.mxu1 %v1007_v0  ;;  %v1076_v63 = vunpack.c.h.s8.bf16 %v452_v55  ;;  %v1078_v0 = vunpack.c.h.s8.bf16 %v454_v56  ;;  %v1085_v1 = vunpack.c.l.s8.bf16 %v461_v42  ;;  %v1087_v2 = vunpack.c.l.s8.bf16 %v463_v62  ;;  %v493_v55 = vld [vmem:[%s4279_s27 + $0x488] sm:$0xff]  ;;  %v495_v56 = vld [vmem:[%s4279_s27 + $0x498] sm:$0xff] }
  0xcb   : >> { %v1093_v7 = vunpack.c.h.s8.bf16 %v461_v42  ;;  %v1095_v8 = vunpack.c.h.s8.bf16 %v463_v62  ;;  %v492_v42 = vld [vmem:[%s4279_s27 + $0x480] sm:$0xff]  ;;  %v494_v62 = vld [vmem:[%s4279_s27 + $0x490] sm:$0xff] }
  0xcd   : >> { %2053 = vmatpush1.bf16.msra.mxu0 %v1004_v3  ;;  %2381 = vmatpush1.bf16.msra.mxu1 %v1006_v4  ;;  %v460_v3 = vld [vmem:[%s4279_s27 + $0x380] sm:$0xff]  ;;  %v462_v4 = vld [vmem:[%s4279_s27 + $0x390] sm:$0xff] }
  0xce   : >> { %2054 = vmatprep.subr.bf16.mxu0 %v1013_v5  ;;  %2382 = vmatprep.subr.bf16.mxu1 %v1015_v6  ;;  %v1084_v5 = vunpack.c.l.s8.bf16 %v460_v3  ;;  %v1086_v6 = vunpack.c.l.s8.bf16 %v462_v4 }
  0xd1   : >> { %2055 = vmatpush1.bf16.msra.mxu0 %v1012_v9  ;;  %2383 = vmatpush1.bf16.msra.mxu1 %v1014_v10  ;;  %v469_v9 = vld [vmem:[%s4279_s27 + $0x3c8] sm:$0xff]  ;;  %v471_v10 = vld [vmem:[%s4279_s27 + $0x3d8] sm:$0xff] }
  0xd2   : >> { %2056 = vmatprep.subr.bf16.mxu0 %v1021_v11  ;;  %2384 = vmatprep.subr.bf16.mxu1 %v1023_v12  ;;  %v1092_v11 = vunpack.c.h.s8.bf16 %v460_v3  ;;  %v1094_v12 = vunpack.c.h.s8.bf16 %v462_v4  ;;  %v1101_v13 = vunpack.c.l.s8.bf16 %v469_v9  ;;  %v1103_v14 = vunpack.c.l.s8.bf16 %v471_v10  ;;  %v501_v3 = vld [vmem:[%s4279_s27 + $0x4c8] sm:$0xff]  ;;  %v503_v4 = vld [vmem:[%s4279_s27 + $0x4d8] sm:$0xff] }
  0xd3   : >> { %v1109_v20 = vunpack.c.h.s8.bf16 %v469_v9  ;;  %v500_v9 = vld [vmem:[%s4279_s27 + $0x4c0] sm:$0xff] }
  0xd5   : >> { %2057 = vmatpush1.bf16.msra.mxu0 %v1020_v15  ;;  %2385 = vmatpush1.bf16.msra.mxu1 %v1022_v16  ;;  %v468_v15 = vld [vmem:[%s4279_s27 + $0x3c0] sm:$0xff]  ;;  %v470_v16 = vld [vmem:[%s4279_s27 + $0x3d0] sm:$0xff] }
  0xd6   : >> { %2058 = vmatprep.subr.bf16.mxu0 %v1029_v17  ;;  %2386 = vmatprep.subr.bf16.mxu1 %v1031_v18  ;;  %v1893_v17 = vcombine.high %v4306_v37, %v4306_v37  ;;  %v1100_v18 = vunpack.c.l.s8.bf16 %v468_v15  ;;  %v1102_v19 = vunpack.c.l.s8.bf16 %v470_v16  ;;  %v1108_v25 = vunpack.c.h.s8.bf16 %v468_v15  ;;  %v509_v15 = vld [vmem:[%s4279_s27 + $0x508] sm:$0xff] }
  0xd7   : >> { %v1110_v26 = vunpack.c.h.s8.bf16 %v470_v16  ;;  %v511_v16 = vld [vmem:[%s4279_s27 + $0x518] sm:$0xff] }
  0xd9   : >> { %2059 = vmatpush1.bf16.msra.mxu0 %v1028_v21  ;;  %2387 = vmatpush1.bf16.msra.mxu1 %v1030_v22  ;;  %v1111_v21 = vunpack.c.h.s8.bf16 %v471_v10  ;;  %v477_v22 = vld [vmem:[%s4279_s27 + $0x408] sm:$0xff]  ;;  %v502_v10 = vld [vmem:[%s4279_s27 + $0x4d0] sm:$0xff] }
  0xda   : >> { %2060 = vmatprep.subr.bf16.mxu0 %v1037_v23  ;;  %2388 = vmatprep.subr.bf16.mxu1 %v1039_v24  ;;  %v479_v23 = vld [vmem:[%s4279_s27 + $0x418] sm:$0xff]  ;;  %v4388_v24 = vrot.slane %v1893_v17, %v4303_v36  ;;  %v1117_v37 = vunpack.c.l.s8.bf16 %v477_v22  ;;  %v1172_v17 = vunpack.c.h.s8.bf16 %v500_v9 }
  0xdd   : >> { %2061 = vmatpush1.bf16.msra.mxu0 %v1036_v28  ;;  %2389 = vmatpush1.bf16.msra.mxu1 %v1038_v29  ;;  %v1119_v28 = vunpack.c.l.s8.bf16 %v479_v23  ;;  %v476_v29 = vld [vmem:[%s4279_s27 + $0x400] sm:$0xff] }
  0xde   : >> { %2062 = vmatprep.subr.bf16.mxu0 %v1045_v30  ;;  %2390 = vmatprep.subr.bf16.mxu1 %v1047_v31  ;;  %v478_v30 = vld [vmem:[%s4279_s27 + $0x410] sm:$0xff]  ;;  %v1909_v31 = vcombine.high %v4388_v24, %v4388_v24  ;;  %v1116_v33 = vunpack.c.l.s8.bf16 %v476_v29 }
  0xe0   : >> { %v4401_v41 = vrot.slane %v1909_v31, %v4303_v36 }
  0xe1   : >> { %2063 = vmatpush1.bf16.msra.mxu0 %v1044_v34  ;;  %2391 = vmatpush1.bf16.msra.mxu1 %v1046_v35  ;;  %v1118_v34 = vunpack.c.l.s8.bf16 %v478_v30  ;;  %v1125_v35 = vunpack.c.h.s8.bf16 %v477_v22  ;;  %v510_v22 = vld [vmem:[%s4279_s27 + $0x510] sm:$0xff] }
  0xe2   : >> { %2064 = vmatprep.subr.bf16.mxu0 %v1053_v38  ;;  %2392 = vmatprep.subr.bf16.mxu1 %v1055_v39  ;;  %v1127_v38 = vunpack.c.h.s8.bf16 %v479_v23  ;;  %v485_v39 = vld [vmem:[%s4279_s27 + $0x448] sm:$0xff]  ;;  %v1190_v31 = vunpack.c.h.s8.bf16 %v510_v22 }
  0xe5   : >> { %2065 = vmatpush1.bf16.msra.mxu0 %v1052_v43  ;;  %2393 = vmatpush1.bf16.msra.mxu1 %v1054_v44  ;;  %v1124_v43 = vunpack.c.h.s8.bf16 %v476_v29  ;;  %v1126_v44 = vunpack.c.h.s8.bf16 %v478_v30  ;;  %v519_v29 = vld [vmem:[%s4279_s27 + $0x558] sm:$0xff] }
  0xe6   : >> { %2066 = vmatprep.subr.bf16.mxu0 %v1061_v45  ;;  %2394 = vmatprep.subr.bf16.mxu1 %v1063_v46  ;;  %v1133_v45 = vunpack.c.l.s8.bf16 %v485_v39  ;;  %v1135_v46 = vunpack.c.l.s8.bf16 %v487_v40 }
  0xe9   : >> { %2067 = vmatpush1.bf16.msra.mxu0 %v1060_v49  ;;  %2395 = vmatpush1.bf16.msra.mxu1 %v1062_v50  ;;  %v1132_v49 = vunpack.c.l.s8.bf16 %v484_v47  ;;  %v1134_v50 = vunpack.c.l.s8.bf16 %v486_v48 }
  0xea   : >> { %2068 = vmatprep.subr.bf16.mxu0 %v1069_v51  ;;  %2396 = vmatprep.subr.bf16.mxu1 %v1071_v53  ;;  %v1141_v51 = vunpack.c.h.s8.bf16 %v485_v39  ;;  %v1143_v53 = vunpack.c.h.s8.bf16 %v487_v40 }
  0xed   : >> { %2069 = vmatpush1.bf16.msra.mxu0 %v1068_v57  ;;  %2397 = vmatpush1.bf16.msra.mxu1 %v1070_v58  ;;  %v1140_v57 = vunpack.c.h.s8.bf16 %v484_v47  ;;  %v1142_v58 = vunpack.c.h.s8.bf16 %v486_v48 }
  0xee   : >> { %2070 = vmatprep.subr.bf16.mxu0 %v1077_v59  ;;  %2398 = vmatprep.subr.bf16.mxu1 %v1079_v60  ;;  %v1149_v59 = vunpack.c.l.s8.bf16 %v493_v55  ;;  %v1151_v60 = vunpack.c.l.s8.bf16 %v495_v56 }
  0xf1   : >> { %2071 = vmatpush1.bf16.msra.mxu0 %v1076_v63  ;;  %2399 = vmatpush1.bf16.msra.mxu1 %v1078_v0  ;;  %v1148_v63 = vunpack.c.l.s8.bf16 %v492_v42  ;;  %v1150_v0 = vunpack.c.l.s8.bf16 %v494_v62 }
  0xf2   : >> { %2072 = vmatprep.subr.bf16.mxu0 %v1085_v1  ;;  %2400 = vmatprep.subr.bf16.mxu1 %v1087_v2  ;;  %v1157_v1 = vunpack.c.h.s8.bf16 %v493_v55  ;;  %v1159_v2 = vunpack.c.h.s8.bf16 %v495_v56 }
  0xf5   : >> { %2073 = vmatpush1.bf16.msra.mxu0 %v1084_v5  ;;  %2401 = vmatpush1.bf16.msra.mxu1 %v1086_v6  ;;  %v1156_v5 = vunpack.c.h.s8.bf16 %v492_v42  ;;  %v1158_v6 = vunpack.c.h.s8.bf16 %v494_v62 }
  0xf6   : >> { %2074 = vmatprep.subr.bf16.mxu0 %v1093_v7  ;;  %2402 = vmatprep.subr.bf16.mxu1 %v1095_v8  ;;  %v1165_v7 = vunpack.c.l.s8.bf16 %v501_v3  ;;  %v1167_v8 = vunpack.c.l.s8.bf16 %v503_v4 }
  0xf9   : >> { %2075 = vmatpush1.bf16.msra.mxu0 %v1092_v11  ;;  %2403 = vmatpush1.bf16.msra.mxu1 %v1094_v12  ;;  %v1164_v11 = vunpack.c.l.s8.bf16 %v500_v9  ;;  %v1166_v12 = vunpack.c.l.s8.bf16 %v502_v10 }
  0xfa   : >> { %2076 = vmatprep.subr.bf16.mxu0 %v1101_v13  ;;  %2404 = vmatprep.subr.bf16.mxu1 %v1103_v14  ;;  %v1173_v13 = vunpack.c.h.s8.bf16 %v501_v3  ;;  %v1175_v14 = vunpack.c.h.s8.bf16 %v503_v4 }
  0xfd   : >> { %2077 = vmatpush1.bf16.msra.mxu0 %v1100_v18  ;;  %2405 = vmatpush1.bf16.msra.mxu1 %v1102_v19  ;;  %v1174_v18 = vunpack.c.h.s8.bf16 %v502_v10  ;;  %v1181_v19 = vunpack.c.l.s8.bf16 %v509_v15 }
  0xfe   : >> { %2078 = vmatprep.subr.bf16.mxu0 %v1109_v20  ;;  %2406 = vmatprep.subr.bf16.mxu1 %v1111_v21  ;;  %v1183_v20 = vunpack.c.l.s8.bf16 %v511_v16  ;;  %v508_v21 = vld [vmem:[%s4279_s27 + $0x500] sm:$0xff] }
  0xff   : >> { %v1180_v23 = vunpack.c.l.s8.bf16 %v508_v21  ;;  %v1188_v30 = vunpack.c.h.s8.bf16 %v508_v21  ;;  %v551_v21 = vld [vmem:[%s4279_s27 + $0x658] sm:$0xff] }
 0x101   : >> { %2079 = vmatpush1.bf16.msra.mxu0 %v1108_v25  ;;  %2407 = vmatpush1.bf16.msra.mxu1 %v1110_v26  ;;  %v1182_v25 = vunpack.c.l.s8.bf16 %v510_v22  ;;  %v1189_v26 = vunpack.c.h.s8.bf16 %v509_v15  ;;  %v4439_v15 = vrot.slane %v4388_v24, %v4303_v36  ;;  %v4445_v22 = vcombine.high %v4401_v41, %v4401_v41 }
 0x102   : >> { %2089 = vmatprep.subr.bf16.mxu0 %v1117_v37  ;;  %2417 = vmatprep.subr.bf16.mxu1 %v1119_v28  ;;  %v1191_v37 = vunpack.c.h.s8.bf16 %v511_v16  ;;  %v517_v28 = vld [vmem:[%s4279_s27 + $0x548] sm:$0xff] }
 0x104   : >> { %2081 = vmatmul.mubr.bf16.vlgmr.msra.gmra.mrb[0].mxu0 %v4396_v32  ;;  %2409 = vmatmul.mubr.bf16.vlgmr.msra.gmra.mrb[0].mxu1 %v4396_v32 }
 0x105   : >> { %2090 = vmatpush1.bf16.msra.mxu0 %v1116_v33  ;;  %2418 = vmatpush1.bf16.msra.mxu1 %v1118_v34  ;;  %v1197_v33 = vunpack.c.l.s8.bf16 %v517_v28  ;;  %v1199_v34 = vunpack.c.l.s8.bf16 %v519_v29 }
 0x106   : >> { %2091 = vmatprep.subr.bf16.mxu0 %v1125_v35  ;;  %2419 = vmatprep.subr.bf16.mxu1 %v1127_v38  ;;  %v516_v35 = vld [vmem:[%s4279_s27 + $0x540] sm:$0xff]  ;;  %v518_v38 = vld [vmem:[%s4279_s27 + $0x550] sm:$0xff] }
 0x107   : >> { %2121 = vmatprep.mubr.bf16.mxu0 %v4401_v41  ;;  %2449 = vmatprep.mubr.bf16.mxu1 %v4401_v41  ;;  %v1196_v39 = vunpack.c.l.s8.bf16 %v516_v35  ;;  %v1198_v40 = vunpack.c.l.s8.bf16 %v518_v38  ;;  %v1204_v47 = vunpack.c.h.s8.bf16 %v516_v35  ;;  %v1206_v48 = vunpack.c.h.s8.bf16 %v518_v38  ;;  %v559_v35 = vld [vmem:[%s4279_s27 + $0x698] sm:$0xff] }
 0x109   : >> { %2092 = vmatpush1.bf16.msra.mxu0 %v1124_v43  ;;  %2420 = vmatpush1.bf16.msra.mxu1 %v1126_v44  ;;  %v1205_v43 = vunpack.c.h.s8.bf16 %v517_v28  ;;  %v1207_v44 = vunpack.c.h.s8.bf16 %v519_v29  ;;  %v550_v28 = vld [vmem:[%s4279_s27 + $0x650] sm:$0xff] }
 0x10a   : >> { %2093 = vmatprep.subr.bf16.mxu0 %v1133_v45  ;;  %2421 = vmatprep.subr.bf16.mxu1 %v1135_v46  ;;  %v525_v45 = vld [vmem:[%s4279_s27 + $0x588] sm:$0xff]  ;;  %v527_v46 = vld [vmem:[%s4279_s27 + $0x598] sm:$0xff] }
 0x10d   : >> { %2094 = vmatpush1.bf16.msra.mxu0 %v1132_v49  ;;  %2422 = vmatpush1.bf16.msra.mxu1 %v1134_v50  ;;  %v1213_v49 = vunpack.c.l.s8.bf16 %v525_v45  ;;  %v1215_v50 = vunpack.c.l.s8.bf16 %v527_v46 }
 0x10e   : >> { %2095 = vmatprep.subr.bf16.mxu0 %v1141_v51  ;;  %2423 = vmatprep.subr.bf16.mxu1 %v1143_v53  ;;  %v524_v51 = vld [vmem:[%s4279_s27 + $0x580] sm:$0xff]  ;;  %v526_v53 = vld [vmem:[%s4279_s27 + $0x590] sm:$0xff] }
 0x10f   : >> { %v1212_v55 = vunpack.c.l.s8.bf16 %v524_v51  ;;  %v1214_v56 = vunpack.c.l.s8.bf16 %v526_v53  ;;  %v1220_v42 = vunpack.c.h.s8.bf16 %v524_v51  ;;  %v1222_v62 = vunpack.c.h.s8.bf16 %v526_v53  ;;  %v567_v51 = vld [vmem:[%s4279_s27 + $0x6d8] sm:$0xff] }
 0x111   : >> { %2096 = vmatpush1.bf16.msra.mxu0 %v1140_v57  ;;  %2424 = vmatpush1.bf16.msra.mxu1 %v1142_v58  ;;  %v1221_v57 = vunpack.c.h.s8.bf16 %v525_v45  ;;  %v1223_v58 = vunpack.c.h.s8.bf16 %v527_v46  ;;  %v558_v45 = vld [vmem:[%s4279_s27 + $0x690] sm:$0xff] }
 0x112   : >> { %2097 = vmatprep.subr.bf16.mxu0 %v1149_v59  ;;  %2425 = vmatprep.subr.bf16.mxu1 %v1151_v60  ;;  %v533_v59 = vld [vmem:[%s4279_s27 + $0x5c8] sm:$0xff]  ;;  %v535_v60 = vld [vmem:[%s4279_s27 + $0x5d8] sm:$0xff] }
 0x115   : >> { %2098 = vmatpush1.bf16.msra.mxu0 %v1148_v63  ;;  %2426 = vmatpush1.bf16.msra.mxu1 %v1150_v0  ;;  %v1229_v63 = vunpack.c.l.s8.bf16 %v533_v59  ;;  %v1231_v0 = vunpack.c.l.s8.bf16 %v535_v60 }
 0x116   : >> { %2099 = vmatprep.subr.bf16.mxu0 %v1157_v1  ;;  %2427 = vmatprep.subr.bf16.mxu1 %v1159_v2  ;;  %v532_v1 = vld [vmem:[%s4279_s27 + $0x5c0] sm:$0xff]  ;;  %v534_v2 = vld [vmem:[%s4279_s27 + $0x5d0] sm:$0xff] }
 0x117   : >> { %v1228_v3 = vunpack.c.l.s8.bf16 %v532_v1  ;;  %v1230_v4 = vunpack.c.l.s8.bf16 %v534_v2  ;;  %v1236_v9 = vunpack.c.h.s8.bf16 %v532_v1  ;;  %v1238_v10 = vunpack.c.h.s8.bf16 %v534_v2  ;;  %v575_v1 = vld [vmem:[%s4279_s27 + $0x718] sm:$0xff] }
 0x119   : >> { %2100 = vmatpush1.bf16.msra.mxu0 %v1156_v5  ;;  %2428 = vmatpush1.bf16.msra.mxu1 %v1158_v6  ;;  %v1237_v5 = vunpack.c.h.s8.bf16 %v533_v59  ;;  %v1239_v6 = vunpack.c.h.s8.bf16 %v535_v60  ;;  %v566_v59 = vld [vmem:[%s4279_s27 + $0x6d0] sm:$0xff] }
 0x11a   : >> { %2101 = vmatprep.subr.bf16.mxu0 %v1165_v7  ;;  %2429 = vmatprep.subr.bf16.mxu1 %v1167_v8  ;;  %v541_v7 = vld [vmem:[%s4279_s27 + $0x608] sm:$0xff]  ;;  %v543_v8 = vld [vmem:[%s4279_s27 + $0x618] sm:$0xff] }
 0x11d   : >> { %2102 = vmatpush1.bf16.msra.mxu0 %v1164_v11  ;;  %2430 = vmatpush1.bf16.msra.mxu1 %v1166_v12  ;;  %v1245_v11 = vunpack.c.l.s8.bf16 %v541_v7  ;;  %v1247_v12 = vunpack.c.l.s8.bf16 %v543_v8 }
 0x11e   : >> { %2103 = vmatprep.subr.bf16.mxu0 %v1173_v13  ;;  %2431 = vmatprep.subr.bf16.mxu1 %v1175_v14  ;;  %v540_v13 = vld [vmem:[%s4279_s27 + $0x600] sm:$0xff]  ;;  %v542_v14 = vld [vmem:[%s4279_s27 + $0x610] sm:$0xff] }
 0x11f   : >> { %v1244_v16 = vunpack.c.l.s8.bf16 %v540_v13  ;;  %v1252_v24 = vunpack.c.h.s8.bf16 %v540_v13  ;;  %v583_v13 = vld [vmem:[%s4279_s27 + $0x758] sm:$0xff] }
 0x121   : >> { %2104 = vmatpush1.bf16.msra.mxu0 %v1172_v17  ;;  %2432 = vmatpush1.bf16.msra.mxu1 %v1174_v18  ;;  %v1246_v17 = vunpack.c.l.s8.bf16 %v542_v14  ;;  %v1253_v18 = vunpack.c.h.s8.bf16 %v541_v7  ;;  %v574_v7 = vld [vmem:[%s4279_s27 + $0x710] sm:$0xff] }
 0x122   : >> { %2105 = vmatprep.subr.bf16.mxu0 %v1181_v19  ;;  %2433 = vmatprep.subr.bf16.mxu1 %v1183_v20  ;;  %v1255_v19 = vunpack.c.h.s8.bf16 %v543_v8  ;;  %v549_v20 = vld [vmem:[%s4279_s27 + $0x648] sm:$0xff] }
 0x125   : >> { %2106 = vmatpush1.bf16.msra.mxu0 %v1180_v23  ;;  %2434 = vmatpush1.bf16.msra.mxu1 %v1182_v25  ;;  %v1254_v23 = vunpack.c.h.s8.bf16 %v542_v14  ;;  %v1261_v25 = vunpack.c.l.s8.bf16 %v549_v20 }
 0x126   : >> { %2107 = vmatprep.subr.bf16.mxu0 %v1189_v26  ;;  %2435 = vmatprep.subr.bf16.mxu1 %v1191_v37  ;;  %v1263_v26 = vunpack.c.l.s8.bf16 %v551_v21  ;;  %v548_v37 = vld [vmem:[%s4279_s27 + $0x640] sm:$0xff] }
 0x127   : >> { %v1260_v29 = vunpack.c.l.s8.bf16 %v548_v37  ;;  %v1268_v38 = vunpack.c.h.s8.bf16 %v548_v37  ;;  %v591_v37 = vld [vmem:[%s4279_s27 + $0x798] sm:$0xff] }
 0x129   : >> { %2108 = vmatpush1.bf16.msra.mxu0 %v1188_v30  ;;  %2436 = vmatpush1.bf16.msra.mxu1 %v1190_v31  ;;  %v1262_v30 = vunpack.c.l.s8.bf16 %v550_v28  ;;  %v1269_v31 = vunpack.c.h.s8.bf16 %v549_v20  ;;  %v582_v20 = vld [vmem:[%s4279_s27 + $0x750] sm:$0xff] }
 0x12a   : >> { %2109 = vmatprep.subr.bf16.mxu0 %v1197_v33  ;;  %2437 = vmatprep.subr.bf16.mxu1 %v1199_v34  ;;  %v1271_v33 = vunpack.c.h.s8.bf16 %v551_v21  ;;  %v557_v34 = vld [vmem:[%s4279_s27 + $0x688] sm:$0xff] }
 0x12d   : >> { %2110 = vmatpush1.bf16.msra.mxu0 %v1196_v39  ;;  %2438 = vmatpush1.bf16.msra.mxu1 %v1198_v40  ;;  %v1270_v39 = vunpack.c.h.s8.bf16 %v550_v28  ;;  %v1277_v40 = vunpack.c.l.s8.bf16 %v557_v34 }
 0x12e   : >> { %2111 = vmatprep.subr.bf16.mxu0 %v1205_v43  ;;  %2439 = vmatprep.subr.bf16.mxu1 %v1207_v44  ;;  %v1279_v43 = vunpack.c.l.s8.bf16 %v559_v35  ;;  %v556_v44 = vld [vmem:[%s4279_s27 + $0x680] sm:$0xff] }
 0x12f   : >> { %v1276_v46 = vunpack.c.l.s8.bf16 %v556_v44  ;;  %v1284_v53 = vunpack.c.h.s8.bf16 %v556_v44  ;;  %v599_v44 = vld [vmem:[%s4279_s27 + $0x7d8] sm:$0xff] }
 0x131   : >> { %2112 = vmatpush1.bf16.msra.mxu0 %v1204_v47  ;;  %2440 = vmatpush1.bf16.msra.mxu1 %v1206_v48  ;;  %v1278_v47 = vunpack.c.l.s8.bf16 %v558_v45  ;;  %v1285_v48 = vunpack.c.h.s8.bf16 %v557_v34  ;;  %v590_v34 = vld [vmem:[%s4279_s27 + $0x790] sm:$0xff] }
 0x132   : >> { %2113 = vmatprep.subr.bf16.mxu0 %v1213_v49  ;;  %2441 = vmatprep.subr.bf16.mxu1 %v1215_v50  ;;  %v1287_v49 = vunpack.c.h.s8.bf16 %v559_v35  ;;  %v565_v50 = vld [vmem:[%s4279_s27 + $0x6c8] sm:$0xff] }
 0x135   : >> { %2114 = vmatpush1.bf16.msra.mxu0 %v1212_v55  ;;  %2442 = vmatpush1.bf16.msra.mxu1 %v1214_v56  ;;  %v1286_v55 = vunpack.c.h.s8.bf16 %v558_v45  ;;  %v1293_v56 = vunpack.c.l.s8.bf16 %v565_v50 }
 0x136   : >> { %2115 = vmatprep.subr.bf16.mxu0 %v1221_v57  ;;  %2443 = vmatprep.subr.bf16.mxu1 %v1223_v58  ;;  %v1295_v57 = vunpack.c.l.s8.bf16 %v567_v51  ;;  %v564_v58 = vld [vmem:[%s4279_s27 + $0x6c0] sm:$0xff] }
 0x137   : >> { %v1292_v60 = vunpack.c.l.s8.bf16 %v564_v58  ;;  %v1300_v2 = vunpack.c.h.s8.bf16 %v564_v58  ;;  %v605_v58 = vld [vmem:[%s4279_s27 + $0x808] sm:$0xff] }
 0x139   : >> { %2116 = vmatpush1.bf16.msra.mxu0 %v1220_v42  ;;  %2444 = vmatpush1.bf16.msra.mxu1 %v1222_v62  ;;  %v1294_v42 = vunpack.c.l.s8.bf16 %v566_v59  ;;  %v1301_v62 = vunpack.c.h.s8.bf16 %v565_v50  ;;  %v598_v50 = vld [vmem:[%s4279_s27 + $0x7d0] sm:$0xff] }
 0x13a   : >> { %2117 = vmatprep.subr.bf16.mxu0 %v1229_v63  ;;  %2445 = vmatprep.subr.bf16.mxu1 %v1231_v0  ;;  %v1303_v63 = vunpack.c.h.s8.bf16 %v567_v51  ;;  %v573_v0 = vld [vmem:[%s4279_s27 + $0x708] sm:$0xff] }
 0x13b   : >> { %v4478_v51 = vld [vmem:[%s4298_s1 + $0x8] sm:$0xff] }
 0x13d   : >> { %2118 = vmatpush1.bf16.msra.mxu0 %v1228_v3  ;;  %2446 = vmatpush1.bf16.msra.mxu1 %v1230_v4  ;;  %v1302_v3 = vunpack.c.h.s8.bf16 %v566_v59  ;;  %v1309_v4 = vunpack.c.l.s8.bf16 %v573_v0  ;;  %v607_v59 = vld [vmem:[%s4279_s27 + $0x818] sm:$0xff] }
 0x13e   : >> { %2119 = vmatprep.subr.bf16.mxu0 %v1237_v5  ;;  %2447 = vmatprep.subr.bf16.mxu1 %v1239_v6  ;;  %v1311_v5 = vunpack.c.l.s8.bf16 %v575_v1  ;;  %v572_v6 = vld [vmem:[%s4279_s27 + $0x700] sm:$0xff] }
 0x13f   : >> { %v1308_v8 = vunpack.c.l.s8.bf16 %v572_v6  ;;  %v1316_v14 = vunpack.c.h.s8.bf16 %v572_v6 }
 0x141   : >> { %2120 = vmatpush1.bf16.msra.mxu0 %v1236_v9  ;;  %2448 = vmatpush1.bf16.msra.mxu1 %v1238_v10  ;;  %v1310_v9 = vunpack.c.l.s8.bf16 %v574_v7  ;;  %v1317_v10 = vunpack.c.h.s8.bf16 %v573_v0  ;;  %v1375_v0 = vunpack.c.l.s8.bf16 %v607_v59 }
 0x142   : >> { %2130 = vmatprep.subr.bf16.mxu0 %v1245_v11  ;;  %2458 = vmatprep.subr.bf16.mxu1 %v1247_v12  ;;  %v1319_v11 = vunpack.c.h.s8.bf16 %v575_v1  ;;  %v581_v12 = vld [vmem:[%s4279_s27 + $0x748] sm:$0xff]  ;;  %v604_v1 = vld [vmem:[%s4279_s27 + $0x800] sm:$0xff] }
 0x144   : >> { %2122 = vmatmul.mubr.bf16.vlgmr.msra.gmra.mrb[0].mxu0 %v4439_v15  ;;  %2450 = vmatmul.mubr.bf16.vlgmr.msra.gmra.mrb[0].mxu1 %v4439_v15 }
 0x145   : >> { %2131 = vmatpush1.bf16.msra.mxu0 %v1244_v16  ;;  %2459 = vmatpush1.bf16.msra.mxu1 %v1246_v17  ;;  %v1318_v16 = vunpack.c.h.s8.bf16 %v574_v7  ;;  %v1325_v17 = vunpack.c.l.s8.bf16 %v581_v12  ;;  %v1381_v7 = vunpack.c.h.s8.bf16 %v605_v58 }
 0x146   : >> { %2132 = vmatprep.subr.bf16.mxu0 %v1253_v18  ;;  %2460 = vmatprep.subr.bf16.mxu1 %v1255_v19  ;;  %v1327_v18 = vunpack.c.l.s8.bf16 %v583_v13  ;;  %v580_v19 = vld [vmem:[%s4279_s27 + $0x740] sm:$0xff] }
 0x147   : >> { %2162 = vmatprep.mubr.bf16.mxu0 %v4445_v22  ;;  %2490 = vmatprep.mubr.bf16.mxu1 %v4445_v22  ;;  %v1324_v21 = vunpack.c.l.s8.bf16 %v580_v19  ;;  %v1332_v28 = vunpack.c.h.s8.bf16 %v580_v19 }
 0x149   : >> { %2133 = vmatpush1.bf16.msra.mxu0 %v1252_v24  ;;  %2461 = vmatpush1.bf16.msra.mxu1 %v1254_v23  ;;  %v1326_v24 = vunpack.c.l.s8.bf16 %v582_v20  ;;  %v1333_v23 = vunpack.c.h.s8.bf16 %v581_v12  ;;  %v1380_v12 = vunpack.c.h.s8.bf16 %v604_v1 }
 0x14a   : >> { %2134 = vmatprep.subr.bf16.mxu0 %v1261_v25  ;;  %2462 = vmatprep.subr.bf16.mxu1 %v1263_v26  ;;  %v1335_v25 = vunpack.c.h.s8.bf16 %v583_v13  ;;  %v589_v26 = vld [vmem:[%s4279_s27 + $0x788] sm:$0xff] }
 0x14d   : >> { %2135 = vmatpush1.bf16.msra.mxu0 %v1260_v29  ;;  %2463 = vmatpush1.bf16.msra.mxu1 %v1262_v30  ;;  %v1334_v29 = vunpack.c.h.s8.bf16 %v582_v20  ;;  %v1341_v30 = vunpack.c.l.s8.bf16 %v589_v26 }
 0x14e   : >> { %2136 = vmatprep.subr.bf16.mxu0 %v1269_v31  ;;  %2464 = vmatprep.subr.bf16.mxu1 %v1271_v33  ;;  %v1343_v31 = vunpack.c.l.s8.bf16 %v591_v37  ;;  %v588_v33 = vld [vmem:[%s4279_s27 + $0x780] sm:$0xff] }
 0x14f   : >> { %v1340_v35 = vunpack.c.l.s8.bf16 %v588_v33  ;;  %v1348_v45 = vunpack.c.h.s8.bf16 %v588_v33 }
 0x151   : >> { %2137 = vmatpush1.bf16.msra.mxu0 %v1268_v38  ;;  %2465 = vmatpush1.bf16.msra.mxu1 %v1270_v39  ;;  %v1342_v38 = vunpack.c.l.s8.bf16 %v590_v34  ;;  %v1349_v39 = vunpack.c.h.s8.bf16 %v589_v26 }
 0x152   : >> { %2138 = vmatprep.subr.bf16.mxu0 %v1277_v40  ;;  %2466 = vmatprep.subr.bf16.mxu1 %v1279_v43  ;;  %v1351_v40 = vunpack.c.h.s8.bf16 %v591_v37  ;;  %v597_v43 = vld [vmem:[%s4279_s27 + $0x7c8] sm:$0xff] }
 0x155   : >> { %2139 = vmatpush1.bf16.msra.mxu0 %v1276_v46  ;;  %2467 = vmatpush1.bf16.msra.mxu1 %v1278_v47  ;;  %v1350_v46 = vunpack.c.h.s8.bf16 %v590_v34  ;;  %v1357_v47 = vunpack.c.l.s8.bf16 %v597_v43 }
 0x156   : >> { %2140 = vmatprep.subr.bf16.mxu0 %v1285_v48  ;;  %2468 = vmatprep.subr.bf16.mxu1 %v1287_v49  ;;  %v1359_v48 = vunpack.c.l.s8.bf16 %v599_v44  ;;  %v596_v49 = vld [vmem:[%s4279_s27 + $0x7c0] sm:$0xff] }
 0x159   : >> { %2141 = vmatpush1.bf16.msra.mxu0 %v1284_v53  ;;  %2469 = vmatpush1.bf16.msra.mxu1 %v1286_v55  ;;  %v1356_v53 = vunpack.c.l.s8.bf16 %v596_v49  ;;  %v1358_v55 = vunpack.c.l.s8.bf16 %v598_v50 }
 0x15a   : >> { %2142 = vmatprep.subr.bf16.mxu0 %v1293_v56  ;;  %2470 = vmatprep.subr.bf16.mxu1 %v1295_v57  ;;  %v1365_v56 = vunpack.c.h.s8.bf16 %v597_v43  ;;  %v1367_v57 = vunpack.c.h.s8.bf16 %v599_v44 }
 0x15d   : >> { %2143 = vmatpush1.bf16.msra.mxu0 %v1292_v60  ;;  %2471 = vmatpush1.bf16.msra.mxu1 %v1294_v42  ;;  %v4484_v60 = vrot.slane %v4478_v51, %v4303_v36  ;;  %v1364_v42 = vunpack.c.h.s8.bf16 %v596_v49 }
 0x15e   : >> { %2144 = vmatprep.subr.bf16.mxu0 %v1301_v62  ;;  %2472 = vmatprep.subr.bf16.mxu1 %v1303_v63  ;;  %v1366_v62 = vunpack.c.h.s8.bf16 %v598_v50  ;;  %v1373_v63 = vunpack.c.l.s8.bf16 %v605_v58 }
 0x161   : >> { %2145 = vmatpush1.bf16.msra.mxu0 %v1300_v2  ;;  %2473 = vmatpush1.bf16.msra.mxu1 %v1302_v3  ;;  %v606_v2 = vld [vmem:[%s4279_s27 + $0x810] sm:$0xff]  ;;  %v1957_v3 = vcombine.high %v4484_v60, %v4484_v60 }
 0x162   : >> { %2146 = vmatprep.subr.bf16.mxu0 %v1309_v4  ;;  %2474 = vmatprep.subr.bf16.mxu1 %v1311_v5  ;;  %v4492_v4 = vcombine.high %v4439_v15, %v4439_v15  ;;  %v1372_v5 = vunpack.c.l.s8.bf16 %v604_v1  ;;  %v1374_v6 = vunpack.c.l.s8.bf16 %v606_v2  ;;  %v1382_v13 = vunpack.c.h.s8.bf16 %v606_v2 }
 0x165   : >> { %2147 = vmatpush1.bf16.msra.mxu0 %v1308_v8  ;;  %2475 = vmatpush1.bf16.msra.mxu1 %v1310_v9  ;;  %v1383_v8 = vunpack.c.h.s8.bf16 %v607_v59  ;;  %v613_v9 = vld [vmem:[%s4279_s27 + $0x848] sm:$0xff] }
 0x166   : >> { %2148 = vmatprep.subr.bf16.mxu0 %v1317_v10  ;;  %2476 = vmatprep.subr.bf16.mxu1 %v1319_v11  ;;  %v615_v10 = vld [vmem:[%s4279_s27 + $0x858] sm:$0xff]  ;;  %v4497_v11 = vrot.slane %v1957_v3, %v4303_v36 }
 0x169   : >> { %2149 = vmatpush1.bf16.msra.mxu0 %v1316_v14  ;;  %2477 = vmatpush1.bf16.msra.mxu1 %v1318_v16  ;;  %v1389_v14 = vunpack.c.l.s8.bf16 %v613_v9  ;;  %v1391_v16 = vunpack.c.l.s8.bf16 %v615_v10 }
 0x16a   : >> { %2150 = vmatprep.subr.bf16.mxu0 %v1325_v17  ;;  %2478 = vmatprep.subr.bf16.mxu1 %v1327_v18  ;;  %v612_v17 = vld [vmem:[%s4279_s27 + $0x840] sm:$0xff]  ;;  %v614_v18 = vld [vmem:[%s4279_s27 + $0x850] sm:$0xff] }
 0x16b   : >> { %v1388_v19 = vunpack.c.l.s8.bf16 %v612_v17  ;;  %v1390_v20 = vunpack.c.l.s8.bf16 %v614_v18  ;;  %v1396_v26 = vunpack.c.h.s8.bf16 %v612_v17  ;;  %v1398_v37 = vunpack.c.h.s8.bf16 %v614_v18 }
 0x16d   : >> { %2151 = vmatpush1.bf16.msra.mxu0 %v1324_v21  ;;  %2479 = vmatpush1.bf16.msra.mxu1 %v1326_v24  ;;  %v1397_v21 = vunpack.c.h.s8.bf16 %v613_v9  ;;  %v1399_v24 = vunpack.c.h.s8.bf16 %v615_v10 }
 0x16e   : >> { %2152 = vmatprep.subr.bf16.mxu0 %v1333_v23  ;;  %2480 = vmatprep.subr.bf16.mxu1 %v1335_v25  ;;  %v621_v23 = vld [vmem:[%s4279_s27 + $0x888] sm:$0xff]  ;;  %v623_v25 = vld [vmem:[%s4279_s27 + $0x898] sm:$0xff] }
 0x171   : >> { %2153 = vmatpush1.bf16.msra.mxu0 %v1332_v28  ;;  %2481 = vmatpush1.bf16.msra.mxu1 %v1334_v29  ;;  %v1405_v28 = vunpack.c.l.s8.bf16 %v621_v23  ;;  %v1407_v29 = vunpack.c.l.s8.bf16 %v623_v25 }
 0x172   : >> { %2154 = vmatprep.subr.bf16.mxu0 %v1341_v30  ;;  %2482 = vmatprep.subr.bf16.mxu1 %v1343_v31  ;;  %v620_v30 = vld [vmem:[%s4279_s27 + $0x880] sm:$0xff]  ;;  %v622_v31 = vld [vmem:[%s4279_s27 + $0x890] sm:$0xff] }
 0x173   : >> { %v1404_v33 = vunpack.c.l.s8.bf16 %v620_v30  ;;  %v1406_v34 = vunpack.c.l.s8.bf16 %v622_v31  ;;  %v1412_v43 = vunpack.c.h.s8.bf16 %v620_v30  ;;  %v1414_v44 = vunpack.c.h.s8.bf16 %v622_v31 }
 0x175   : >> { %2155 = vmatpush1.bf16.msra.mxu0 %v1340_v35  ;;  %2483 = vmatpush1.bf16.msra.mxu1 %v1342_v38  ;;  %v1413_v35 = vunpack.c.h.s8.bf16 %v621_v23  ;;  %v1415_v38 = vunpack.c.h.s8.bf16 %v623_v25 }
 0x176   : >> { %2156 = vmatprep.subr.bf16.mxu0 %v1349_v39  ;;  %2484 = vmatprep.subr.bf16.mxu1 %v1351_v40  ;;  %v629_v39 = vld [vmem:[%s4279_s27 + $0x8c8] sm:$0xff]  ;;  %v631_v40 = vld [vmem:[%s4279_s27 + $0x8d8] sm:$0xff] }
 0x179   : >> { %2157 = vmatpush1.bf16.msra.mxu0 %v1348_v45  ;;  %2485 = vmatpush1.bf16.msra.mxu1 %v1350_v46  ;;  %v1421_v45 = vunpack.c.l.s8.bf16 %v629_v39  ;;  %v1423_v46 = vunpack.c.l.s8.bf16 %v631_v40 }
 0x17a   : >> { %2158 = vmatprep.subr.bf16.mxu0 %v1357_v47  ;;  %2486 = vmatprep.subr.bf16.mxu1 %v1359_v48  ;;  %v628_v47 = vld [vmem:[%s4279_s27 + $0x8c0] sm:$0xff]  ;;  %v630_v48 = vld [vmem:[%s4279_s27 + $0x8d0] sm:$0xff] }
 0x17b   : >> { %v1420_v49 = vunpack.c.l.s8.bf16 %v628_v47  ;;  %v1422_v50 = vunpack.c.l.s8.bf16 %v630_v48  ;;  %v1428_v58 = vunpack.c.h.s8.bf16 %v628_v47  ;;  %v1430_v59 = vunpack.c.h.s8.bf16 %v630_v48 }
 0x17d   : >> { %2159 = vmatpush1.bf16.msra.mxu0 %v1356_v53  ;;  %2487 = vmatpush1.bf16.msra.mxu1 %v1358_v55  ;;  %v1429_v53 = vunpack.c.h.s8.bf16 %v629_v39  ;;  %v1431_v55 = vunpack.c.h.s8.bf16 %v631_v40 }
 0x17e   : >> { %2160 = vmatprep.subr.bf16.mxu0 %v1365_v56  ;;  %2488 = vmatprep.subr.bf16.mxu1 %v1367_v57  ;;  %v637_v56 = vld [vmem:[%s4279_s27 + $0x908] sm:$0xff]  ;;  %v639_v57 = vld [vmem:[%s4279_s27 + $0x918] sm:$0xff] }
 0x17f   : >> { %v1445_v3 = vunpack.c.h.s8.bf16 %v637_v56 }
 0x181   : >> { %2161 = vmatpush1.bf16.msra.mxu0 %v1364_v42  ;;  %2489 = vmatpush1.bf16.msra.mxu1 %v1366_v62  ;;  %v1437_v42 = vunpack.c.l.s8.bf16 %v637_v56  ;;  %v1439_v62 = vunpack.c.l.s8.bf16 %v639_v57 }
 0x182   : >> { %2171 = vmatprep.subr.bf16.mxu0 %v1373_v63  ;;  %2499 = vmatprep.subr.bf16.mxu1 %v1375_v0  ;;  %v636_v63 = vld [vmem:[%s4279_s27 + $0x900] sm:$0xff]  ;;  %v638_v0 = vld [vmem:[%s4279_s27 + $0x910] sm:$0xff] }
 0x183   : >> { %v1436_v1 = vunpack.c.l.s8.bf16 %v636_v63  ;;  %v1438_v2 = vunpack.c.l.s8.bf16 %v638_v0  ;;  %v1446_v9 = vunpack.c.h.s8.bf16 %v638_v0 }
 0x184   : >> { %2163 = vmatmul.mubr.bf16.vlgmr.msra.gmra.mrb[0].mxu0 %v4492_v4  ;;  %2491 = vmatmul.mubr.bf16.vlgmr.msra.gmra.mrb[0].mxu1 %v4492_v4 }
 0x185   : >> { %2172 = vmatpush1.bf16.msra.mxu0 %v1372_v5  ;;  %2500 = vmatpush1.bf16.msra.mxu1 %v1374_v6  ;;  %v1447_v5 = vunpack.c.h.s8.bf16 %v639_v57  ;;  %v645_v6 = vld [vmem:[%s4279_s27 + $0x948] sm:$0xff] }
 0x186   : >> { %2173 = vmatprep.subr.bf16.mxu0 %v1381_v7  ;;  %2501 = vmatprep.subr.bf16.mxu1 %v1383_v8  ;;  %v647_v7 = vld [vmem:[%s4279_s27 + $0x958] sm:$0xff]  ;;  %v1444_v8 = vunpack.c.h.s8.bf16 %v636_v63  ;;  %v1453_v10 = vunpack.c.l.s8.bf16 %v645_v6  ;;  %v1461_v18 = vunpack.c.h.s8.bf16 %v645_v6  ;;  %v4541_v6 = vcombine.high %v4497_v11, %v4497_v11 }
 0x187   : >> { %2203 = vmatprep.mubr.bf16.mxu0 %v4497_v11  ;;  %2531 = vmatprep.mubr.bf16.mxu1 %v4497_v11 }
 0x189   : >> { %2174 = vmatpush1.bf16.msra.mxu0 %v1380_v12  ;;  %2502 = vmatpush1.bf16.msra.mxu1 %v1382_v13  ;;  %v1455_v12 = vunpack.c.l.s8.bf16 %v647_v7  ;;  %v644_v13 = vld [vmem:[%s4279_s27 + $0x940] sm:$0xff] }
 0x18a   : >> { %2175 = vmatprep.subr.bf16.mxu0 %v1389_v14  ;;  %2503 = vmatprep.subr.bf16.mxu1 %v1391_v16  ;;  %v646_v14 = vld [vmem:[%s4279_s27 + $0x950] sm:$0xff]  ;;  %v1452_v16 = vunpack.c.l.s8.bf16 %v644_v13 }
 0x18b   : >> { %v1454_v17 = vunpack.c.l.s8.bf16 %v646_v14  ;;  %v1462_v23 = vunpack.c.h.s8.bf16 %v646_v14 }
 0x18d   : >> { %2176 = vmatpush1.bf16.msra.mxu0 %v1388_v19  ;;  %2504 = vmatpush1.bf16.msra.mxu1 %v1390_v20  ;;  %v1463_v19 = vunpack.c.h.s8.bf16 %v647_v7  ;;  %v653_v20 = vld [vmem:[%s4279_s27 + $0x988] sm:$0xff] }
 0x18e   : >> { %2177 = vmatprep.subr.bf16.mxu0 %v1397_v21  ;;  %2505 = vmatprep.subr.bf16.mxu1 %v1399_v24  ;;  %v655_v21 = vld [vmem:[%s4279_s27 + $0x998] sm:$0xff]  ;;  %v1460_v24 = vunpack.c.h.s8.bf16 %v644_v13  ;;  %v1469_v25 = vunpack.c.l.s8.bf16 %v653_v20  ;;  %v1477_v31 = vunpack.c.h.s8.bf16 %v653_v20 }
 0x191   : >> { %2178 = vmatpush1.bf16.msra.mxu0 %v1396_v26  ;;  %2506 = vmatpush1.bf16.msra.mxu1 %v1398_v37  ;;  %v1471_v26 = vunpack.c.l.s8.bf16 %v655_v21  ;;  %v652_v37 = vld [vmem:[%s4279_s27 + $0x980] sm:$0xff] }
 0x192   : >> { %2179 = vmatprep.subr.bf16.mxu0 %v1405_v28  ;;  %2507 = vmatprep.subr.bf16.mxu1 %v1407_v29  ;;  %v654_v28 = vld [vmem:[%s4279_s27 + $0x990] sm:$0xff]  ;;  %v1468_v29 = vunpack.c.l.s8.bf16 %v652_v37 }
 0x193   : >> { %v1470_v30 = vunpack.c.l.s8.bf16 %v654_v28  ;;  %v1478_v39 = vunpack.c.h.s8.bf16 %v654_v28 }
 0x195   : >> { %2180 = vmatpush1.bf16.msra.mxu0 %v1404_v33  ;;  %2508 = vmatpush1.bf16.msra.mxu1 %v1406_v34  ;;  %v1479_v33 = vunpack.c.h.s8.bf16 %v655_v21  ;;  %v661_v34 = vld [vmem:[%s4279_s27 + $0x9c8] sm:$0xff] }
 0x196   : >> { %2181 = vmatprep.subr.bf16.mxu0 %v1413_v35  ;;  %2509 = vmatprep.subr.bf16.mxu1 %v1415_v38  ;;  %v663_v35 = vld [vmem:[%s4279_s27 + $0x9d8] sm:$0xff]  ;;  %v1476_v38 = vunpack.c.h.s8.bf16 %v652_v37  ;;  %v1485_v40 = vunpack.c.l.s8.bf16 %v661_v34  ;;  %v1493_v48 = vunpack.c.h.s8.bf16 %v661_v34 }
 0x199   : >> { %2182 = vmatpush1.bf16.msra.mxu0 %v1412_v43  ;;  %2510 = vmatpush1.bf16.msra.mxu1 %v1414_v44  ;;  %v1487_v43 = vunpack.c.l.s8.bf16 %v663_v35  ;;  %v660_v44 = vld [vmem:[%s4279_s27 + $0x9c0] sm:$0xff] }
 0x19a   : >> { %2183 = vmatprep.subr.bf16.mxu0 %v1421_v45  ;;  %2511 = vmatprep.subr.bf16.mxu1 %v1423_v46  ;;  %v662_v45 = vld [vmem:[%s4279_s27 + $0x9d0] sm:$0xff]  ;;  %v1484_v46 = vunpack.c.l.s8.bf16 %v660_v44 }
 0x19b   : >> { %v1486_v47 = vunpack.c.l.s8.bf16 %v662_v45  ;;  %v1494_v56 = vunpack.c.h.s8.bf16 %v662_v45 }
 0x19d   : >> { %2184 = vmatpush1.bf16.msra.mxu0 %v1420_v49  ;;  %2512 = vmatpush1.bf16.msra.mxu1 %v1422_v50  ;;  %v1495_v49 = vunpack.c.h.s8.bf16 %v663_v35  ;;  %v669_v50 = vld [vmem:[%s4279_s27 + $0xa08] sm:$0xff] }
 0x19e   : >> { %2185 = vmatprep.subr.bf16.mxu0 %v1429_v53  ;;  %2513 = vmatprep.subr.bf16.mxu1 %v1431_v55  ;;  %v671_v53 = vld [vmem:[%s4279_s27 + $0xa18] sm:$0xff]  ;;  %v1492_v55 = vunpack.c.h.s8.bf16 %v660_v44  ;;  %v1501_v57 = vunpack.c.l.s8.bf16 %v669_v50 }
 0x1a1   : >> { %2186 = vmatpush1.bf16.msra.mxu0 %v1428_v58  ;;  %2514 = vmatpush1.bf16.msra.mxu1 %v1430_v59  ;;  %v1503_v58 = vunpack.c.l.s8.bf16 %v671_v53  ;;  %v668_v59 = vld [vmem:[%s4279_s27 + $0xa00] sm:$0xff] }
 0x1a2   : >> { %2187 = vmatprep.subr.bf16.mxu0 %v1437_v42  ;;  %2515 = vmatprep.subr.bf16.mxu1 %v1439_v62  ;;  %v670_v42 = vld [vmem:[%s4279_s27 + $0xa10] sm:$0xff]  ;;  %v4535_v62 = vrot.slane %v4484_v60, %v4303_v36  ;;  %v1500_v63 = vunpack.c.l.s8.bf16 %v668_v59  ;;  %v1508_v60 = vunpack.c.h.s8.bf16 %v668_v59 }
 0x1a3   : >> { %v1502_v0 = vunpack.c.l.s8.bf16 %v670_v42  ;;  %v1510_v7 = vunpack.c.h.s8.bf16 %v670_v42 }
 0x1a5   : >> { %2188 = vmatpush1.bf16.msra.mxu0 %v1436_v1  ;;  %2516 = vmatpush1.bf16.msra.mxu1 %v1438_v2  ;;  %v1509_v1 = vunpack.c.h.s8.bf16 %v669_v50  ;;  %v1511_v2 = vunpack.c.h.s8.bf16 %v671_v53 }
 0x1a6   : >> { %2189 = vmatprep.subr.bf16.mxu0 %v1445_v3  ;;  %2517 = vmatprep.subr.bf16.mxu1 %v1447_v5  ;;  %v677_v3 = vld [vmem:[%s4279_s27 + $0xa48] sm:$0xff]  ;;  %v679_v5 = vld [vmem:[%s4279_s27 + $0xa58] sm:$0xff] }
 0x1a9   : >> { %2190 = vmatpush1.bf16.msra.mxu0 %v1444_v8  ;;  %2518 = vmatpush1.bf16.msra.mxu1 %v1446_v9  ;;  %v1517_v8 = vunpack.c.l.s8.bf16 %v677_v3  ;;  %v1519_v9 = vunpack.c.l.s8.bf16 %v679_v5 }
 0x1aa   : >> { %2191 = vmatprep.subr.bf16.mxu0 %v1453_v10  ;;  %2519 = vmatprep.subr.bf16.mxu1 %v1455_v12  ;;  %v676_v10 = vld [vmem:[%s4279_s27 + $0xa40] sm:$0xff]  ;;  %v678_v12 = vld [vmem:[%s4279_s27 + $0xa50] sm:$0xff] }
 0x1ab   : >> { %v1516_v13 = vunpack.c.l.s8.bf16 %v676_v10  ;;  %v1518_v14 = vunpack.c.l.s8.bf16 %v678_v12  ;;  %v1524_v20 = vunpack.c.h.s8.bf16 %v676_v10  ;;  %v1526_v21 = vunpack.c.h.s8.bf16 %v678_v12 }
 0x1ad   : >> { %2192 = vmatpush1.bf16.msra.mxu0 %v1452_v16  ;;  %2520 = vmatpush1.bf16.msra.mxu1 %v1454_v17  ;;  %v1525_v16 = vunpack.c.h.s8.bf16 %v677_v3  ;;  %v1527_v17 = vunpack.c.h.s8.bf16 %v679_v5 }
 0x1ae   : >> { %2193 = vmatprep.subr.bf16.mxu0 %v1461_v18  ;;  %2521 = vmatprep.subr.bf16.mxu1 %v1463_v19  ;;  %v685_v18 = vld [vmem:[%s4279_s27 + $0xa88] sm:$0xff]  ;;  %v687_v19 = vld [vmem:[%s4279_s27 + $0xa98] sm:$0xff] }
 0x1b1   : >> { %2194 = vmatpush1.bf16.msra.mxu0 %v1460_v24  ;;  %2522 = vmatpush1.bf16.msra.mxu1 %v1462_v23  ;;  %v1533_v24 = vunpack.c.l.s8.bf16 %v685_v18  ;;  %v1535_v23 = vunpack.c.l.s8.bf16 %v687_v19 }
 0x1b2   : >> { %2195 = vmatprep.subr.bf16.mxu0 %v1469_v25  ;;  %2523 = vmatprep.subr.bf16.mxu1 %v1471_v26  ;;  %v684_v25 = vld [vmem:[%s4279_s27 + $0xa80] sm:$0xff]  ;;  %v686_v26 = vld [vmem:[%s4279_s27 + $0xa90] sm:$0xff] }
 0x1b3   : >> { %v1532_v37 = vunpack.c.l.s8.bf16 %v684_v25  ;;  %v1534_v28 = vunpack.c.l.s8.bf16 %v686_v26  ;;  %v1540_v34 = vunpack.c.h.s8.bf16 %v684_v25  ;;  %v1542_v35 = vunpack.c.h.s8.bf16 %v686_v26 }
 0x1b5   : >> { %2196 = vmatpush1.bf16.msra.mxu0 %v1468_v29  ;;  %2524 = vmatpush1.bf16.msra.mxu1 %v1470_v30  ;;  %v1541_v29 = vunpack.c.h.s8.bf16 %v685_v18  ;;  %v1543_v30 = vunpack.c.h.s8.bf16 %v687_v19 }
 0x1b6   : >> { %2197 = vmatprep.subr.bf16.mxu0 %v1477_v31  ;;  %2525 = vmatprep.subr.bf16.mxu1 %v1479_v33  ;;  %v693_v31 = vld [vmem:[%s4279_s27 + $0xac8] sm:$0xff]  ;;  %v695_v33 = vld [vmem:[%s4279_s27 + $0xad8] sm:$0xff] }
 0x1b9   : >> { %2198 = vmatpush1.bf16.msra.mxu0 %v1476_v38  ;;  %2526 = vmatpush1.bf16.msra.mxu1 %v1478_v39  ;;  %v1549_v38 = vunpack.c.l.s8.bf16 %v693_v31  ;;  %v1551_v39 = vunpack.c.l.s8.bf16 %v695_v33 }
 0x1ba   : >> { %2199 = vmatprep.subr.bf16.mxu0 %v1485_v40  ;;  %2527 = vmatprep.subr.bf16.mxu1 %v1487_v43  ;;  %v692_v40 = vld [vmem:[%s4279_s27 + $0xac0] sm:$0xff]  ;;  %v694_v43 = vld [vmem:[%s4279_s27 + $0xad0] sm:$0xff] }
 0x1bb   : >> { %v1548_v44 = vunpack.c.l.s8.bf16 %v692_v40  ;;  %v1550_v45 = vunpack.c.l.s8.bf16 %v694_v43  ;;  %v1556_v50 = vunpack.c.h.s8.bf16 %v692_v40  ;;  %v1558_v53 = vunpack.c.h.s8.bf16 %v694_v43 }
 0x1bc   : >> { %v1942_v40 = vcombine.high %v4478_v51, %v4478_v51 }
 0x1bd   : >> { %2200 = vmatpush1.bf16.msra.mxu0 %v1484_v46  ;;  %2528 = vmatpush1.bf16.msra.mxu1 %v1486_v47  ;;  %v1557_v46 = vunpack.c.h.s8.bf16 %v693_v31  ;;  %v1559_v47 = vunpack.c.h.s8.bf16 %v695_v33 }
 0x1be   : >> { %2201 = vmatprep.subr.bf16.mxu0 %v1493_v48  ;;  %2529 = vmatprep.subr.bf16.mxu1 %v1495_v49  ;;  %v701_v48 = vld [vmem:[%s4279_s27 + $0xb08] sm:$0xff]  ;;  %v703_v49 = vld [vmem:[%s4279_s27 + $0xb18] sm:$0xff] }
 0x1c1   : >> { %2202 = vmatpush1.bf16.msra.mxu0 %v1492_v55  ;;  %2530 = vmatpush1.bf16.msra.mxu1 %v1494_v56  ;;  %v1565_v55 = vunpack.c.l.s8.bf16 %v701_v48  ;;  %v1567_v56 = vunpack.c.l.s8.bf16 %v703_v49 }
 0x1c2   : >> { %2212 = vmatprep.subr.bf16.mxu0 %v1501_v57  ;;  %2540 = vmatprep.subr.bf16.mxu1 %v1503_v58  ;;  %v700_v57 = vld [vmem:[%s4279_s27 + $0xb00] sm:$0xff]  ;;  %v702_v58 = vld [vmem:[%s4279_s27 + $0xb10] sm:$0xff] }
 0x1c3   : >> { %v1564_v59 = vunpack.c.l.s8.bf16 %v700_v57  ;;  %v1566_v42 = vunpack.c.l.s8.bf16 %v702_v58  ;;  %v1572_v3 = vunpack.c.h.s8.bf16 %v700_v57  ;;  %v1574_v5 = vunpack.c.h.s8.bf16 %v702_v58  ;;  %v734_v57 = vld [vmem:[%s4279_s27 + $0xc10] sm:$0xff] }
 0x1c4   : >> { %2204 = vmatmul.mubr.bf16.vlgmr.msra.gmra.mrb[0].mxu0 %v4535_v62  ;;  %2532 = vmatmul.mubr.bf16.vlgmr.msra.gmra.mrb[0].mxu1 %v4535_v62 }
 0x1c5   : >> { %2213 = vmatpush1.bf16.msra.mxu0 %v1500_v63  ;;  %2541 = vmatpush1.bf16.msra.mxu1 %v1502_v0  ;;  %v1573_v63 = vunpack.c.h.s8.bf16 %v701_v48  ;;  %v1575_v0 = vunpack.c.h.s8.bf16 %v703_v49  ;;  %v735_v48 = vld [vmem:[%s4279_s27 + $0xc18] sm:$0xff]  ;;  %v4578_v49 = vrot.slane %v1942_v40, %v4303_v36  ;;  %v756_v40 = vld [vmem:[%s4279_s27 + $0xcc0] sm:$0xff] }
 0x1c6   : >> { %2214 = vmatprep.subr.bf16.mxu0 %v1509_v1  ;;  %2542 = vmatprep.subr.bf16.mxu1 %v1511_v2  ;;  %v709_v1 = vld [vmem:[%s4279_s27 + $0xb48] sm:$0xff]  ;;  %v711_v2 = vld [vmem:[%s4279_s27 + $0xb58] sm:$0xff] }
 0x1c7   : >> { %2244 = vmatprep.mubr.bf16.mxu0 %v4541_v6  ;;  %2572 = vmatprep.mubr.bf16.mxu1 %v4541_v6  ;;  %v1958_v58 = vcombine.high %v4578_v49, %v4578_v49 }
 0x1c9   : >> { %2215 = vmatpush1.bf16.msra.mxu0 %v1508_v60  ;;  %2543 = vmatpush1.bf16.msra.mxu1 %v1510_v7  ;;  %v1581_v60 = vunpack.c.l.s8.bf16 %v709_v1  ;;  %v1583_v7 = vunpack.c.l.s8.bf16 %v711_v2 }
 0x1ca   : >> { %2216 = vmatprep.subr.bf16.mxu0 %v1517_v8  ;;  %2544 = vmatprep.subr.bf16.mxu1 %v1519_v9  ;;  %v708_v8 = vld [vmem:[%s4279_s27 + $0xb40] sm:$0xff]  ;;  %v710_v9 = vld [vmem:[%s4279_s27 + $0xb50] sm:$0xff] }
 0x1cb   : >> { %v1580_v10 = vunpack.c.l.s8.bf16 %v708_v8  ;;  %v1582_v12 = vunpack.c.l.s8.bf16 %v710_v9  ;;  %v1588_v18 = vunpack.c.h.s8.bf16 %v708_v8  ;;  %v1590_v19 = vunpack.c.h.s8.bf16 %v710_v9 }
 0x1cd   : >> { %2217 = vmatpush1.bf16.msra.mxu0 %v1516_v13  ;;  %2545 = vmatpush1.bf16.msra.mxu1 %v1518_v14  ;;  %v1589_v13 = vunpack.c.h.s8.bf16 %v709_v1  ;;  %v1591_v14 = vunpack.c.h.s8.bf16 %v711_v2  ;;  %v1639_v1 = vunpack.c.h.s8.bf16 %v735_v48  ;;  %v741_v2 = vld [vmem:[%s4279_s27 + $0xc48] sm:$0xff] }
 0x1ce   : >> { %2218 = vmatprep.subr.bf16.mxu0 %v1525_v16  ;;  %2546 = vmatprep.subr.bf16.mxu1 %v1527_v17  ;;  %v717_v16 = vld [vmem:[%s4279_s27 + $0xb88] sm:$0xff]  ;;  %v719_v17 = vld [vmem:[%s4279_s27 + $0xb98] sm:$0xff]  ;;  %v1645_v8 = vunpack.c.l.s8.bf16 %v741_v2 }
 0x1d1   : >> { %2219 = vmatpush1.bf16.msra.mxu0 %v1524_v20  ;;  %2547 = vmatpush1.bf16.msra.mxu1 %v1526_v21  ;;  %v1597_v20 = vunpack.c.l.s8.bf16 %v717_v16  ;;  %v1599_v21 = vunpack.c.l.s8.bf16 %v719_v17 }
 0x1d2   : >> { %2220 = vmatprep.subr.bf16.mxu0 %v1533_v24  ;;  %2548 = vmatprep.subr.bf16.mxu1 %v1535_v23  ;;  %v716_v24 = vld [vmem:[%s4279_s27 + $0xb80] sm:$0xff]  ;;  %v718_v23 = vld [vmem:[%s4279_s27 + $0xb90] sm:$0xff] }
 0x1d3   : >> { %v1596_v25 = vunpack.c.l.s8.bf16 %v716_v24  ;;  %v1598_v26 = vunpack.c.l.s8.bf16 %v718_v23  ;;  %v1604_v31 = vunpack.c.h.s8.bf16 %v716_v24  ;;  %v1606_v33 = vunpack.c.h.s8.bf16 %v718_v23 }
 0x1d5   : >> { %2221 = vmatpush1.bf16.msra.mxu0 %v1532_v37  ;;  %2549 = vmatpush1.bf16.msra.mxu1 %v1534_v28  ;;  %v1605_v37 = vunpack.c.h.s8.bf16 %v717_v16  ;;  %v1607_v28 = vunpack.c.h.s8.bf16 %v719_v17  ;;  %v1653_v16 = vunpack.c.h.s8.bf16 %v741_v2  ;;  %v773_v2 = vld [vmem:[%s4279_s27 + $0xd48] sm:$0xff] }
 0x1d6   : >> { %2222 = vmatprep.subr.bf16.mxu0 %v1541_v29  ;;  %2550 = vmatprep.subr.bf16.mxu1 %v1543_v30  ;;  %v725_v29 = vld [vmem:[%s4279_s27 + $0xbc8] sm:$0xff]  ;;  %v727_v30 = vld [vmem:[%s4279_s27 + $0xbd8] sm:$0xff] }
 0x1d9   : >> { %2223 = vmatpush1.bf16.msra.mxu0 %v1540_v34  ;;  %2551 = vmatpush1.bf16.msra.mxu1 %v1542_v35  ;;  %v1613_v34 = vunpack.c.l.s8.bf16 %v725_v29  ;;  %v1615_v35 = vunpack.c.l.s8.bf16 %v727_v30 }
 0x1da   : >> { %2224 = vmatprep.subr.bf16.mxu0 %v1549_v38  ;;  %2552 = vmatprep.subr.bf16.mxu1 %v1551_v39  ;;  %v724_v38 = vld [vmem:[%s4279_s27 + $0xbc0] sm:$0xff]  ;;  %v726_v39 = vld [vmem:[%s4279_s27 + $0xbd0] sm:$0xff] }
 0x1db   : >> { %v1612_v43 = vunpack.c.l.s8.bf16 %v724_v38 }
 0x1dd   : >> { %2225 = vmatpush1.bf16.msra.mxu0 %v1548_v44  ;;  %2553 = vmatpush1.bf16.msra.mxu1 %v1550_v45  ;;  %v1614_v44 = vunpack.c.l.s8.bf16 %v726_v39  ;;  %v1621_v45 = vunpack.c.h.s8.bf16 %v725_v29 }
 0x1de   : >> { %2226 = vmatprep.subr.bf16.mxu0 %v1557_v46  ;;  %2554 = vmatprep.subr.bf16.mxu1 %v1559_v47  ;;  %v1623_v46 = vunpack.c.h.s8.bf16 %v727_v30  ;;  %v733_v47 = vld [vmem:[%s4279_s27 + $0xc08] sm:$0xff] }
 0x1df   : >> { %v1629_v51 = vunpack.c.l.s8.bf16 %v733_v47 }
 0x1e1   : >> { %2227 = vmatpush1.bf16.msra.mxu0 %v1556_v50  ;;  %2555 = vmatpush1.bf16.msra.mxu1 %v1558_v53  ;;  %v1620_v50 = vunpack.c.h.s8.bf16 %v724_v38  ;;  %v1622_v53 = vunpack.c.h.s8.bf16 %v726_v39 }
 0x1e2   : >> { %2228 = vmatprep.subr.bf16.mxu0 %v1565_v55  ;;  %2556 = vmatprep.subr.bf16.mxu1 %v1567_v56  ;;  %v1631_v55 = vunpack.c.l.s8.bf16 %v735_v48  ;;  %v732_v56 = vld [vmem:[%s4279_s27 + $0xc00] sm:$0xff]  ;;  %v765_v48 = vld [vmem:[%s4279_s27 + $0xd08] sm:$0xff] }
 0x1e5   : >> { %2229 = vmatpush1.bf16.msra.mxu0 %v1564_v59  ;;  %2557 = vmatpush1.bf16.msra.mxu1 %v1566_v42  ;;  %v4586_v59 = vcombine.high %v4535_v62, %v4535_v62  ;;  %v1628_v42 = vunpack.c.l.s8.bf16 %v732_v56 }
 0x1e6   : >> { %2230 = vmatprep.subr.bf16.mxu0 %v1573_v63  ;;  %2558 = vmatprep.subr.bf16.mxu1 %v1575_v0  ;;  %v1630_v63 = vunpack.c.l.s8.bf16 %v734_v57  ;;  %v1637_v0 = vunpack.c.h.s8.bf16 %v733_v47 }
 0x1e9   : >> { %2231 = vmatpush1.bf16.msra.mxu0 %v1572_v3  ;;  %2559 = vmatpush1.bf16.msra.mxu1 %v1574_v5  ;;  %v743_v3 = vld [vmem:[%s4279_s27 + $0xc58] sm:$0xff]  ;;  %v4591_v5 = vrot.slane %v1958_v58, %v4303_v36  ;;  %v766_v58 = vld [vmem:[%s4279_s27 + $0xd10] sm:$0xff] }
 0x1ea   : >> { %2232 = vmatprep.subr.bf16.mxu0 %v1581_v60  ;;  %2560 = vmatprep.subr.bf16.mxu1 %v1583_v7  ;;  %v1636_v60 = vunpack.c.h.s8.bf16 %v732_v56  ;;  %v1638_v7 = vunpack.c.h.s8.bf16 %v734_v57  ;;  %v1647_v9 = vunpack.c.l.s8.bf16 %v743_v3  ;;  %v1655_v17 = vunpack.c.h.s8.bf16 %v743_v3  ;;  %v764_v57 = vld [vmem:[%s4279_s27 + $0xd00] sm:$0xff]  ;;  %v775_v3 = vld [vmem:[%s4279_s27 + $0xd58] sm:$0xff] }
 0x1ed   : >> { %2233 = vmatpush1.bf16.msra.mxu0 %v1580_v10  ;;  %2561 = vmatpush1.bf16.msra.mxu1 %v1582_v12  ;;  %v740_v10 = vld [vmem:[%s4279_s27 + $0xc40] sm:$0xff]  ;;  %v742_v12 = vld [vmem:[%s4279_s27 + $0xc50] sm:$0xff] }
 0x1ee   : >> { %2234 = vmatprep.subr.bf16.mxu0 %v1589_v13  ;;  %2562 = vmatprep.subr.bf16.mxu1 %v1591_v14  ;;  %v1644_v13 = vunpack.c.l.s8.bf16 %v740_v10  ;;  %v1646_v14 = vunpack.c.l.s8.bf16 %v742_v12 }
 0x1f1   : >> { %2235 = vmatpush1.bf16.msra.mxu0 %v1588_v18  ;;  %2563 = vmatpush1.bf16.msra.mxu1 %v1590_v19  ;;  %v749_v18 = vld [vmem:[%s4279_s27 + $0xc88] sm:$0xff]  ;;  %v751_v19 = vld [vmem:[%s4279_s27 + $0xc98] sm:$0xff] }
 0x1f2   : >> { %2236 = vmatprep.subr.bf16.mxu0 %v1597_v20  ;;  %2564 = vmatprep.subr.bf16.mxu1 %v1599_v21  ;;  %v1652_v20 = vunpack.c.h.s8.bf16 %v740_v10  ;;  %v1654_v21 = vunpack.c.h.s8.bf16 %v742_v12  ;;  %v1661_v24 = vunpack.c.l.s8.bf16 %v749_v18  ;;  %v1663_v23 = vunpack.c.l.s8.bf16 %v751_v19  ;;  %v772_v10 = vld [vmem:[%s4279_s27 + $0xd40] sm:$0xff]  ;;  %v774_v12 = vld [vmem:[%s4279_s27 + $0xd50] sm:$0xff] }
 0x1f3   : >> { %v1669_v29 = vunpack.c.h.s8.bf16 %v749_v18  ;;  %v1671_v30 = vunpack.c.h.s8.bf16 %v751_v19  ;;  %v781_v18 = vld [vmem:[%s4279_s27 + $0xd88] sm:$0xff]  ;;  %v783_v19 = vld [vmem:[%s4279_s27 + $0xd98] sm:$0xff] }
 0x1f5   : >> { %2237 = vmatpush1.bf16.msra.mxu0 %v1596_v25  ;;  %2565 = vmatpush1.bf16.msra.mxu1 %v1598_v26  ;;  %v748_v25 = vld [vmem:[%s4279_s27 + $0xc80] sm:$0xff]  ;;  %v750_v26 = vld [vmem:[%s4279_s27 + $0xc90] sm:$0xff] }
 0x1f6   : >> { %2238 = vmatprep.subr.bf16.mxu0 %v1605_v37  ;;  %2566 = vmatprep.subr.bf16.mxu1 %v1607_v28  ;;  %v1660_v37 = vunpack.c.l.s8.bf16 %v748_v25  ;;  %v1662_v28 = vunpack.c.l.s8.bf16 %v750_v26 }
 0x1f9   : >> { %2239 = vmatpush1.bf16.msra.mxu0 %v1604_v31  ;;  %2567 = vmatpush1.bf16.msra.mxu1 %v1606_v33  ;;  %v757_v31 = vld [vmem:[%s4279_s27 + $0xcc8] sm:$0xff]  ;;  %v759_v33 = vld [vmem:[%s4279_s27 + $0xcd8] sm:$0xff] }
 0x1fa   : >> { %2240 = vmatprep.subr.bf16.mxu0 %v1613_v34  ;;  %2568 = vmatprep.subr.bf16.mxu1 %v1615_v35  ;;  %v1668_v34 = vunpack.c.h.s8.bf16 %v748_v25  ;;  %v1670_v35 = vunpack.c.h.s8.bf16 %v750_v26  ;;  %v1677_v38 = vunpack.c.l.s8.bf16 %v757_v31  ;;  %v1679_v39 = vunpack.c.l.s8.bf16 %v759_v33  ;;  %v780_v25 = vld [vmem:[%s4279_s27 + $0xd80] sm:$0xff]  ;;  %v782_v26 = vld [vmem:[%s4279_s27 + $0xd90] sm:$0xff] }
 0x1fb   : >> { %v1687_v47 = vunpack.c.h.s8.bf16 %v759_v33  ;;  %v791_v33 = vld [vmem:[%s4279_s27 + $0xdd8] sm:$0xff] }
 0x1fd   : >> { %2241 = vmatpush1.bf16.msra.mxu0 %v1612_v43  ;;  %2569 = vmatpush1.bf16.msra.mxu1 %v1614_v44  ;;  %v758_v43 = vld [vmem:[%s4279_s27 + $0xcd0] sm:$0xff]  ;;  %v1676_v44 = vunpack.c.l.s8.bf16 %v756_v40 }
 0x1fe   : >> { %2242 = vmatprep.subr.bf16.mxu0 %v1621_v45  ;;  %2570 = vmatprep.subr.bf16.mxu1 %v1623_v46  ;;  %v1678_v45 = vunpack.c.l.s8.bf16 %v758_v43  ;;  %v1685_v46 = vunpack.c.h.s8.bf16 %v757_v31  ;;  %v789_v31 = vld [vmem:[%s4279_s27 + $0xdc8] sm:$0xff] }
 0x201   : >> { %2243 = vmatpush1.bf16.msra.mxu0 %v1620_v50  ;;  %2571 = vmatpush1.bf16.msra.mxu1 %v1622_v53  ;;  %v767_v50 = vld [vmem:[%s4279_s27 + $0xd18] sm:$0xff]  ;;  %v1684_v53 = vunpack.c.h.s8.bf16 %v756_v40  ;;  %v788_v40 = vld [vmem:[%s4279_s27 + $0xdc0] sm:$0xff] }
 0x202   : >> { %2253 = vmatprep.subr.bf16.mxu0 %v1629_v51  ;;  %2581 = vmatprep.subr.bf16.mxu1 %v1631_v55  ;;  %v1686_v51 = vunpack.c.h.s8.bf16 %v758_v43  ;;  %v1693_v55 = vunpack.c.l.s8.bf16 %v765_v48  ;;  %v1695_v56 = vunpack.c.l.s8.bf16 %v767_v50  ;;  %v790_v43 = vld [vmem:[%s4279_s27 + $0xdd0] sm:$0xff] }
 0x204   : >> { %2245 = vmatmul.mubr.bf16.vlgmr.msra.gmra.mrb[0].mxu0 %v4586_v59  ;;  %2573 = vmatmul.mubr.bf16.vlgmr.msra.gmra.mrb[0].mxu1 %v4586_v59 }
 0x205   : >> { %2254 = vmatpush1.bf16.msra.mxu0 %v1628_v42  ;;  %2582 = vmatpush1.bf16.msra.mxu1 %v1630_v63  ;;  %v1692_v42 = vunpack.c.l.s8.bf16 %v764_v57  ;;  %v1694_v63 = vunpack.c.l.s8.bf16 %v766_v58 }
 0x206   : >> { %2255 = vmatprep.subr.bf16.mxu0 %v1637_v0  ;;  %2583 = vmatprep.subr.bf16.mxu1 %v1639_v1  ;;  %v1701_v0 = vunpack.c.h.s8.bf16 %v765_v48  ;;  %v1703_v1 = vunpack.c.h.s8.bf16 %v767_v50  ;;  %v797_v48 = vld [vmem:[%s4279_s27 + $0xe08] sm:$0xff]  ;;  %v799_v50 = vld [vmem:[%s4279_s27 + $0xe18] sm:$0xff] }
 0x207   : >> { %2285 = vmatprep.mubr.bf16.mxu0 %v4591_v5  ;;  %2613 = vmatprep.mubr.bf16.mxu1 %v4591_v5 }
 0x209   : >> { %2256 = vmatpush1.bf16.msra.mxu0 %v1636_v60  ;;  %2584 = vmatpush1.bf16.msra.mxu1 %v1638_v7  ;;  %v1700_v60 = vunpack.c.h.s8.bf16 %v764_v57  ;;  %v1702_v7 = vunpack.c.h.s8.bf16 %v766_v58  ;;  %v796_v57 = vld [vmem:[%s4279_s27 + $0xe00] sm:$0xff]  ;;  %v798_v58 = vld [vmem:[%s4279_s27 + $0xe10] sm:$0xff] }
 0x20a   : >> { %2257 = vmatprep.subr.bf16.mxu0 %v1645_v8  ;;  %2585 = vmatprep.subr.bf16.mxu1 %v1647_v9  ;;  %v1709_v8 = vunpack.c.l.s8.bf16 %v773_v2  ;;  %v1711_v9 = vunpack.c.l.s8.bf16 %v775_v3 }
 0x20d   : >> { %2258 = vmatpush1.bf16.msra.mxu0 %v1644_v13  ;;  %2586 = vmatpush1.bf16.msra.mxu1 %v1646_v14  ;;  %v1708_v13 = vunpack.c.l.s8.bf16 %v772_v10  ;;  %v1710_v14 = vunpack.c.l.s8.bf16 %v774_v12 }
 0x20e   : >> { %2259 = vmatprep.subr.bf16.mxu0 %v1653_v16  ;;  %2587 = vmatprep.subr.bf16.mxu1 %v1655_v17  ;;  %v1717_v16 = vunpack.c.h.s8.bf16 %v773_v2  ;;  %v1719_v17 = vunpack.c.h.s8.bf16 %v775_v3  ;;  %v1767_v2 = vunpack.c.h.s8.bf16 %v799_v50  ;;  %v805_v3 = vld [vmem:[%s4279_s27 + $0xe48] sm:$0xff] }
 0x211   : >> { %2260 = vmatpush1.bf16.msra.mxu0 %v1652_v20  ;;  %2588 = vmatpush1.bf16.msra.mxu1 %v1654_v21  ;;  %v1716_v20 = vunpack.c.h.s8.bf16 %v772_v10  ;;  %v1718_v21 = vunpack.c.h.s8.bf16 %v774_v12  ;;  %v804_v10 = vld [vmem:[%s4279_s27 + $0xe40] sm:$0xff]  ;;  %v806_v12 = vld [vmem:[%s4279_s27 + $0xe50] sm:$0xff] }
 0x212   : >> { %2261 = vmatprep.subr.bf16.mxu0 %v1661_v24  ;;  %2589 = vmatprep.subr.bf16.mxu1 %v1663_v23  ;;  %v1725_v24 = vunpack.c.l.s8.bf16 %v781_v18  ;;  %v1727_v23 = vunpack.c.l.s8.bf16 %v783_v19 }
 0x215   : >> { %2262 = vmatpush1.bf16.msra.mxu0 %v1660_v37  ;;  %2590 = vmatpush1.bf16.msra.mxu1 %v1662_v28  ;;  %v1724_v37 = vunpack.c.l.s8.bf16 %v780_v25  ;;  %v1726_v28 = vunpack.c.l.s8.bf16 %v782_v26 }
 0x216   : >> { %2263 = vmatprep.subr.bf16.mxu0 %v1669_v29  ;;  %2591 = vmatprep.subr.bf16.mxu1 %v1671_v30  ;;  %v1733_v29 = vunpack.c.h.s8.bf16 %v781_v18  ;;  %v1735_v30 = vunpack.c.h.s8.bf16 %v783_v19  ;;  %v813_v18 = vld [vmem:[%s4279_s27 + $0xe88] sm:$0xff]  ;;  %v815_v19 = vld [vmem:[%s4279_s27 + $0xe98] sm:$0xff] }
 0x219   : >> { %2264 = vmatpush1.bf16.msra.mxu0 %v1668_v34  ;;  %2592 = vmatpush1.bf16.msra.mxu1 %v1670_v35  ;;  %v1732_v34 = vunpack.c.h.s8.bf16 %v780_v25  ;;  %v1734_v35 = vunpack.c.h.s8.bf16 %v782_v26  ;;  %v812_v25 = vld [vmem:[%s4279_s27 + $0xe80] sm:$0xff]  ;;  %v814_v26 = vld [vmem:[%s4279_s27 + $0xe90] sm:$0xff] }
 0x21a   : >> { %2265 = vmatprep.subr.bf16.mxu0 %v1677_v38  ;;  %2593 = vmatprep.subr.bf16.mxu1 %v1679_v39  ;;  %v1741_v38 = vunpack.c.l.s8.bf16 %v789_v31  ;;  %v1743_v39 = vunpack.c.l.s8.bf16 %v791_v33 }
 0x21d   : >> { %2266 = vmatpush1.bf16.msra.mxu0 %v1676_v44  ;;  %2594 = vmatpush1.bf16.msra.mxu1 %v1678_v45  ;;  %v1740_v44 = vunpack.c.l.s8.bf16 %v788_v40  ;;  %v1742_v45 = vunpack.c.l.s8.bf16 %v790_v43 }
 0x21e   : >> { %2267 = vmatprep.subr.bf16.mxu0 %v1685_v46  ;;  %2595 = vmatprep.subr.bf16.mxu1 %v1687_v47  ;;  %v1749_v46 = vunpack.c.h.s8.bf16 %v789_v31  ;;  %v1751_v47 = vunpack.c.h.s8.bf16 %v791_v33  ;;  %v821_v31 = vld [vmem:[%s4279_s27 + $0xec8] sm:$0xff]  ;;  %v823_v33 = vld [vmem:[%s4279_s27 + $0xed8] sm:$0xff] }
 0x221   : >> { %2268 = vmatpush1.bf16.msra.mxu0 %v1684_v53  ;;  %2596 = vmatpush1.bf16.msra.mxu1 %v1686_v51  ;;  %v1748_v53 = vunpack.c.h.s8.bf16 %v788_v40  ;;  %v1750_v51 = vunpack.c.h.s8.bf16 %v790_v43  ;;  %v820_v40 = vld [vmem:[%s4279_s27 + $0xec0] sm:$0xff]  ;;  %v822_v43 = vld [vmem:[%s4279_s27 + $0xed0] sm:$0xff] }
 0x222   : >> { %2269 = vmatprep.subr.bf16.mxu0 %v1693_v55  ;;  %2597 = vmatprep.subr.bf16.mxu1 %v1695_v56  ;;  %v1757_v55 = vunpack.c.l.s8.bf16 %v797_v48  ;;  %v1759_v56 = vunpack.c.l.s8.bf16 %v799_v50  ;;  %v831_v50 = vld [vmem:[%s4279_s27 + $0xf18] sm:$0xff] }
 0x225   : >> { %2270 = vmatpush1.bf16.msra.mxu0 %v1692_v42  ;;  %2598 = vmatpush1.bf16.msra.mxu1 %v1694_v63  ;;  %v4629_v42 = vrot.slane %v4578_v49, %v4303_v36  ;;  %v1756_v63 = vunpack.c.l.s8.bf16 %v796_v57  ;;  %v1764_v36 = vunpack.c.h.s8.bf16 %v796_v57  ;;  %v1766_v49 = vunpack.c.h.s8.bf16 %v798_v58  ;;  %v828_v57 = vld [vmem:[%s4279_s27 + $0xf00] sm:$0xff] }
 0x226   : >> { %2271 = vmatprep.subr.bf16.mxu0 %v1701_v0  ;;  %2599 = vmatprep.subr.bf16.mxu1 %v1703_v1  ;;  %v1758_v0 = vunpack.c.l.s8.bf16 %v798_v58  ;;  %v1765_v1 = vunpack.c.h.s8.bf16 %v797_v48  ;;  %v829_v48 = vld [vmem:[%s4279_s27 + $0xf08] sm:$0xff]  ;;  %v830_v58 = vld [vmem:[%s4279_s27 + $0xf10] sm:$0xff] }
 0x229   : >> { %2272 = vmatpush1.bf16.msra.mxu0 %v1700_v60  ;;  %2600 = vmatpush1.bf16.msra.mxu1 %v1702_v7  ;;  %v807_v60 = vld [vmem:[%s4279_s27 + $0xe58] sm:$0xff]  ;;  %v4635_v7 = vcombine.high %v4591_v5, %v4591_v5 }
 0x22a   : >> { %2273 = vmatprep.subr.bf16.mxu0 %v1709_v8  ;;  %2601 = vmatprep.subr.bf16.mxu1 %v1711_v9  ;;  %v1773_v8 = vunpack.c.l.s8.bf16 %v805_v3  ;;  %v1775_v9 = vunpack.c.l.s8.bf16 %v807_v60 }
 0x22d   : >> { %2274 = vmatpush1.bf16.msra.mxu0 %v1708_v13  ;;  %2602 = vmatpush1.bf16.msra.mxu1 %v1710_v14  ;;  %v1772_v13 = vunpack.c.l.s8.bf16 %v804_v10  ;;  %v1774_v14 = vunpack.c.l.s8.bf16 %v806_v12 }
 0x22e   : >> { %2275 = vmatprep.subr.bf16.mxu0 %v1717_v16  ;;  %2603 = vmatprep.subr.bf16.mxu1 %v1719_v17  ;;  %v1781_v16 = vunpack.c.h.s8.bf16 %v805_v3  ;;  %v1783_v17 = vunpack.c.h.s8.bf16 %v807_v60  ;;  %v837_v3 = vld [vmem:[%s4279_s27 + $0xf48] sm:$0xff]  ;;  %v839_v60 = vld [vmem:[%s4279_s27 + $0xf58] sm:$0xff] }
 0x231   : >> { %2276 = vmatpush1.bf16.msra.mxu0 %v1716_v20  ;;  %2604 = vmatpush1.bf16.msra.mxu1 %v1718_v21  ;;  %v1780_v20 = vunpack.c.h.s8.bf16 %v804_v10  ;;  %v1782_v21 = vunpack.c.h.s8.bf16 %v806_v12  ;;  %v836_v10 = vld [vmem:[%s4279_s27 + $0xf40] sm:$0xff]  ;;  %v838_v12 = vld [vmem:[%s4279_s27 + $0xf50] sm:$0xff] }
 0x232   : >> { %2277 = vmatprep.subr.bf16.mxu0 %v1725_v24  ;;  %2605 = vmatprep.subr.bf16.mxu1 %v1727_v23  ;;  %v1789_v24 = vunpack.c.l.s8.bf16 %v813_v18  ;;  %v1791_v23 = vunpack.c.l.s8.bf16 %v815_v19 }
 0x235   : >> { %2278 = vmatpush1.bf16.msra.mxu0 %v1724_v37  ;;  %2606 = vmatpush1.bf16.msra.mxu1 %v1726_v28  ;;  %v1788_v37 = vunpack.c.l.s8.bf16 %v812_v25  ;;  %v1790_v28 = vunpack.c.l.s8.bf16 %v814_v26 }
 0x236   : >> { %2279 = vmatprep.subr.bf16.mxu0 %v1733_v29  ;;  %2607 = vmatprep.subr.bf16.mxu1 %v1735_v30  ;;  %v1797_v29 = vunpack.c.h.s8.bf16 %v813_v18  ;;  %v1799_v30 = vunpack.c.h.s8.bf16 %v815_v19  ;;  %v845_v18 = vld [vmem:[%s4279_s27 + $0xf88] sm:$0xff]  ;;  %v847_v19 = vld [vmem:[%s4279_s27 + $0xf98] sm:$0xff] }
 0x239   : >> { %2280 = vmatpush1.bf16.msra.mxu0 %v1732_v34  ;;  %2608 = vmatpush1.bf16.msra.mxu1 %v1734_v35  ;;  %v1796_v34 = vunpack.c.h.s8.bf16 %v812_v25  ;;  %v1798_v35 = vunpack.c.h.s8.bf16 %v814_v26  ;;  %v844_v25 = vld [vmem:[%s4279_s27 + $0xf80] sm:$0xff]  ;;  %v846_v26 = vld [vmem:[%s4279_s27 + $0xf90] sm:$0xff] }
 0x23a   : >> { %2281 = vmatprep.subr.bf16.mxu0 %v1741_v38  ;;  %2609 = vmatprep.subr.bf16.mxu1 %v1743_v39  ;;  %v1805_v38 = vunpack.c.l.s8.bf16 %v821_v31  ;;  %v1807_v39 = vunpack.c.l.s8.bf16 %v823_v33 }
 0x23d   : >> { %2282 = vmatpush1.bf16.msra.mxu0 %v1740_v44  ;;  %2610 = vmatpush1.bf16.msra.mxu1 %v1742_v45  ;;  %v1804_v44 = vunpack.c.l.s8.bf16 %v820_v40  ;;  %v1806_v45 = vunpack.c.l.s8.bf16 %v822_v43 }
 0x23e   : >> { %2283 = vmatprep.subr.bf16.mxu0 %v1749_v46  ;;  %2611 = vmatprep.subr.bf16.mxu1 %v1751_v47  ;;  %v1813_v46 = vunpack.c.h.s8.bf16 %v821_v31  ;;  %v1815_v47 = vunpack.c.h.s8.bf16 %v823_v33  ;;  %v853_v31 = vld [vmem:[%s4279_s27 + $0xfc8] sm:$0xff]  ;;  %v855_v33 = vld [vmem:[%s4279_s27 + $0xfd8] sm:$0xff] }
 0x241   : >> { %2284 = vmatpush1.bf16.msra.mxu0 %v1748_v53  ;;  %2612 = vmatpush1.bf16.msra.mxu1 %v1750_v51  ;;  %v1812_v53 = vunpack.c.h.s8.bf16 %v820_v40  ;;  %v1814_v51 = vunpack.c.h.s8.bf16 %v822_v43  ;;  %v852_v40 = vld [vmem:[%s4279_s27 + $0xfc0] sm:$0xff]  ;;  %v854_v43 = vld [vmem:[%s4279_s27 + $0xfd0] sm:$0xff] }
 0x242   : >> { %2294 = vmatprep.subr.bf16.mxu0 %v1757_v55  ;;  %2622 = vmatprep.subr.bf16.mxu1 %v1759_v56  ;;  %v1821_v55 = vunpack.c.l.s8.bf16 %v829_v48  ;;  %v1823_v56 = vunpack.c.l.s8.bf16 %v831_v50 }
 0x244   : >> { %2286 = vmatmul.mubr.bf16.vlgmr.msra.gmra.mrb[0].mxu0 %v4629_v42  ;;  %2614 = vmatmul.mubr.bf16.vlgmr.msra.gmra.mrb[0].mxu1 %v4629_v42 }
 0x245   : >> { %2295 = vmatpush1.bf16.msra.mxu0 %v1756_v63  ;;  %2623 = vmatpush1.bf16.msra.mxu1 %v1758_v0  ;;  %v1820_v63 = vunpack.c.l.s8.bf16 %v828_v57  ;;  %v1822_v0 = vunpack.c.l.s8.bf16 %v830_v58 }
 0x246   : >> { %2296 = vmatprep.subr.bf16.mxu0 %v1765_v1  ;;  %2624 = vmatprep.subr.bf16.mxu1 %v1767_v2  ;;  %v1829_v1 = vunpack.c.h.s8.bf16 %v829_v48  ;;  %v1831_v2 = vunpack.c.h.s8.bf16 %v831_v50  ;;  %v353_v48 = vld [vmem:[%s4279_s27 + $0x28] sm:$0xff]  ;;  %v355_v50 = vld [vmem:[%s4279_s27 + $0x38] sm:$0xff] }
 0x247   : >> { %2326 = vmatprep.mubr.bf16.mxu0 %v4635_v7  ;;  %2654 = vmatprep.mubr.bf16.mxu1 %v4635_v7 }
 0x249   : >> { %2297 = vmatpush1.bf16.msra.mxu0 %v1764_v36  ;;  %2625 = vmatpush1.bf16.msra.mxu1 %v1766_v49  ;;  %v1828_v36 = vunpack.c.h.s8.bf16 %v828_v57  ;;  %v1830_v49 = vunpack.c.h.s8.bf16 %v830_v58  ;;  %v352_v57 = vld [vmem:[%s4279_s27 + $0x20] sm:$0xff]  ;;  %v354_v58 = vld [vmem:[%s4279_s27 + $0x30] sm:$0xff] }
 0x24a   : >> { %2298 = vmatprep.subr.bf16.mxu0 %v1773_v8  ;;  %2626 = vmatprep.subr.bf16.mxu1 %v1775_v9  ;;  %v1837_v8 = vunpack.c.l.s8.bf16 %v837_v3  ;;  %v1839_v9 = vunpack.c.l.s8.bf16 %v839_v60 }
 0x24d   : >> { %2299 = vmatpush1.bf16.msra.mxu0 %v1772_v13  ;;  %2627 = vmatpush1.bf16.msra.mxu1 %v1774_v14  ;;  %v1836_v13 = vunpack.c.l.s8.bf16 %v836_v10  ;;  %v1838_v14 = vunpack.c.l.s8.bf16 %v838_v12 }
 0x24e   : >> { %2300 = vmatprep.subr.bf16.mxu0 %v1781_v16  ;;  %2628 = vmatprep.subr.bf16.mxu1 %v1783_v17  ;;  %v1845_v16 = vunpack.c.h.s8.bf16 %v837_v3  ;;  %v1847_v17 = vunpack.c.h.s8.bf16 %v839_v60  ;;  %v875_v3 = vunpack.c.h.s8.bf16 %v355_v50  ;;  %v361_v60 = vld [vmem:[%s4279_s27 + $0x68] sm:$0xff] }
 0x251   : >> { %2301 = vmatpush1.bf16.msra.mxu0 %v1780_v20  ;;  %2629 = vmatpush1.bf16.msra.mxu1 %v1782_v21  ;;  %v1844_v20 = vunpack.c.h.s8.bf16 %v836_v10  ;;  %v1846_v21 = vunpack.c.h.s8.bf16 %v838_v12  ;;  %v360_v12 = vld [vmem:[%s4279_s27 + $0x60] sm:$0xff] }
 0x252   : >> { %2302 = vmatprep.subr.bf16.mxu0 %v1789_v24  ;;  %2630 = vmatprep.subr.bf16.mxu1 %v1791_v23  ;;  %v1853_v24 = vunpack.c.l.s8.bf16 %v845_v18  ;;  %v1855_v23 = vunpack.c.l.s8.bf16 %v847_v19 }
 0x255   : >> { %2303 = vmatpush1.bf16.msra.mxu0 %v1788_v37  ;;  %2631 = vmatpush1.bf16.msra.mxu1 %v1790_v28  ;;  %v1852_v37 = vunpack.c.l.s8.bf16 %v844_v25  ;;  %v1854_v28 = vunpack.c.l.s8.bf16 %v846_v26 }
 0x256   : >> { %2304 = vmatprep.subr.bf16.mxu0 %v1797_v29  ;;  %2632 = vmatprep.subr.bf16.mxu1 %v1799_v30  ;;  %v1861_v29 = vunpack.c.h.s8.bf16 %v845_v18  ;;  %v1863_v30 = vunpack.c.h.s8.bf16 %v847_v19  ;;  %v369_v19 = vld [vmem:[%s4279_s27 + $0xa8] sm:$0xff] }
 0x259   : >> { %2305 = vmatpush1.bf16.msra.mxu0 %v1796_v34  ;;  %2633 = vmatpush1.bf16.msra.mxu1 %v1798_v35  ;;  %v1860_v34 = vunpack.c.h.s8.bf16 %v844_v25  ;;  %v1862_v35 = vunpack.c.h.s8.bf16 %v846_v26  ;;  %v368_v25 = vld [vmem:[%s4279_s27 + $0xa0] sm:$0xff]  ;;  %v370_v26 = vld [vmem:[%s4279_s27 + $0xb0] sm:$0xff] }
 0x25a   : >> { %2306 = vmatprep.subr.bf16.mxu0 %v1805_v38  ;;  %2634 = vmatprep.subr.bf16.mxu1 %v1807_v39  ;;  %v1869_v38 = vunpack.c.l.s8.bf16 %v853_v31  ;;  %v1871_v39 = vunpack.c.l.s8.bf16 %v855_v33 }
 0x25d   : >> { %2307 = vmatpush1.bf16.msra.mxu0 %v1804_v44  ;;  %2635 = vmatpush1.bf16.msra.mxu1 %v1806_v45  ;;  %v1868_v44 = vunpack.c.l.s8.bf16 %v852_v40  ;;  %v1870_v45 = vunpack.c.l.s8.bf16 %v854_v43 }
 0x25e   : >> { %2308 = vmatprep.subr.bf16.mxu0 %v1813_v46  ;;  %2636 = vmatprep.subr.bf16.mxu1 %v1815_v47  ;;  %v1877_v46 = vunpack.c.h.s8.bf16 %v853_v31  ;;  %v1879_v47 = vunpack.c.h.s8.bf16 %v855_v33  ;;  %v377_v31 = vld [vmem:[%s4279_s27 + $0xe8] sm:$0xff]  ;;  %v379_v33 = vld [vmem:[%s4279_s27 + $0xf8] sm:$0xff] }
 0x261   : >> { %2309 = vmatpush1.bf16.msra.mxu0 %v1812_v53  ;;  %2637 = vmatpush1.bf16.msra.mxu1 %v1814_v51  ;;  %v1876_v53 = vunpack.c.h.s8.bf16 %v852_v40  ;;  %v1878_v51 = vunpack.c.h.s8.bf16 %v854_v43  ;;  %v376_v40 = vld [vmem:[%s4279_s27 + $0xe0] sm:$0xff]  ;;  %v378_v43 = vld [vmem:[%s4279_s27 + $0xf0] sm:$0xff] }
 0x262   : >> { %2310 = vmatprep.subr.bf16.mxu0 %v1821_v55  ;;  %2638 = vmatprep.subr.bf16.mxu1 %v1823_v56  ;;  %v865_v55 = vunpack.c.l.s8.bf16 %v353_v48  ;;  %v867_v56 = vunpack.c.l.s8.bf16 %v355_v50  ;;  %v387_v50 = vld [vmem:[%s4279_s27 + $0x138] sm:$0xff] }
 0x265   : >> { %2311 = vmatpush1.bf16.msra.mxu0 %v1820_v63  ;;  %2639 = vmatpush1.bf16.msra.mxu1 %v1822_v0  ;;  %v4673_v63 = vcombine.high %v4629_v42, %v4629_v42  ;;  %v864_v0 = vunpack.c.l.s8.bf16 %v352_v57 }
 0x266   : >> { %2312 = vmatprep.subr.bf16.mxu0 %v1829_v1  ;;  %2640 = vmatprep.subr.bf16.mxu1 %v1831_v2  ;;  %v866_v1 = vunpack.c.l.s8.bf16 %v354_v58  ;;  %v873_v2 = vunpack.c.h.s8.bf16 %v353_v48  ;;  %v385_v48 = vld [vmem:[%s4279_s27 + $0x128] sm:$0xff] }
 0x269   : >> { %2313 = vmatpush1.bf16.msra.mxu0 %v1828_v36  ;;  %2641 = vmatpush1.bf16.msra.mxu1 %v1830_v49  ;;  %v363_v36 = vld [vmem:[%s4279_s27 + $0x78] sm:$0xff]  ;;  %v872_v49 = vunpack.c.h.s8.bf16 %v352_v57  ;;  %v384_v57 = vld [vmem:[%s4279_s27 + $0x120] sm:$0xff] }
 0x26a   : >> { %2314 = vmatprep.subr.bf16.mxu0 %v1837_v8  ;;  %2642 = vmatprep.subr.bf16.mxu1 %v1839_v9  ;;  %v874_v8 = vunpack.c.h.s8.bf16 %v354_v58  ;;  %v881_v9 = vunpack.c.l.s8.bf16 %v361_v60  ;;  %v883_v10 = vunpack.c.l.s8.bf16 %v363_v36  ;;  %v891_v18 = vunpack.c.h.s8.bf16 %v363_v36  ;;  %v386_v58 = vld [vmem:[%s4279_s27 + $0x130] sm:$0xff]  ;;  %v395_v36 = vld [vmem:[%s4279_s27 + $0x178] sm:$0xff] }
 0x26d   : >> { %2315 = vmatpush1.bf16.msra.mxu0 %v1836_v13  ;;  %2643 = vmatpush1.bf16.msra.mxu1 %v1838_v14  ;;  %v362_v13 = vld [vmem:[%s4279_s27 + $0x70] sm:$0xff]  ;;  %v880_v14 = vunpack.c.l.s8.bf16 %v360_v12 }
 0x26e   : >> { %2316 = vmatprep.subr.bf16.mxu0 %v1845_v16  ;;  %2644 = vmatprep.subr.bf16.mxu1 %v1847_v17  ;;  %v882_v16 = vunpack.c.l.s8.bf16 %v362_v13  ;;  %v889_v17 = vunpack.c.h.s8.bf16 %v361_v60  ;;  %v393_v60 = vld [vmem:[%s4279_s27 + $0x168] sm:$0xff] }
 0x271   : >> { %2317 = vmatpush1.bf16.msra.mxu0 %v1844_v20  ;;  %2645 = vmatpush1.bf16.msra.mxu1 %v1846_v21  ;;  %v371_v20 = vld [vmem:[%s4279_s27 + $0xb8] sm:$0xff]  ;;  %v888_v21 = vunpack.c.h.s8.bf16 %v360_v12  ;;  %v392_v12 = vld [vmem:[%s4279_s27 + $0x160] sm:$0xff] }
 0x272   : >> { %2318 = vmatprep.subr.bf16.mxu0 %v1853_v24  ;;  %2646 = vmatprep.subr.bf16.mxu1 %v1855_v23  ;;  %v890_v24 = vunpack.c.h.s8.bf16 %v362_v13  ;;  %v899_v23 = vunpack.c.l.s8.bf16 %v371_v20  ;;  %v394_v13 = vld [vmem:[%s4279_s27 + $0x170] sm:$0xff] }
 0x275   : >> { %2319 = vmatpush1.bf16.msra.mxu0 %v1852_v37  ;;  %2647 = vmatpush1.bf16.msra.mxu1 %v1854_v28  ;;  %v896_v37 = vunpack.c.l.s8.bf16 %v368_v25  ;;  %v898_v28 = vunpack.c.l.s8.bf16 %v370_v26 }
 0x276   : >> { %2320 = vmatprep.subr.bf16.mxu0 %v1861_v29  ;;  %2648 = vmatprep.subr.bf16.mxu1 %v1863_v30  ;;  %v905_v29 = vunpack.c.h.s8.bf16 %v369_v19  ;;  %v907_v30 = vunpack.c.h.s8.bf16 %v371_v20  ;;  %v403_v20 = vld [vmem:[%s4279_s27 + $0x1b8] sm:$0xff] }
 0x279   : >> { %2321 = vmatpush1.bf16.msra.mxu0 %v1860_v34  ;;  %2649 = vmatpush1.bf16.msra.mxu1 %v1862_v35  ;;  %v904_v34 = vunpack.c.h.s8.bf16 %v368_v25  ;;  %v906_v35 = vunpack.c.h.s8.bf16 %v370_v26  ;;  %v400_v25 = vld [vmem:[%s4279_s27 + $0x1a0] sm:$0xff]  ;;  %v402_v26 = vld [vmem:[%s4279_s27 + $0x1b0] sm:$0xff] }
 0x27a   : >> { %2322 = vmatprep.subr.bf16.mxu0 %v1869_v38  ;;  %2650 = vmatprep.subr.bf16.mxu1 %v1871_v39  ;;  %v913_v38 = vunpack.c.l.s8.bf16 %v377_v31  ;;  %v915_v39 = vunpack.c.l.s8.bf16 %v379_v33 }
 0x27d   : >> { %2323 = vmatpush1.bf16.msra.mxu0 %v1868_v44  ;;  %2651 = vmatpush1.bf16.msra.mxu1 %v1870_v45  ;;  %v912_v44 = vunpack.c.l.s8.bf16 %v376_v40  ;;  %v914_v45 = vunpack.c.l.s8.bf16 %v378_v43 }
 0x27e   : >> { %2324 = vmatprep.subr.bf16.mxu0 %v1877_v46  ;;  %2652 = vmatprep.subr.bf16.mxu1 %v1879_v47  ;;  %v921_v46 = vunpack.c.h.s8.bf16 %v377_v31  ;;  %v923_v47 = vunpack.c.h.s8.bf16 %v379_v33  ;;  %v409_v31 = vld [vmem:[%s4279_s27 + $0x1e8] sm:$0xff]  ;;  %v411_v33 = vld [vmem:[%s4279_s27 + $0x1f8] sm:$0xff] }
 0x281   : >> { %2325 = vmatpush1.bf16.msra.mxu0 %v1876_v53  ;;  %2653 = vmatpush1.bf16.msra.mxu1 %v1878_v51  ;;  %v920_v53 = vunpack.c.h.s8.bf16 %v376_v40  ;;  %v922_v51 = vunpack.c.h.s8.bf16 %v378_v43  ;;  %v408_v40 = vld [vmem:[%s4279_s27 + $0x1e0] sm:$0xff]  ;;  %v410_v43 = vld [vmem:[%s4279_s27 + $0x1f0] sm:$0xff] }
 0x282   : >> { %2663 = vmatprep.subr.bf16.mxu0 %v865_v55  ;;  %2991 = vmatprep.subr.bf16.mxu1 %v867_v56  ;;  %v929_v55 = vunpack.c.l.s8.bf16 %v385_v48  ;;  %v931_v56 = vunpack.c.l.s8.bf16 %v387_v50 }
 0x284   : >> { %2327 = vmatmul.mubr.bf16.vlgmr.msra.gmra.mrb[0].mxu0 %v4673_v63  ;;  %2655 = vmatmul.mubr.bf16.vlgmr.msra.gmra.mrb[0].mxu1 %v4673_v63 }
 0x285   : >> { %2664 = vmatpush1.bf16.msra.mxu0 %v864_v0  ;;  %2992 = vmatpush1.bf16.msra.mxu1 %v866_v1  ;;  %v928_v0 = vunpack.c.l.s8.bf16 %v384_v57  ;;  %v930_v1 = vunpack.c.l.s8.bf16 %v386_v58 }
 0x286   : >> { %2665 = vmatprep.subr.bf16.mxu0 %v873_v2  ;;  %2993 = vmatprep.subr.bf16.mxu1 %v875_v3  ;;  %v937_v2 = vunpack.c.h.s8.bf16 %v385_v48  ;;  %v939_v3 = vunpack.c.h.s8.bf16 %v387_v50  ;;  %v417_v48 = vld [vmem:[%s4279_s27 + $0x228] sm:$0xff]  ;;  %v419_v50 = vld [vmem:[%s4279_s27 + $0x238] sm:$0xff] }
 0x287   : >> { %2695 = vmatprep.mubr.bf16.mxu0 %v4319_v52  ;;  %3023 = vmatprep.mubr.bf16.mxu1 %v4319_v52  ;;  %v897_v52 = vunpack.c.l.s8.bf16 %v369_v19  ;;  %v401_v19 = vld [vmem:[%s4279_s27 + $0x1a8] sm:$0xff] }
 0x289   : >> { %2666 = vmatpush1.bf16.msra.mxu0 %v872_v49  ;;  %2994 = vmatpush1.bf16.msra.mxu1 %v874_v8  ;;  %v936_v49 = vunpack.c.h.s8.bf16 %v384_v57  ;;  %v938_v8 = vunpack.c.h.s8.bf16 %v386_v58  ;;  %v416_v57 = vld [vmem:[%s4279_s27 + $0x220] sm:$0xff]  ;;  %v418_v58 = vld [vmem:[%s4279_s27 + $0x230] sm:$0xff] }
 0x28a   : >> { %2667 = vmatprep.subr.bf16.mxu0 %v881_v9  ;;  %2995 = vmatprep.subr.bf16.mxu1 %v883_v10  ;;  %v945_v9 = vunpack.c.l.s8.bf16 %v393_v60  ;;  %v947_v10 = vunpack.c.l.s8.bf16 %v395_v36 }
 0x28d   : >> { %2668 = vmatpush1.bf16.msra.mxu0 %v880_v14  ;;  %2996 = vmatpush1.bf16.msra.mxu1 %v882_v16  ;;  %v944_v14 = vunpack.c.l.s8.bf16 %v392_v12  ;;  %v946_v16 = vunpack.c.l.s8.bf16 %v394_v13 }
 0x28e   : >> { %2669 = vmatprep.subr.bf16.mxu0 %v889_v17  ;;  %2997 = vmatprep.subr.bf16.mxu1 %v891_v18  ;;  %v953_v17 = vunpack.c.h.s8.bf16 %v393_v60  ;;  %v955_v18 = vunpack.c.h.s8.bf16 %v395_v36  ;;  %v425_v60 = vld [vmem:[%s4279_s27 + $0x268] sm:$0xff]  ;;  %v427_v36 = vld [vmem:[%s4279_s27 + $0x278] sm:$0xff] }
 0x291   : >> { %2670 = vmatpush1.bf16.msra.mxu0 %v888_v21  ;;  %2998 = vmatpush1.bf16.msra.mxu1 %v890_v24  ;;  %v952_v21 = vunpack.c.h.s8.bf16 %v392_v12  ;;  %v954_v24 = vunpack.c.h.s8.bf16 %v394_v13  ;;  %v424_v12 = vld [vmem:[%s4279_s27 + $0x260] sm:$0xff]  ;;  %v426_v13 = vld [vmem:[%s4279_s27 + $0x270] sm:$0xff] }
 0x292   : >> { %2671 = vmatprep.subr.bf16.mxu0 %v897_v52  ;;  %2999 = vmatprep.subr.bf16.mxu1 %v899_v23  ;;  %v961_v52 = vunpack.c.l.s8.bf16 %v401_v19  ;;  %v963_v23 = vunpack.c.l.s8.bf16 %v403_v20 }
 0x295   : >> { %2672 = vmatpush1.bf16.msra.mxu0 %v896_v37  ;;  %3000 = vmatpush1.bf16.msra.mxu1 %v898_v28  ;;  %v960_v37 = vunpack.c.l.s8.bf16 %v400_v25  ;;  %v962_v28 = vunpack.c.l.s8.bf16 %v402_v26 }
 0x296   : >> { %2673 = vmatprep.subr.bf16.mxu0 %v905_v29  ;;  %3001 = vmatprep.subr.bf16.mxu1 %v907_v30  ;;  %v969_v29 = vunpack.c.h.s8.bf16 %v401_v19  ;;  %v971_v30 = vunpack.c.h.s8.bf16 %v403_v20  ;;  %v435_v19 = vld [vmem:[%s4279_s27 + $0x2b8] sm:$0xff]  ;;  %v1016_v20 = vunpack.c.h.s8.bf16 %v424_v12 }
 0x299   : >> { %2674 = vmatpush1.bf16.msra.mxu0 %v904_v34  ;;  %3002 = vmatpush1.bf16.msra.mxu1 %v906_v35  ;;  %v968_v34 = vunpack.c.h.s8.bf16 %v400_v25  ;;  %v970_v35 = vunpack.c.h.s8.bf16 %v402_v26 }
 0x29a   : >> { %2675 = vmatprep.subr.bf16.mxu0 %v913_v38  ;;  %3003 = vmatprep.subr.bf16.mxu1 %v915_v39  ;;  %v977_v38 = vunpack.c.l.s8.bf16 %v409_v31  ;;  %v979_v39 = vunpack.c.l.s8.bf16 %v411_v33 }
 0x29d   : >> { %2676 = vmatpush1.bf16.msra.mxu0 %v912_v44  ;;  %3004 = vmatpush1.bf16.msra.mxu1 %v914_v45  ;;  %v976_v44 = vunpack.c.l.s8.bf16 %v408_v40  ;;  %v978_v45 = vunpack.c.l.s8.bf16 %v410_v43 }
 0x29e   : >> { %2677 = vmatprep.subr.bf16.mxu0 %v921_v46  ;;  %3005 = vmatprep.subr.bf16.mxu1 %v923_v47  ;;  %v985_v46 = vunpack.c.h.s8.bf16 %v409_v31  ;;  %v987_v47 = vunpack.c.h.s8.bf16 %v411_v33 }
 0x2a1   : >> { %2678 = vmatpush1.bf16.msra.mxu0 %v920_v53  ;;  %3006 = vmatpush1.bf16.msra.mxu1 %v922_v51  ;;  %v984_v53 = vunpack.c.h.s8.bf16 %v408_v40  ;;  %v986_v51 = vunpack.c.h.s8.bf16 %v410_v43 }
 0x2a2   : >> { %2679 = vmatprep.subr.bf16.mxu0 %v929_v55  ;;  %3007 = vmatprep.subr.bf16.mxu1 %v931_v56  ;;  %v993_v55 = vunpack.c.l.s8.bf16 %v417_v48  ;;  %v995_v56 = vunpack.c.l.s8.bf16 %v419_v50 }
 0x2a5   : >> { %2680 = vmatpush1.bf16.msra.mxu0 %v928_v0  ;;  %3008 = vmatpush1.bf16.msra.mxu1 %v930_v1  ;;  %v992_v0 = vunpack.c.l.s8.bf16 %v416_v57  ;;  %v994_v1 = vunpack.c.l.s8.bf16 %v418_v58 }
 0x2a6   : >> { %2681 = vmatprep.subr.bf16.mxu0 %v937_v2  ;;  %3009 = vmatprep.subr.bf16.mxu1 %v939_v3  ;;  %v1001_v2 = vunpack.c.h.s8.bf16 %v417_v48  ;;  %v1003_v3 = vunpack.c.h.s8.bf16 %v419_v50 }
 0x2a9   : >> { %2682 = vmatpush1.bf16.msra.mxu0 %v936_v49  ;;  %3010 = vmatpush1.bf16.msra.mxu1 %v938_v8  ;;  %v1000_v49 = vunpack.c.h.s8.bf16 %v416_v57  ;;  %v1002_v8 = vunpack.c.h.s8.bf16 %v418_v58 }
 0x2aa   : >> { %2683 = vmatprep.subr.bf16.mxu0 %v945_v9  ;;  %3011 = vmatprep.subr.bf16.mxu1 %v947_v10  ;;  %v1009_v9 = vunpack.c.l.s8.bf16 %v425_v60  ;;  %v1011_v10 = vunpack.c.l.s8.bf16 %v427_v36 }
 0x2ad   : >> { %2684 = vmatpush1.bf16.msra.mxu0 %v944_v14  ;;  %3012 = vmatpush1.bf16.msra.mxu1 %v946_v16  ;;  %v1008_v14 = vunpack.c.l.s8.bf16 %v424_v12  ;;  %v1017_v16 = vunpack.c.h.s8.bf16 %v425_v60 }
 0x2ae   : >> { %2685 = vmatprep.subr.bf16.mxu0 %v953_v17  ;;  %3013 = vmatprep.subr.bf16.mxu1 %v955_v18  ;;  %v1019_v17 = vunpack.c.h.s8.bf16 %v427_v36  ;;  %v433_v18 = vld [vmem:[%s4279_s27 + $0x2a8] sm:$0xff] }
 0x2b1   : >> { %2686 = vmatpush1.bf16.msra.mxu0 %v952_v21  ;;  %3014 = vmatpush1.bf16.msra.mxu1 %v954_v24  ;;  %v1018_v21 = vunpack.c.h.s8.bf16 %v426_v13  ;;  %v1027_v24 = vunpack.c.l.s8.bf16 %v435_v19 }
 0x2b2   : >> { %2687 = vmatprep.subr.bf16.mxu0 %v961_v52  ;;  %3015 = vmatprep.subr.bf16.mxu1 %v963_v23  ;;  %v432_v52 = vld [vmem:[%s4279_s27 + $0x2a0] sm:$0xff]  ;;  %v434_v23 = vld [vmem:[%s4279_s27 + $0x2b0] sm:$0xff] }
 0x2b3   : >> { %v1024_v25 = vunpack.c.l.s8.bf16 %v432_v52  ;;  %v1026_v26 = vunpack.c.l.s8.bf16 %v434_v23  ;;  %v1032_v31 = vunpack.c.h.s8.bf16 %v432_v52  ;;  %v1034_v33 = vunpack.c.h.s8.bf16 %v434_v23 }
 0x2b5   : >> { %2688 = vmatpush1.bf16.msra.mxu0 %v960_v37  ;;  %3016 = vmatpush1.bf16.msra.mxu1 %v962_v28  ;;  %v1033_v37 = vunpack.c.h.s8.bf16 %v433_v18  ;;  %v1035_v28 = vunpack.c.h.s8.bf16 %v435_v19 }
 0x2b6   : >> { %2689 = vmatprep.subr.bf16.mxu0 %v969_v29  ;;  %3017 = vmatprep.subr.bf16.mxu1 %v971_v30  ;;  %v441_v29 = vld [vmem:[%s4279_s27 + $0x2e8] sm:$0xff]  ;;  %v443_v30 = vld [vmem:[%s4279_s27 + $0x2f8] sm:$0xff] }
 0x2b9   : >> { %2690 = vmatpush1.bf16.msra.mxu0 %v968_v34  ;;  %3018 = vmatpush1.bf16.msra.mxu1 %v970_v35  ;;  %v1041_v34 = vunpack.c.l.s8.bf16 %v441_v29  ;;  %v1043_v35 = vunpack.c.l.s8.bf16 %v443_v30 }
 0x2ba   : >> { %2691 = vmatprep.subr.bf16.mxu0 %v977_v38  ;;  %3019 = vmatprep.subr.bf16.mxu1 %v979_v39  ;;  %v440_v38 = vld [vmem:[%s4279_s27 + $0x2e0] sm:$0xff]  ;;  %v442_v39 = vld [vmem:[%s4279_s27 + $0x2f0] sm:$0xff] }
 0x2bb   : >> { %v1040_v40 = vunpack.c.l.s8.bf16 %v440_v38  ;;  %v1042_v43 = vunpack.c.l.s8.bf16 %v442_v39  ;;  %v1048_v48 = vunpack.c.h.s8.bf16 %v440_v38  ;;  %v1050_v50 = vunpack.c.h.s8.bf16 %v442_v39 }
 0x2bd   : >> { %2692 = vmatpush1.bf16.msra.mxu0 %v976_v44  ;;  %3020 = vmatpush1.bf16.msra.mxu1 %v978_v45  ;;  %v1049_v44 = vunpack.c.h.s8.bf16 %v441_v29  ;;  %v1051_v45 = vunpack.c.h.s8.bf16 %v443_v30 }
 0x2be   : >> { %2693 = vmatprep.subr.bf16.mxu0 %v985_v46  ;;  %3021 = vmatprep.subr.bf16.mxu1 %v987_v47  ;;  %v449_v46 = vld [vmem:[%s4279_s27 + $0x328] sm:$0xff]  ;;  %v451_v47 = vld [vmem:[%s4279_s27 + $0x338] sm:$0xff] }
 0x2c1   : >> { %2694 = vmatpush1.bf16.msra.mxu0 %v984_v53  ;;  %3022 = vmatpush1.bf16.msra.mxu1 %v986_v51  ;;  %v1057_v53 = vunpack.c.l.s8.bf16 %v449_v46  ;;  %v1059_v51 = vunpack.c.l.s8.bf16 %v451_v47 }
 0x2c2   : >> { %2704 = vmatprep.subr.bf16.mxu0 %v993_v55  ;;  %3032 = vmatprep.subr.bf16.mxu1 %v995_v56  ;;  %v448_v55 = vld [vmem:[%s4279_s27 + $0x320] sm:$0xff]  ;;  %v450_v56 = vld [vmem:[%s4279_s27 + $0x330] sm:$0xff] }
 0x2c3   : >> { %v1056_v57 = vunpack.c.l.s8.bf16 %v448_v55  ;;  %v1058_v58 = vunpack.c.l.s8.bf16 %v450_v56  ;;  %v1064_v60 = vunpack.c.h.s8.bf16 %v448_v55  ;;  %v1066_v36 = vunpack.c.h.s8.bf16 %v450_v56 }
 0x2c4   : >> { %2696 = vmatmul.mubr.bf16.vlgmr.msra.gmra.mrb[4].mxu0 %v4345_v54  ;;  %3024 = vmatmul.mubr.bf16.vlgmr.msra.gmra.mrb[4].mxu1 %v4345_v54  ;;  %v1010_v54 = vunpack.c.l.s8.bf16 %v426_v13 }
 0x2c5   : >> { %2705 = vmatpush1.bf16.msra.mxu0 %v992_v0  ;;  %3033 = vmatpush1.bf16.msra.mxu1 %v994_v1  ;;  %v1065_v0 = vunpack.c.h.s8.bf16 %v449_v46  ;;  %v1067_v1 = vunpack.c.h.s8.bf16 %v451_v47 }
 0x2c6   : >> { %2706 = vmatprep.subr.bf16.mxu0 %v1001_v2  ;;  %3034 = vmatprep.subr.bf16.mxu1 %v1003_v3  ;;  %v457_v2 = vld [vmem:[%s4279_s27 + $0x368] sm:$0xff]  ;;  %v459_v3 = vld [vmem:[%s4279_s27 + $0x378] sm:$0xff] }
 0x2c7   : >> { %2736 = vmatprep.mubr.bf16.mxu0 %v4351_v61  ;;  %3064 = vmatprep.mubr.bf16.mxu1 %v4351_v61  ;;  %v1025_v61 = vunpack.c.l.s8.bf16 %v433_v18 }
 0x2c9   : >> { %2707 = vmatpush1.bf16.msra.mxu0 %v1000_v49  ;;  %3035 = vmatpush1.bf16.msra.mxu1 %v1002_v8  ;;  %v1073_v49 = vunpack.c.l.s8.bf16 %v457_v2  ;;  %v1075_v8 = vunpack.c.l.s8.bf16 %v459_v3 }
 0x2ca   : >> { %2708 = vmatprep.subr.bf16.mxu0 %v1009_v9  ;;  %3036 = vmatprep.subr.bf16.mxu1 %v1011_v10  ;;  %v456_v9 = vld [vmem:[%s4279_s27 + $0x360] sm:$0xff]  ;;  %v458_v10 = vld [vmem:[%s4279_s27 + $0x370] sm:$0xff] }
 0x2cb   : >> { %v1072_v12 = vunpack.c.l.s8.bf16 %v456_v9  ;;  %v1074_v13 = vunpack.c.l.s8.bf16 %v458_v10  ;;  %v1080_v18 = vunpack.c.h.s8.bf16 %v456_v9  ;;  %v1082_v19 = vunpack.c.h.s8.bf16 %v458_v10 }
 0x2cd   : >> { %2709 = vmatpush1.bf16.msra.mxu0 %v1008_v14  ;;  %3037 = vmatpush1.bf16.msra.mxu1 %v1010_v54  ;;  %v1081_v14 = vunpack.c.h.s8.bf16 %v457_v2  ;;  %v1083_v54 = vunpack.c.h.s8.bf16 %v459_v3 }
 0x2ce   : >> { %2710 = vmatprep.subr.bf16.mxu0 %v1017_v16  ;;  %3038 = vmatprep.subr.bf16.mxu1 %v1019_v17  ;;  %v465_v16 = vld [vmem:[%s4279_s27 + $0x3a8] sm:$0xff]  ;;  %v467_v17 = vld [vmem:[%s4279_s27 + $0x3b8] sm:$0xff] }
 0x2d1   : >> { %2711 = vmatpush1.bf16.msra.mxu0 %v1016_v20  ;;  %3039 = vmatpush1.bf16.msra.mxu1 %v1018_v21  ;;  %v1089_v20 = vunpack.c.l.s8.bf16 %v465_v16  ;;  %v1091_v21 = vunpack.c.l.s8.bf16 %v467_v17 }
 0x2d2   : >> { %2712 = vmatprep.subr.bf16.mxu0 %v1025_v61  ;;  %3040 = vmatprep.subr.bf16.mxu1 %v1027_v24  ;;  %v464_v61 = vld [vmem:[%s4279_s27 + $0x3a0] sm:$0xff]  ;;  %v466_v24 = vld [vmem:[%s4279_s27 + $0x3b0] sm:$0xff] }
 0x2d3   : >> { %v1088_v52 = vunpack.c.l.s8.bf16 %v464_v61  ;;  %v1090_v23 = vunpack.c.l.s8.bf16 %v466_v24  ;;  %v1096_v29 = vunpack.c.h.s8.bf16 %v464_v61  ;;  %v1098_v30 = vunpack.c.h.s8.bf16 %v466_v24 }
 0x2d5   : >> { %2713 = vmatpush1.bf16.msra.mxu0 %v1024_v25  ;;  %3041 = vmatpush1.bf16.msra.mxu1 %v1026_v26  ;;  %v1097_v25 = vunpack.c.h.s8.bf16 %v465_v16  ;;  %v1099_v26 = vunpack.c.h.s8.bf16 %v467_v17 }
 0x2d6   : >> { %2714 = vmatprep.subr.bf16.mxu0 %v1033_v37  ;;  %3042 = vmatprep.subr.bf16.mxu1 %v1035_v28  ;;  %v473_v37 = vld [vmem:[%s4279_s27 + $0x3e8] sm:$0xff]  ;;  %v475_v28 = vld [vmem:[%s4279_s27 + $0x3f8] sm:$0xff] }
 0x2d9   : >> { %2715 = vmatpush1.bf16.msra.mxu0 %v1032_v31  ;;  %3043 = vmatpush1.bf16.msra.mxu1 %v1034_v33  ;;  %v1105_v31 = vunpack.c.l.s8.bf16 %v473_v37  ;;  %v1107_v33 = vunpack.c.l.s8.bf16 %v475_v28 }
 0x2da   : >> { %2716 = vmatprep.subr.bf16.mxu0 %v1041_v34  ;;  %3044 = vmatprep.subr.bf16.mxu1 %v1043_v35  ;;  %v472_v34 = vld [vmem:[%s4279_s27 + $0x3e0] sm:$0xff]  ;;  %v474_v35 = vld [vmem:[%s4279_s27 + $0x3f0] sm:$0xff] }
 0x2db   : >> { %v1104_v38 = vunpack.c.l.s8.bf16 %v472_v34  ;;  %v1106_v39 = vunpack.c.l.s8.bf16 %v474_v35  ;;  %v1112_v46 = vunpack.c.h.s8.bf16 %v472_v34  ;;  %v1114_v47 = vunpack.c.h.s8.bf16 %v474_v35 }
 0x2dd   : >> { %2717 = vmatpush1.bf16.msra.mxu0 %v1040_v40  ;;  %3045 = vmatpush1.bf16.msra.mxu1 %v1042_v43  ;;  %v1113_v40 = vunpack.c.h.s8.bf16 %v473_v37  ;;  %v1115_v43 = vunpack.c.h.s8.bf16 %v475_v28 }
 0x2de   : >> { %2718 = vmatprep.subr.bf16.mxu0 %v1049_v44  ;;  %3046 = vmatprep.subr.bf16.mxu1 %v1051_v45  ;;  %v481_v44 = vld [vmem:[%s4279_s27 + $0x428] sm:$0xff]  ;;  %v483_v45 = vld [vmem:[%s4279_s27 + $0x438] sm:$0xff] }
 0x2e1   : >> { %2719 = vmatpush1.bf16.msra.mxu0 %v1048_v48  ;;  %3047 = vmatpush1.bf16.msra.mxu1 %v1050_v50  ;;  %v1121_v48 = vunpack.c.l.s8.bf16 %v481_v44  ;;  %v1123_v50 = vunpack.c.l.s8.bf16 %v483_v45 }
 0x2e2   : >> { %2720 = vmatprep.subr.bf16.mxu0 %v1057_v53  ;;  %3048 = vmatprep.subr.bf16.mxu1 %v1059_v51  ;;  %v480_v53 = vld [vmem:[%s4279_s27 + $0x420] sm:$0xff]  ;;  %v482_v51 = vld [vmem:[%s4279_s27 + $0x430] sm:$0xff] }
 0x2e3   : >> { %v1120_v55 = vunpack.c.l.s8.bf16 %v480_v53  ;;  %v1122_v56 = vunpack.c.l.s8.bf16 %v482_v51  ;;  %v1128_v2 = vunpack.c.h.s8.bf16 %v480_v53  ;;  %v1130_v3 = vunpack.c.h.s8.bf16 %v482_v51 }
 0x2e5   : >> { %2721 = vmatpush1.bf16.msra.mxu0 %v1056_v57  ;;  %3049 = vmatpush1.bf16.msra.mxu1 %v1058_v58  ;;  %v1129_v57 = vunpack.c.h.s8.bf16 %v481_v44  ;;  %v1131_v58 = vunpack.c.h.s8.bf16 %v483_v45 }
 0x2e6   : >> { %2722 = vmatprep.subr.bf16.mxu0 %v1065_v0  ;;  %3050 = vmatprep.subr.bf16.mxu1 %v1067_v1  ;;  %v489_v0 = vld [vmem:[%s4279_s27 + $0x468] sm:$0xff]  ;;  %v491_v1 = vld [vmem:[%s4279_s27 + $0x478] sm:$0xff] }
 0x2e7   : >> { %v1145_v10 = vunpack.c.h.s8.bf16 %v489_v0 }
 0x2e9   : >> { %2723 = vmatpush1.bf16.msra.mxu0 %v1064_v60  ;;  %3051 = vmatpush1.bf16.msra.mxu1 %v1066_v36  ;;  %v1137_v60 = vunpack.c.l.s8.bf16 %v489_v0  ;;  %v1139_v36 = vunpack.c.l.s8.bf16 %v491_v1 }
 0x2ea   : >> { %2724 = vmatprep.subr.bf16.mxu0 %v1073_v49  ;;  %3052 = vmatprep.subr.bf16.mxu1 %v1075_v8  ;;  %v488_v49 = vld [vmem:[%s4279_s27 + $0x460] sm:$0xff]  ;;  %v490_v8 = vld [vmem:[%s4279_s27 + $0x470] sm:$0xff] }
 0x2eb   : >> { %v1136_v9 = vunpack.c.l.s8.bf16 %v488_v49  ;;  %v1146_v16 = vunpack.c.h.s8.bf16 %v490_v8 }
 0x2ed   : >> { %2725 = vmatpush1.bf16.msra.mxu0 %v1072_v12  ;;  %3053 = vmatpush1.bf16.msra.mxu1 %v1074_v13  ;;  %v1147_v12 = vunpack.c.h.s8.bf16 %v491_v1  ;;  %v497_v13 = vld [vmem:[%s4279_s27 + $0x4a8] sm:$0xff] }
 0x2ee   : >> { %2726 = vmatprep.subr.bf16.mxu0 %v1081_v14  ;;  %3054 = vmatprep.subr.bf16.mxu1 %v1083_v54  ;;  %v499_v14 = vld [vmem:[%s4279_s27 + $0x4b8] sm:$0xff]  ;;  %v1144_v54 = vunpack.c.h.s8.bf16 %v488_v49  ;;  %v1161_v61 = vunpack.c.h.s8.bf16 %v497_v13 }
 0x2ef   : >> { %v1155_v17 = vunpack.c.l.s8.bf16 %v499_v14  ;;  %v1163_v24 = vunpack.c.h.s8.bf16 %v499_v14 }
 0x2f1   : >> { %2727 = vmatpush1.bf16.msra.mxu0 %v1080_v18  ;;  %3055 = vmatpush1.bf16.msra.mxu1 %v1082_v19  ;;  %v496_v18 = vld [vmem:[%s4279_s27 + $0x4a0] sm:$0xff]  ;;  %v498_v19 = vld [vmem:[%s4279_s27 + $0x4b0] sm:$0xff] }
 0x2f2   : >> { %2728 = vmatprep.subr.bf16.mxu0 %v1089_v20  ;;  %3056 = vmatprep.subr.bf16.mxu1 %v1091_v21  ;;  %v1152_v20 = vunpack.c.l.s8.bf16 %v496_v18  ;;  %v1154_v21 = vunpack.c.l.s8.bf16 %v498_v19 }
 0x2f5   : >> { %2729 = vmatpush1.bf16.msra.mxu0 %v1088_v52  ;;  %3057 = vmatpush1.bf16.msra.mxu1 %v1090_v23  ;;  %v505_v52 = vld [vmem:[%s4279_s27 + $0x4e8] sm:$0xff]  ;;  %v507_v23 = vld [vmem:[%s4279_s27 + $0x4f8] sm:$0xff] }
 0x2f6   : >> { %2730 = vmatprep.subr.bf16.mxu0 %v1097_v25  ;;  %3058 = vmatprep.subr.bf16.mxu1 %v1099_v26  ;;  %v1160_v25 = vunpack.c.h.s8.bf16 %v496_v18  ;;  %v1162_v26 = vunpack.c.h.s8.bf16 %v498_v19  ;;  %v1169_v37 = vunpack.c.l.s8.bf16 %v505_v52  ;;  %v1171_v28 = vunpack.c.l.s8.bf16 %v507_v23 }
 0x2f7   : >> { %v1177_v34 = vunpack.c.h.s8.bf16 %v505_v52  ;;  %v1179_v35 = vunpack.c.h.s8.bf16 %v507_v23 }
 0x2f9   : >> { %2731 = vmatpush1.bf16.msra.mxu0 %v1096_v29  ;;  %3059 = vmatpush1.bf16.msra.mxu1 %v1098_v30  ;;  %v504_v29 = vld [vmem:[%s4279_s27 + $0x4e0] sm:$0xff]  ;;  %v506_v30 = vld [vmem:[%s4279_s27 + $0x4f0] sm:$0xff] }
 0x2fa   : >> { %2732 = vmatprep.subr.bf16.mxu0 %v1105_v31  ;;  %3060 = vmatprep.subr.bf16.mxu1 %v1107_v33  ;;  %v1168_v31 = vunpack.c.l.s8.bf16 %v504_v29  ;;  %v1170_v33 = vunpack.c.l.s8.bf16 %v506_v30 }
 0x2fd   : >> { %2733 = vmatpush1.bf16.msra.mxu0 %v1104_v38  ;;  %3061 = vmatpush1.bf16.msra.mxu1 %v1106_v39  ;;  %v513_v38 = vld [vmem:[%s4279_s27 + $0x528] sm:$0xff]  ;;  %v515_v39 = vld [vmem:[%s4279_s27 + $0x538] sm:$0xff] }
 0x2fe   : >> { %2734 = vmatprep.subr.bf16.mxu0 %v1113_v40  ;;  %3062 = vmatprep.subr.bf16.mxu1 %v1115_v43  ;;  %v1176_v40 = vunpack.c.h.s8.bf16 %v504_v29  ;;  %v1178_v43 = vunpack.c.h.s8.bf16 %v506_v30  ;;  %v1185_v44 = vunpack.c.l.s8.bf16 %v513_v38  ;;  %v1187_v45 = vunpack.c.l.s8.bf16 %v515_v39 }
 0x2ff   : >> { %v1193_v53 = vunpack.c.h.s8.bf16 %v513_v38  ;;  %v1195_v51 = vunpack.c.h.s8.bf16 %v515_v39 }
 0x301   : >> { %2735 = vmatpush1.bf16.msra.mxu0 %v1112_v46  ;;  %3063 = vmatpush1.bf16.msra.mxu1 %v1114_v47  ;;  %v512_v46 = vld [vmem:[%s4279_s27 + $0x520] sm:$0xff]  ;;  %v514_v47 = vld [vmem:[%s4279_s27 + $0x530] sm:$0xff] }
 0x302   : >> { %2745 = vmatprep.subr.bf16.mxu0 %v1121_v48  ;;  %3073 = vmatprep.subr.bf16.mxu1 %v1123_v50  ;;  %v1184_v48 = vunpack.c.l.s8.bf16 %v512_v46  ;;  %v1186_v50 = vunpack.c.l.s8.bf16 %v514_v47 }
 0x304   : >> { %2737 = vmatmul.mubr.bf16.vlgmr.msra.gmra.mrb[4].mxu0 %v4396_v32  ;;  %3065 = vmatmul.mubr.bf16.vlgmr.msra.gmra.mrb[4].mxu1 %v4396_v32  ;;  %v1138_v32 = vunpack.c.l.s8.bf16 %v490_v8 }
 0x305   : >> { %2746 = vmatpush1.bf16.msra.mxu0 %v1120_v55  ;;  %3074 = vmatpush1.bf16.msra.mxu1 %v1122_v56  ;;  %v521_v55 = vld [vmem:[%s4279_s27 + $0x568] sm:$0xff]  ;;  %v523_v56 = vld [vmem:[%s4279_s27 + $0x578] sm:$0xff] }
 0x306   : >> { %2747 = vmatprep.subr.bf16.mxu0 %v1129_v57  ;;  %3075 = vmatprep.subr.bf16.mxu1 %v1131_v58  ;;  %v1192_v57 = vunpack.c.h.s8.bf16 %v512_v46  ;;  %v1194_v58 = vunpack.c.h.s8.bf16 %v514_v47  ;;  %v1201_v0 = vunpack.c.l.s8.bf16 %v521_v55  ;;  %v1203_v1 = vunpack.c.l.s8.bf16 %v523_v56 }
 0x307   : >> { %2777 = vmatprep.mubr.bf16.mxu0 %v4401_v41  ;;  %3105 = vmatprep.mubr.bf16.mxu1 %v4401_v41  ;;  %v1153_v41 = vunpack.c.l.s8.bf16 %v497_v13  ;;  %v1209_v49 = vunpack.c.h.s8.bf16 %v521_v55  ;;  %v1211_v8 = vunpack.c.h.s8.bf16 %v523_v56 }
 0x309   : >> { %2748 = vmatpush1.bf16.msra.mxu0 %v1128_v2  ;;  %3076 = vmatpush1.bf16.msra.mxu1 %v1130_v3  ;;  %v520_v2 = vld [vmem:[%s4279_s27 + $0x560] sm:$0xff]  ;;  %v522_v3 = vld [vmem:[%s4279_s27 + $0x570] sm:$0xff] }
 0x30a   : >> { %2749 = vmatprep.subr.bf16.mxu0 %v1137_v60  ;;  %3077 = vmatprep.subr.bf16.mxu1 %v1139_v36  ;;  %v1200_v60 = vunpack.c.l.s8.bf16 %v520_v2  ;;  %v1202_v36 = vunpack.c.l.s8.bf16 %v522_v3 }
 0x30d   : >> { %2750 = vmatpush1.bf16.msra.mxu0 %v1136_v9  ;;  %3078 = vmatpush1.bf16.msra.mxu1 %v1138_v32  ;;  %v529_v9 = vld [vmem:[%s4279_s27 + $0x5a8] sm:$0xff]  ;;  %v531_v32 = vld [vmem:[%s4279_s27 + $0x5b8] sm:$0xff] }
 0x30e   : >> { %2751 = vmatprep.subr.bf16.mxu0 %v1145_v10  ;;  %3079 = vmatprep.subr.bf16.mxu1 %v1147_v12  ;;  %v1208_v10 = vunpack.c.h.s8.bf16 %v520_v2  ;;  %v1210_v12 = vunpack.c.h.s8.bf16 %v522_v3  ;;  %v1217_v13 = vunpack.c.l.s8.bf16 %v529_v9  ;;  %v1219_v14 = vunpack.c.l.s8.bf16 %v531_v32  ;;  %v561_v3 = vld [vmem:[%s4279_s27 + $0x6a8] sm:$0xff] }
 0x30f   : >> { %v1225_v18 = vunpack.c.h.s8.bf16 %v529_v9  ;;  %v1227_v19 = vunpack.c.h.s8.bf16 %v531_v32  ;;  %v560_v9 = vld [vmem:[%s4279_s27 + $0x6a0] sm:$0xff]  ;;  %v562_v32 = vld [vmem:[%s4279_s27 + $0x6b0] sm:$0xff] }
 0x311   : >> { %2752 = vmatpush1.bf16.msra.mxu0 %v1144_v54  ;;  %3080 = vmatpush1.bf16.msra.mxu1 %v1146_v16  ;;  %v528_v54 = vld [vmem:[%s4279_s27 + $0x5a0] sm:$0xff]  ;;  %v530_v16 = vld [vmem:[%s4279_s27 + $0x5b0] sm:$0xff] }
 0x312   : >> { %2753 = vmatprep.subr.bf16.mxu0 %v1153_v41  ;;  %3081 = vmatprep.subr.bf16.mxu1 %v1155_v17  ;;  %v1216_v41 = vunpack.c.l.s8.bf16 %v528_v54  ;;  %v1218_v17 = vunpack.c.l.s8.bf16 %v530_v16 }
 0x315   : >> { %2754 = vmatpush1.bf16.msra.mxu0 %v1152_v20  ;;  %3082 = vmatpush1.bf16.msra.mxu1 %v1154_v21  ;;  %v537_v20 = vld [vmem:[%s4279_s27 + $0x5e8] sm:$0xff]  ;;  %v539_v21 = vld [vmem:[%s4279_s27 + $0x5f8] sm:$0xff] }
 0x316   : >> { %2755 = vmatprep.subr.bf16.mxu0 %v1161_v61  ;;  %3083 = vmatprep.subr.bf16.mxu1 %v1163_v24  ;;  %v1224_v61 = vunpack.c.h.s8.bf16 %v528_v54  ;;  %v1226_v24 = vunpack.c.h.s8.bf16 %v530_v16  ;;  %v1233_v52 = vunpack.c.l.s8.bf16 %v537_v20  ;;  %v1235_v23 = vunpack.c.l.s8.bf16 %v539_v21 }
 0x317   : >> { %v1241_v29 = vunpack.c.h.s8.bf16 %v537_v20  ;;  %v1243_v30 = vunpack.c.h.s8.bf16 %v539_v21  ;;  %v1289_v54 = vunpack.c.h.s8.bf16 %v561_v3  ;;  %v1290_v20 = vunpack.c.h.s8.bf16 %v562_v32 }
 0x319   : >> { %2756 = vmatpush1.bf16.msra.mxu0 %v1160_v25  ;;  %3084 = vmatpush1.bf16.msra.mxu1 %v1162_v26  ;;  %v536_v25 = vld [vmem:[%s4279_s27 + $0x5e0] sm:$0xff]  ;;  %v538_v26 = vld [vmem:[%s4279_s27 + $0x5f0] sm:$0xff] }
 0x31a   : >> { %2757 = vmatprep.subr.bf16.mxu0 %v1169_v37  ;;  %3085 = vmatprep.subr.bf16.mxu1 %v1171_v28  ;;  %v1232_v37 = vunpack.c.l.s8.bf16 %v536_v25  ;;  %v1234_v28 = vunpack.c.l.s8.bf16 %v538_v26 }
 0x31d   : >> { %2758 = vmatpush1.bf16.msra.mxu0 %v1168_v31  ;;  %3086 = vmatpush1.bf16.msra.mxu1 %v1170_v33  ;;  %v545_v31 = vld [vmem:[%s4279_s27 + $0x628] sm:$0xff]  ;;  %v547_v33 = vld [vmem:[%s4279_s27 + $0x638] sm:$0xff] }
 0x31e   : >> { %2759 = vmatprep.subr.bf16.mxu0 %v1177_v34  ;;  %3087 = vmatprep.subr.bf16.mxu1 %v1179_v35  ;;  %v1240_v34 = vunpack.c.h.s8.bf16 %v536_v25  ;;  %v1242_v35 = vunpack.c.h.s8.bf16 %v538_v26  ;;  %v1249_v38 = vunpack.c.l.s8.bf16 %v545_v31  ;;  %v1251_v39 = vunpack.c.l.s8.bf16 %v547_v33 }
 0x31f   : >> { %v1257_v46 = vunpack.c.h.s8.bf16 %v545_v31  ;;  %v1259_v47 = vunpack.c.h.s8.bf16 %v547_v33 }
 0x321   : >> { %2760 = vmatpush1.bf16.msra.mxu0 %v1176_v40  ;;  %3088 = vmatpush1.bf16.msra.mxu1 %v1178_v43  ;;  %v544_v40 = vld [vmem:[%s4279_s27 + $0x620] sm:$0xff]  ;;  %v546_v43 = vld [vmem:[%s4279_s27 + $0x630] sm:$0xff] }
 0x322   : >> { %2761 = vmatprep.subr.bf16.mxu0 %v1185_v44  ;;  %3089 = vmatprep.subr.bf16.mxu1 %v1187_v45  ;;  %v1248_v44 = vunpack.c.l.s8.bf16 %v544_v40  ;;  %v1250_v45 = vunpack.c.l.s8.bf16 %v546_v43 }
 0x325   : >> { %2762 = vmatpush1.bf16.msra.mxu0 %v1184_v48  ;;  %3090 = vmatpush1.bf16.msra.mxu1 %v1186_v50  ;;  %v553_v48 = vld [vmem:[%s4279_s27 + $0x668] sm:$0xff]  ;;  %v555_v50 = vld [vmem:[%s4279_s27 + $0x678] sm:$0xff] }
 0x326   : >> { %2763 = vmatprep.subr.bf16.mxu0 %v1193_v53  ;;  %3091 = vmatprep.subr.bf16.mxu1 %v1195_v51  ;;  %v1256_v53 = vunpack.c.h.s8.bf16 %v544_v40  ;;  %v1258_v51 = vunpack.c.h.s8.bf16 %v546_v43  ;;  %v1265_v55 = vunpack.c.l.s8.bf16 %v553_v48  ;;  %v1267_v56 = vunpack.c.l.s8.bf16 %v555_v50 }
 0x327   : >> { %v1275_v2 = vunpack.c.h.s8.bf16 %v555_v50 }
 0x329   : >> { %2764 = vmatpush1.bf16.msra.mxu0 %v1192_v57  ;;  %3092 = vmatpush1.bf16.msra.mxu1 %v1194_v58  ;;  %v552_v57 = vld [vmem:[%s4279_s27 + $0x660] sm:$0xff]  ;;  %v554_v58 = vld [vmem:[%s4279_s27 + $0x670] sm:$0xff] }
 0x32a   : >> { %2765 = vmatprep.subr.bf16.mxu0 %v1201_v0  ;;  %3093 = vmatprep.subr.bf16.mxu1 %v1203_v1  ;;  %v1264_v0 = vunpack.c.l.s8.bf16 %v552_v57  ;;  %v1273_v1 = vunpack.c.h.s8.bf16 %v553_v48  ;;  %v1889_v48 = vld [vmem:[#allocation2] sm:$0xff] }
 0x32d   : >> { %2766 = vmatpush1.bf16.msra.mxu0 %v1200_v60  ;;  %3094 = vmatpush1.bf16.msra.mxu1 %v1202_v36  ;;  %v563_v60 = vld [vmem:[%s4279_s27 + $0x6b8] sm:$0xff]  ;;  %v1272_v36 = vunpack.c.h.s8.bf16 %v552_v57  ;;  %v576_v57 = vld [vmem:[%s4279_s27 + $0x720] sm:$0xff] }
 0x32e   : >> { %2767 = vmatprep.subr.bf16.mxu0 %v1209_v49  ;;  %3095 = vmatprep.subr.bf16.mxu1 %v1211_v8  ;;  %v1274_v49 = vunpack.c.h.s8.bf16 %v554_v58  ;;  %v1283_v8 = vunpack.c.l.s8.bf16 %v563_v60  ;;  %v1291_v16 = vunpack.c.h.s8.bf16 %v563_v60  ;;  %v585_v60 = vld [vmem:[%s4279_s27 + $0x768] sm:$0xff] }
 0x331   : >> { %2768 = vmatpush1.bf16.msra.mxu0 %v1208_v10  ;;  %3096 = vmatpush1.bf16.msra.mxu1 %v1210_v12  ;;  %v4057_v10 = vmov 1983009808  }
 0x332   : >> { %2769 = vmatprep.subr.bf16.mxu0 %v1217_v13  ;;  %3097 = vmatprep.subr.bf16.mxu1 %v1219_v14  ;;  %v3330_v12 = vunpack.c.l.s4 %v4057_v10  ;;  %v1280_v13 = vunpack.c.l.s8.bf16 %v560_v9  ;;  %v1282_v14 = vunpack.c.l.s8.bf16 %v562_v32  ;;  %v584_v32 = vld [vmem:[%s4279_s27 + $0x760] sm:$0xff]  ;;  %v586_v10 = vld [vmem:[%s4279_s27 + $0x770] sm:$0xff] }
 0x335   : >> { %2770 = vmatpush1.bf16.msra.mxu0 %v1216_v41  ;;  %3098 = vmatpush1.bf16.msra.mxu1 %v1218_v17  ;;  %v3331_v41 = vunpack.c.0.s8 %v3330_v12  ;;  %v569_v17 = vld [vmem:[%s4279_s27 + $0x6e8] sm:$0xff]  ;;  %v1328_v12 = vunpack.c.l.s8.bf16 %v584_v32 }
 0x336   : >> { %2771 = vmatprep.subr.bf16.mxu0 %v1225_v18  ;;  %3099 = vmatprep.subr.bf16.mxu1 %v1227_v19  ;;  %v571_v18 = vld [vmem:[%s4279_s27 + $0x6f8] sm:$0xff]  ;;  %v1288_v19 = vunpack.c.h.s8.bf16 %v560_v9  ;;  %v1297_v21 = vunpack.c.l.s8.bf16 %v569_v17  ;;  %v1305_v40 = vunpack.c.h.s8.bf16 %v569_v17  ;;  %v1336_v17 = vunpack.c.h.s8.bf16 %v584_v32  ;;  %v625_v32 = vld [vmem:[%s4279_s27 + $0x8a8] sm:$0xff] }
 0x337   : >> { %v4800_v26 = vsub.s32 %v3331_v41, %v4291_v27  ;;  %v1307_v43 = vunpack.c.h.s8.bf16 %v571_v18  ;;  %v595_v41 = vld [vmem:[%s4279_s27 + $0x7b8] sm:$0xff] }
 0x339   : >> { %2772 = vmatpush1.bf16.msra.mxu0 %v1224_v61  ;;  %3100 = vmatpush1.bf16.msra.mxu1 %v1226_v24  ;;  %v1299_v61 = vunpack.c.l.s8.bf16 %v571_v18  ;;  %v568_v24 = vld [vmem:[%s4279_s27 + $0x6e0] sm:$0xff]  ;;  %v1338_v18 = vunpack.c.h.s8.bf16 %v586_v10 }
 0x33a   : >> { %2773 = vmatprep.subr.bf16.mxu0 %v1233_v52  ;;  %3101 = vmatprep.subr.bf16.mxu1 %v1235_v23  ;;  %v570_v52 = vld [vmem:[%s4279_s27 + $0x6f0] sm:$0xff] }
 0x33d   : >> { %2774 = vmatpush1.bf16.msra.mxu0 %v1232_v37  ;;  %3102 = vmatpush1.bf16.msra.mxu1 %v1234_v28 }
 0x33e   : >> { %2775 = vmatprep.subr.bf16.mxu0 %v1241_v29  ;;  %3103 = vmatprep.subr.bf16.mxu1 %v1243_v30 }
 0x341   : >> { %2776 = vmatpush1.bf16.msra.mxu0 %v1240_v34  ;;  %3104 = vmatpush1.bf16.msra.mxu1 %v1242_v35  ;;  %v1296_v34 = vunpack.c.l.s8.bf16 %v568_v24  ;;  %v1298_v35 = vunpack.c.l.s8.bf16 %v570_v52 }
 0x342   : >> { %2786 = vmatprep.subr.bf16.mxu0 %v1249_v38  ;;  %3114 = vmatprep.subr.bf16.mxu1 %v1251_v39 }
 0x344   : >> { %2778 = vmatmul.mubr.bf16.vlgmr.msra.gmra.mrb[4].mxu0 %v4439_v15  ;;  %3106 = vmatmul.mubr.bf16.vlgmr.msra.gmra.mrb[4].mxu1 %v4439_v15  ;;  %v1266_v15 = vunpack.c.l.s8.bf16 %v554_v58  ;;  %v578_v58 = vld [vmem:[%s4279_s27 + $0x730] sm:$0xff] }
 0x345   : >> { %2787 = vmatpush1.bf16.msra.mxu0 %v1248_v44  ;;  %3115 = vmatpush1.bf16.msra.mxu1 %v1250_v45 }
 0x346   : >> { %2788 = vmatprep.subr.bf16.mxu0 %v1257_v46  ;;  %3116 = vmatprep.subr.bf16.mxu1 %v1259_v47  ;;  %v577_v46 = vld [vmem:[%s4279_s27 + $0x728] sm:$0xff]  ;;  %v579_v47 = vld [vmem:[%s4279_s27 + $0x738] sm:$0xff] }
 0x347   : >> { %2818 = vmatprep.mubr.bf16.mxu0 %v4445_v22  ;;  %3146 = vmatprep.mubr.bf16.mxu1 %v4445_v22  ;;  %v1281_v22 = vunpack.c.l.s8.bf16 %v561_v3  ;;  %v1323_v3 = vunpack.c.h.s8.bf16 %v579_v47 }
 0x349   : >> { %2789 = vmatpush1.bf16.msra.mxu0 %v1256_v53  ;;  %3117 = vmatpush1.bf16.msra.mxu1 %v1258_v51  ;;  %v1304_v53 = vunpack.c.h.s8.bf16 %v568_v24  ;;  %v1306_v51 = vunpack.c.h.s8.bf16 %v570_v52 }
 0x34a   : >> { %2790 = vmatprep.subr.bf16.mxu0 %v1265_v55  ;;  %3118 = vmatprep.subr.bf16.mxu1 %v1267_v56  ;;  %v1313_v55 = vunpack.c.l.s8.bf16 %v577_v46  ;;  %v1315_v56 = vunpack.c.l.s8.bf16 %v579_v47 }
 0x34d   : >> { %2791 = vmatpush1.bf16.msra.mxu0 %v1264_v0  ;;  %3119 = vmatpush1.bf16.msra.mxu1 %v1266_v15  ;;  %v1312_v15 = vunpack.c.l.s8.bf16 %v576_v57 }
 0x34e   : >> { %2792 = vmatprep.subr.bf16.mxu0 %v1273_v1  ;;  %3120 = vmatprep.subr.bf16.mxu1 %v1275_v2  ;;  %v1314_v1 = vunpack.c.l.s8.bf16 %v578_v58  ;;  %v1321_v2 = vunpack.c.h.s8.bf16 %v577_v46 }
 0x351   : >> { %2793 = vmatpush1.bf16.msra.mxu0 %v1272_v36  ;;  %3121 = vmatpush1.bf16.msra.mxu1 %v1274_v49  ;;  %v587_v36 = vld [vmem:[%s4279_s27 + $0x778] sm:$0xff]  ;;  %v1320_v49 = vunpack.c.h.s8.bf16 %v576_v57 }
 0x352   : >> { %2794 = vmatprep.subr.bf16.mxu0 %v1281_v22  ;;  %3122 = vmatprep.subr.bf16.mxu1 %v1283_v8  ;;  %v1322_v22 = vunpack.c.h.s8.bf16 %v578_v58  ;;  %v1329_v8 = vunpack.c.l.s8.bf16 %v585_v60  ;;  %v1331_v9 = vunpack.c.l.s8.bf16 %v587_v36 }
 0x355   : >> { %2795 = vmatpush1.bf16.msra.mxu0 %v1280_v13  ;;  %3123 = vmatpush1.bf16.msra.mxu1 %v1282_v14  ;;  %v1330_v13 = vunpack.c.l.s8.bf16 %v586_v10  ;;  %v1337_v14 = vunpack.c.h.s8.bf16 %v585_v60  ;;  %v627_v10 = vld [vmem:[%s4279_s27 + $0x8b8] sm:$0xff] }
 0x356   : >> { %2796 = vmatprep.subr.bf16.mxu0 %v1289_v54  ;;  %3124 = vmatprep.subr.bf16.mxu1 %v1291_v16  ;;  %v1339_v54 = vunpack.c.h.s8.bf16 %v587_v36  ;;  %v593_v16 = vld [vmem:[%s4279_s27 + $0x7a8] sm:$0xff]  ;;  %v616_v36 = vld [vmem:[%s4279_s27 + $0x860] sm:$0xff] }
 0x357   : >> { %v2328_v23 = vpop.f32.mrb[0].mxu0  ;;  %v2656_v25 = vpop.f32.mrb[0].mxu1 }
 0x358   : >> { %v2330_v37 = vpop.f32.mrb[1].mxu0  ;;  %v2658_v28 = vpop.f32.mrb[1].mxu1 }
 0x359   : >> { %v3327_v29 = vcombine.low %v2328_v23, %v2330_v37  ;;  %v3328_v30 = vcombine.low %v2656_v25, %v2658_v28  ;;  %v2332_v31 = vpop.f32.mrb[2].mxu0  ;;  %v2660_v33 = vpop.f32.mrb[2].mxu1  ;;  %2797 = vmatpush1.bf16.msra.mxu0 %v1288_v19  ;;  %3125 = vmatpush1.bf16.msra.mxu1 %v1290_v20  ;;  %v1345_v19 = vunpack.c.l.s8.bf16 %v593_v16  ;;  %v1347_v20 = vunpack.c.l.s8.bf16 %v595_v41  ;;  %v601_v37 = vld [vmem:[%s4279_s27 + $0x7e8] sm:$0xff]  ;;  %v603_v28 = vld [vmem:[%s4279_s27 + $0x7f8] sm:$0xff] }
 0x35a   : >> { %v2333_v38 = vpop.f32.mrb[3].mxu0  ;;  %v2661_v39 = vpop.f32.mrb[3].mxu1  ;;  %2798 = vmatprep.subr.bf16.mxu0 %v1297_v21  ;;  %3126 = vmatprep.subr.bf16.mxu1 %v1299_v61  ;;  %v592_v21 = vld [vmem:[%s4279_s27 + $0x7a0] sm:$0xff]  ;;  %v594_v61 = vld [vmem:[%s4279_s27 + $0x7b0] sm:$0xff]  ;;  %v1353_v23 = vunpack.c.h.s8.bf16 %v593_v16  ;;  %v1355_v25 = vunpack.c.h.s8.bf16 %v595_v41  ;;  %v1361_v31 = vunpack.c.l.s8.bf16 %v601_v37  ;;  %v1363_v33 = vunpack.c.l.s8.bf16 %v603_v28 }
 0x35b   : >> { %v3335_v44 = vrot.slane %v3327_v29, %v4800_v26  ;;  %v3342_v45 = vrot.slane %v3328_v30, %v4800_v26  ;;  %v1344_v24 = vunpack.c.l.s8.bf16 %v592_v21  ;;  %v1346_v52 = vunpack.c.l.s8.bf16 %v594_v61  ;;  %v626_v16 = vld [vmem:[%s4279_s27 + $0x8b0] sm:$0xff] }
 0x35c   : >> { %v1352_v29 = vunpack.c.h.s8.bf16 %v592_v21  ;;  %v1354_v30 = vunpack.c.h.s8.bf16 %v594_v61  ;;  %v635_v21 = vld [vmem:[%s4279_s27 + $0x8f8] sm:$0xff] }
 0x35d   : >> { %v3343_v50 = vcombine.low %v3335_v44, %v3342_v45  ;;  %2799 = vmatpush1.bf16.msra.mxu0 %v1296_v34  ;;  %3127 = vmatpush1.bf16.msra.mxu1 %v1298_v35  ;;  %v600_v34 = vld [vmem:[%s4279_s27 + $0x7e0] sm:$0xff]  ;;  %v602_v35 = vld [vmem:[%s4279_s27 + $0x7f0] sm:$0xff]  ;;  %v609_v44 = vld [vmem:[%s4279_s27 + $0x828] sm:$0xff] }
 0x35e   : >> { %2800 = vmatprep.subr.bf16.mxu0 %v1305_v40  ;;  %3128 = vmatprep.subr.bf16.mxu1 %v1307_v43  ;;  %v1360_v38 = vunpack.c.l.s8.bf16 %v600_v34  ;;  %v1362_v39 = vunpack.c.l.s8.bf16 %v602_v35  ;;  %v1369_v40 = vunpack.c.h.s8.bf16 %v601_v37  ;;  %v1371_v43 = vunpack.c.h.s8.bf16 %v603_v28  ;;  %v611_v45 = vld [vmem:[%s4279_s27 + $0x838] sm:$0xff]  ;;  %v634_v37 = vld [vmem:[%s4279_s27 + $0x8f0] sm:$0xff] }
 0x35f   : >> { %v3363_v0 = vadd.f32 %v3343_v50, %v1889_v48  ;;  %v1368_v46 = vunpack.c.h.s8.bf16 %v600_v34  ;;  %v1370_v47 = vunpack.c.h.s8.bf16 %v602_v35  ;;  %v1377_v48 = vunpack.c.l.s8.bf16 %v609_v44  ;;  %v643_v34 = vld [vmem:[%s4279_s27 + $0x938] sm:$0xff] }
 0x360   : >> { %v1379_v50 = vunpack.c.l.s8.bf16 %v611_v45  ;;  %v1385_v57 = vunpack.c.h.s8.bf16 %v609_v44  ;;  %v1387_v58 = vunpack.c.h.s8.bf16 %v611_v45  ;;  %v642_v44 = vld [vmem:[%s4279_s27 + $0x930] sm:$0xff] }
 0x361   : >> { %3365 = vst [vmem:[#allocation2] sm:$0xff] %v3363_v0  ;;  %2801 = vmatpush1.bf16.msra.mxu0 %v1304_v53  ;;  %3129 = vmatpush1.bf16.msra.mxu1 %v1306_v51  ;;  %v608_v53 = vld [vmem:[%s4279_s27 + $0x820] sm:$0xff]  ;;  %v610_v51 = vld [vmem:[%s4279_s27 + $0x830] sm:$0xff]  ;;  %v617_v0 = vld [vmem:[%s4279_s27 + $0x868] sm:$0xff] }
 0x362   : >> { %2802 = vmatprep.subr.bf16.mxu0 %v1313_v55  ;;  %3130 = vmatprep.subr.bf16.mxu1 %v1315_v56  ;;  %v1376_v55 = vunpack.c.l.s8.bf16 %v608_v53  ;;  %v1378_v56 = vunpack.c.l.s8.bf16 %v610_v51 }
 0x365   : >> { %2803 = vmatpush1.bf16.msra.mxu0 %v1312_v15  ;;  %3131 = vmatpush1.bf16.msra.mxu1 %v1314_v1  ;;  %v619_v15 = vld [vmem:[%s4279_s27 + $0x878] sm:$0xff]  ;;  %v1384_v1 = vunpack.c.h.s8.bf16 %v608_v53 }
 0x366   : >> { %2804 = vmatprep.subr.bf16.mxu0 %v1321_v2  ;;  %3132 = vmatprep.subr.bf16.mxu1 %v1323_v3  ;;  %v1386_v2 = vunpack.c.h.s8.bf16 %v610_v51  ;;  %v1393_v3 = vunpack.c.l.s8.bf16 %v617_v0  ;;  %v1395_v60 = vunpack.c.l.s8.bf16 %v619_v15  ;;  %v651_v53 = vld [vmem:[%s4279_s27 + $0x978] sm:$0xff] }
 0x369   : >> { %2805 = vmatpush1.bf16.msra.mxu0 %v1320_v49  ;;  %3133 = vmatpush1.bf16.msra.mxu1 %v1322_v22  ;;  %v618_v49 = vld [vmem:[%s4279_s27 + $0x870] sm:$0xff]  ;;  %v1392_v22 = vunpack.c.l.s8.bf16 %v616_v36 }
 0x36a   : >> { %2806 = vmatprep.subr.bf16.mxu0 %v1329_v8  ;;  %3134 = vmatprep.subr.bf16.mxu1 %v1331_v9  ;;  %v1401_v8 = vunpack.c.h.s8.bf16 %v617_v0  ;;  %v1403_v9 = vunpack.c.h.s8.bf16 %v619_v15  ;;  %v650_v0 = vld [vmem:[%s4279_s27 + $0x970] sm:$0xff] }
 0x36d   : >> { %2807 = vmatpush1.bf16.msra.mxu0 %v1328_v12  ;;  %3135 = vmatpush1.bf16.msra.mxu1 %v1330_v13  ;;  %v1400_v12 = vunpack.c.h.s8.bf16 %v616_v36  ;;  %v1402_v13 = vunpack.c.h.s8.bf16 %v618_v49  ;;  %v659_v36 = vld [vmem:[%s4279_s27 + $0x9b8] sm:$0xff] }
 0x36e   : >> { %2808 = vmatprep.subr.bf16.mxu0 %v1337_v14  ;;  %3136 = vmatprep.subr.bf16.mxu1 %v1339_v54  ;;  %v1411_v14 = vunpack.c.l.s8.bf16 %v627_v10  ;;  %v624_v54 = vld [vmem:[%s4279_s27 + $0x8a0] sm:$0xff] }
 0x36f   : >> { %v1408_v41 = vunpack.c.l.s8.bf16 %v624_v54  ;;  %v1416_v61 = vunpack.c.h.s8.bf16 %v624_v54  ;;  %v667_v54 = vld [vmem:[%s4279_s27 + $0x9f8] sm:$0xff] }
 0x371   : >> { %2809 = vmatpush1.bf16.msra.mxu0 %v1336_v17  ;;  %3137 = vmatpush1.bf16.msra.mxu1 %v1338_v18  ;;  %v1410_v17 = vunpack.c.l.s8.bf16 %v626_v16  ;;  %v1417_v18 = vunpack.c.h.s8.bf16 %v625_v32 }
 0x372   : >> { %2810 = vmatprep.subr.bf16.mxu0 %v1345_v19  ;;  %3138 = vmatprep.subr.bf16.mxu1 %v1347_v20  ;;  %v1419_v19 = vunpack.c.h.s8.bf16 %v627_v10  ;;  %v633_v20 = vld [vmem:[%s4279_s27 + $0x8e8] sm:$0xff] }
 0x375   : >> { %2811 = vmatpush1.bf16.msra.mxu0 %v1344_v24  ;;  %3139 = vmatpush1.bf16.msra.mxu1 %v1346_v52  ;;  %v1418_v24 = vunpack.c.h.s8.bf16 %v626_v16  ;;  %v1425_v52 = vunpack.c.l.s8.bf16 %v633_v20 }
 0x376   : >> { %2812 = vmatprep.subr.bf16.mxu0 %v1353_v23  ;;  %3140 = vmatprep.subr.bf16.mxu1 %v1355_v25  ;;  %v1427_v23 = vunpack.c.l.s8.bf16 %v635_v21  ;;  %v632_v25 = vld [vmem:[%s4279_s27 + $0x8e0] sm:$0xff] }
 0x377   : >> { %v1424_v28 = vunpack.c.l.s8.bf16 %v632_v25  ;;  %v1432_v35 = vunpack.c.h.s8.bf16 %v632_v25  ;;  %v675_v25 = vld [vmem:[%s4279_s27 + $0xa38] sm:$0xff] }
 0x379   : >> { %2813 = vmatpush1.bf16.msra.mxu0 %v1352_v29  ;;  %3141 = vmatpush1.bf16.msra.mxu1 %v1354_v30  ;;  %v1426_v29 = vunpack.c.l.s8.bf16 %v634_v37  ;;  %v1433_v30 = vunpack.c.h.s8.bf16 %v633_v20  ;;  %v666_v20 = vld [vmem:[%s4279_s27 + $0x9f0] sm:$0xff] }
 0x37a   : >> { %2814 = vmatprep.subr.bf16.mxu0 %v1361_v31  ;;  %3142 = vmatprep.subr.bf16.mxu1 %v1363_v33  ;;  %v1435_v31 = vunpack.c.h.s8.bf16 %v635_v21  ;;  %v641_v33 = vld [vmem:[%s4279_s27 + $0x928] sm:$0xff] }
 0x37d   : >> { %2815 = vmatpush1.bf16.msra.mxu0 %v1360_v38  ;;  %3143 = vmatpush1.bf16.msra.mxu1 %v1362_v39  ;;  %v1434_v38 = vunpack.c.h.s8.bf16 %v634_v37  ;;  %v1441_v39 = vunpack.c.l.s8.bf16 %v641_v33 }
 0x37e   : >> { %2816 = vmatprep.subr.bf16.mxu0 %v1369_v40  ;;  %3144 = vmatprep.subr.bf16.mxu1 %v1371_v43  ;;  %v1443_v40 = vunpack.c.l.s8.bf16 %v643_v34  ;;  %v640_v43 = vld [vmem:[%s4279_s27 + $0x920] sm:$0xff] }
 0x37f   : >> { %v1440_v45 = vunpack.c.l.s8.bf16 %v640_v43  ;;  %v1448_v51 = vunpack.c.h.s8.bf16 %v640_v43  ;;  %v683_v43 = vld [vmem:[%s4279_s27 + $0xa78] sm:$0xff] }
 0x381   : >> { %2817 = vmatpush1.bf16.msra.mxu0 %v1368_v46  ;;  %3145 = vmatpush1.bf16.msra.mxu1 %v1370_v47  ;;  %v1442_v46 = vunpack.c.l.s8.bf16 %v642_v44  ;;  %v1449_v47 = vunpack.c.h.s8.bf16 %v641_v33  ;;  %v674_v33 = vld [vmem:[%s4279_s27 + $0xa30] sm:$0xff] }
 0x382   : >> { %2827 = vmatprep.subr.bf16.mxu0 %v1377_v48  ;;  %3155 = vmatprep.subr.bf16.mxu1 %v1379_v50  ;;  %v1451_v48 = vunpack.c.h.s8.bf16 %v643_v34  ;;  %v649_v50 = vld [vmem:[%s4279_s27 + $0x968] sm:$0xff] }
 0x384   : >> { %2819 = vmatmul.mubr.bf16.vlgmr.msra.gmra.mrb[4].mxu0 %v4492_v4  ;;  %3147 = vmatmul.mubr.bf16.vlgmr.msra.gmra.mrb[4].mxu1 %v4492_v4  ;;  %v1394_v4 = vunpack.c.l.s8.bf16 %v618_v49 }
 0x385   : >> { %2828 = vmatpush1.bf16.msra.mxu0 %v1376_v55  ;;  %3156 = vmatpush1.bf16.msra.mxu1 %v1378_v56  ;;  %v1450_v55 = vunpack.c.h.s8.bf16 %v642_v44  ;;  %v1457_v56 = vunpack.c.l.s8.bf16 %v649_v50 }
 0x386   : >> { %2829 = vmatprep.subr.bf16.mxu0 %v1385_v57  ;;  %3157 = vmatprep.subr.bf16.mxu1 %v1387_v58  ;;  %v1459_v57 = vunpack.c.l.s8.bf16 %v651_v53  ;;  %v648_v58 = vld [vmem:[%s4279_s27 + $0x960] sm:$0xff] }
 0x387   : >> { %2859 = vmatprep.mubr.bf16.mxu0 %v4497_v11  ;;  %3187 = vmatprep.mubr.bf16.mxu1 %v4497_v11  ;;  %v1409_v11 = vunpack.c.l.s8.bf16 %v625_v32  ;;  %v1456_v15 = vunpack.c.l.s8.bf16 %v648_v58  ;;  %v1464_v49 = vunpack.c.h.s8.bf16 %v648_v58  ;;  %v658_v32 = vld [vmem:[%s4279_s27 + $0x9b0] sm:$0xff] }
 0x389   : >> { %2830 = vmatpush1.bf16.msra.mxu0 %v1384_v1  ;;  %3158 = vmatpush1.bf16.msra.mxu1 %v1386_v2  ;;  %v1458_v1 = vunpack.c.l.s8.bf16 %v650_v0  ;;  %v1465_v2 = vunpack.c.h.s8.bf16 %v649_v50  ;;  %v682_v50 = vld [vmem:[%s4279_s27 + $0xa70] sm:$0xff] }
 0x38a   : >> { %2831 = vmatprep.subr.bf16.mxu0 %v1393_v3  ;;  %3159 = vmatprep.subr.bf16.mxu1 %v1395_v60  ;;  %v1467_v3 = vunpack.c.h.s8.bf16 %v651_v53  ;;  %v657_v60 = vld [vmem:[%s4279_s27 + $0x9a8] sm:$0xff] }
 0x38d   : >> { %2832 = vmatpush1.bf16.msra.mxu0 %v1392_v22  ;;  %3160 = vmatpush1.bf16.msra.mxu1 %v1394_v4  ;;  %v1466_v22 = vunpack.c.h.s8.bf16 %v650_v0  ;;  %v1473_v4 = vunpack.c.l.s8.bf16 %v657_v60  ;;  %v1530_v0 = vunpack.c.h.s8.bf16 %v682_v50 }
 0x38e   : >> { %2833 = vmatprep.subr.bf16.mxu0 %v1401_v8  ;;  %3161 = vmatprep.subr.bf16.mxu1 %v1403_v9  ;;  %v1475_v8 = vunpack.c.l.s8.bf16 %v659_v36  ;;  %v656_v9 = vld [vmem:[%s4279_s27 + $0x9a0] sm:$0xff] }
 0x38f   : >> { %v1472_v10 = vunpack.c.l.s8.bf16 %v656_v9  ;;  %v1480_v16 = vunpack.c.h.s8.bf16 %v656_v9 }
 0x391   : >> { %2834 = vmatpush1.bf16.msra.mxu0 %v1400_v12  ;;  %3162 = vmatpush1.bf16.msra.mxu1 %v1402_v13  ;;  %v1474_v12 = vunpack.c.l.s8.bf16 %v658_v32  ;;  %v1481_v13 = vunpack.c.h.s8.bf16 %v657_v60 }
 0x392   : >> { %2835 = vmatprep.subr.bf16.mxu0 %v1409_v11  ;;  %3163 = vmatprep.subr.bf16.mxu1 %v1411_v14  ;;  %v1483_v11 = vunpack.c.h.s8.bf16 %v659_v36  ;;  %v665_v14 = vld [vmem:[%s4279_s27 + $0x9e8] sm:$0xff] }
 0x395   : >> { %2836 = vmatpush1.bf16.msra.mxu0 %v1408_v41  ;;  %3164 = vmatpush1.bf16.msra.mxu1 %v1410_v17  ;;  %v1482_v41 = vunpack.c.h.s8.bf16 %v658_v32  ;;  %v1489_v17 = vunpack.c.l.s8.bf16 %v665_v14 }
 0x396   : >> { %2837 = vmatprep.subr.bf16.mxu0 %v1417_v18  ;;  %3165 = vmatprep.subr.bf16.mxu1 %v1419_v19  ;;  %v1491_v18 = vunpack.c.l.s8.bf16 %v667_v54  ;;  %v664_v19 = vld [vmem:[%s4279_s27 + $0x9e0] sm:$0xff] }
 0x397   : >> { %v1488_v21 = vunpack.c.l.s8.bf16 %v664_v19  ;;  %v1496_v37 = vunpack.c.h.s8.bf16 %v664_v19 }
 0x399   : >> { %2838 = vmatpush1.bf16.msra.mxu0 %v1416_v61  ;;  %3166 = vmatpush1.bf16.msra.mxu1 %v1418_v24  ;;  %v1490_v61 = vunpack.c.l.s8.bf16 %v666_v20  ;;  %v1497_v24 = vunpack.c.h.s8.bf16 %v665_v14 }
 0x39a   : >> { %2839 = vmatprep.subr.bf16.mxu0 %v1425_v52  ;;  %3167 = vmatprep.subr.bf16.mxu1 %v1427_v23  ;;  %v1499_v52 = vunpack.c.h.s8.bf16 %v667_v54  ;;  %v673_v23 = vld [vmem:[%s4279_s27 + $0xa28] sm:$0xff] }
 0x39d   : >> { %2840 = vmatpush1.bf16.msra.mxu0 %v1424_v28  ;;  %3168 = vmatpush1.bf16.msra.mxu1 %v1426_v29  ;;  %v1498_v28 = vunpack.c.h.s8.bf16 %v666_v20  ;;  %v1505_v29 = vunpack.c.l.s8.bf16 %v673_v23 }
 0x39e   : >> { %2841 = vmatprep.subr.bf16.mxu0 %v1433_v30  ;;  %3169 = vmatprep.subr.bf16.mxu1 %v1435_v31  ;;  %v1507_v30 = vunpack.c.l.s8.bf16 %v675_v25  ;;  %v672_v31 = vld [vmem:[%s4279_s27 + $0xa20] sm:$0xff] }
 0x39f   : >> { %v1504_v34 = vunpack.c.l.s8.bf16 %v672_v31  ;;  %v1512_v44 = vunpack.c.h.s8.bf16 %v672_v31 }
 0x3a1   : >> { %2842 = vmatpush1.bf16.msra.mxu0 %v1432_v35  ;;  %3170 = vmatpush1.bf16.msra.mxu1 %v1434_v38  ;;  %v1506_v35 = vunpack.c.l.s8.bf16 %v674_v33  ;;  %v1513_v38 = vunpack.c.h.s8.bf16 %v673_v23 }
 0x3a2   : >> { %2843 = vmatprep.subr.bf16.mxu0 %v1441_v39  ;;  %3171 = vmatprep.subr.bf16.mxu1 %v1443_v40  ;;  %v1515_v39 = vunpack.c.h.s8.bf16 %v675_v25  ;;  %v681_v40 = vld [vmem:[%s4279_s27 + $0xa68] sm:$0xff] }
 0x3a5   : >> { %2844 = vmatpush1.bf16.msra.mxu0 %v1440_v45  ;;  %3172 = vmatpush1.bf16.msra.mxu1 %v1442_v46  ;;  %v1514_v45 = vunpack.c.h.s8.bf16 %v674_v33  ;;  %v1521_v46 = vunpack.c.l.s8.bf16 %v681_v40 }
 0x3a6   : >> { %2845 = vmatprep.subr.bf16.mxu0 %v1449_v47  ;;  %3173 = vmatprep.subr.bf16.mxu1 %v1451_v48  ;;  %v1523_v47 = vunpack.c.l.s8.bf16 %v683_v43  ;;  %v680_v48 = vld [vmem:[%s4279_s27 + $0xa60] sm:$0xff] }
 0x3a7   : >> { %v1520_v53 = vunpack.c.l.s8.bf16 %v680_v48  ;;  %v1528_v58 = vunpack.c.h.s8.bf16 %v680_v48 }
 0x3a9   : >> { %2846 = vmatpush1.bf16.msra.mxu0 %v1448_v51  ;;  %3174 = vmatpush1.bf16.msra.mxu1 %v1450_v55  ;;  %v1529_v51 = vunpack.c.h.s8.bf16 %v681_v40  ;;  %v1531_v55 = vunpack.c.h.s8.bf16 %v683_v43 }
 0x3aa   : >> { %2847 = vmatprep.subr.bf16.mxu0 %v1457_v56  ;;  %3175 = vmatprep.subr.bf16.mxu1 %v1459_v57  ;;  %v689_v56 = vld [vmem:[%s4279_s27 + $0xaa8] sm:$0xff]  ;;  %v691_v57 = vld [vmem:[%s4279_s27 + $0xab8] sm:$0xff] }
 0x3ab   : >> { %v1545_v36 = vunpack.c.h.s8.bf16 %v689_v56 }
 0x3ad   : >> { %2848 = vmatpush1.bf16.msra.mxu0 %v1456_v15  ;;  %3176 = vmatpush1.bf16.msra.mxu1 %v1458_v1  ;;  %v1539_v15 = vunpack.c.l.s8.bf16 %v691_v57  ;;  %v688_v1 = vld [vmem:[%s4279_s27 + $0xaa0] sm:$0xff] }
 0x3ae   : >> { %2849 = vmatprep.subr.bf16.mxu0 %v1465_v2  ;;  %3177 = vmatprep.subr.bf16.mxu1 %v1467_v3  ;;  %v690_v2 = vld [vmem:[%s4279_s27 + $0xab0] sm:$0xff]  ;;  %v1536_v3 = vunpack.c.l.s8.bf16 %v688_v1 }
 0x3af   : >> { %v1538_v60 = vunpack.c.l.s8.bf16 %v690_v2  ;;  %v1546_v9 = vunpack.c.h.s8.bf16 %v690_v2 }
 0x3b1   : >> { %2850 = vmatpush1.bf16.msra.mxu0 %v1464_v49  ;;  %3178 = vmatpush1.bf16.msra.mxu1 %v1466_v22  ;;  %v1547_v49 = vunpack.c.h.s8.bf16 %v691_v57  ;;  %v697_v22 = vld [vmem:[%s4279_s27 + $0xae8] sm:$0xff] }
 0x3b2   : >> { %2851 = vmatprep.subr.bf16.mxu0 %v1473_v4  ;;  %3179 = vmatprep.subr.bf16.mxu1 %v1475_v8  ;;  %v699_v4 = vld [vmem:[%s4279_s27 + $0xaf8] sm:$0xff]  ;;  %v1544_v8 = vunpack.c.h.s8.bf16 %v688_v1  ;;  %v1553_v32 = vunpack.c.l.s8.bf16 %v697_v22  ;;  %v1561_v54 = vunpack.c.h.s8.bf16 %v697_v22 }
 0x3b5   : >> { %2852 = vmatpush1.bf16.msra.mxu0 %v1472_v10  ;;  %3180 = vmatpush1.bf16.msra.mxu1 %v1474_v12  ;;  %v1555_v10 = vunpack.c.l.s8.bf16 %v699_v4  ;;  %v696_v12 = vld [vmem:[%s4279_s27 + $0xae0] sm:$0xff] }
 0x3b6   : >> { %2853 = vmatprep.subr.bf16.mxu0 %v1481_v13  ;;  %3181 = vmatprep.subr.bf16.mxu1 %v1483_v11  ;;  %v698_v13 = vld [vmem:[%s4279_s27 + $0xaf0] sm:$0xff]  ;;  %v1552_v11 = vunpack.c.l.s8.bf16 %v696_v12 }
 0x3b7   : >> { %v1554_v14 = vunpack.c.l.s8.bf16 %v698_v13  ;;  %v1562_v19 = vunpack.c.h.s8.bf16 %v698_v13 }
 0x3b9   : >> { %2854 = vmatpush1.bf16.msra.mxu0 %v1480_v16  ;;  %3182 = vmatpush1.bf16.msra.mxu1 %v1482_v41  ;;  %v1563_v16 = vunpack.c.h.s8.bf16 %v699_v4  ;;  %v705_v41 = vld [vmem:[%s4279_s27 + $0xb28] sm:$0xff] }
 0x3ba   : >> { %2855 = vmatprep.subr.bf16.mxu0 %v1489_v17  ;;  %3183 = vmatprep.subr.bf16.mxu1 %v1491_v18  ;;  %v707_v17 = vld [vmem:[%s4279_s27 + $0xb38] sm:$0xff]  ;;  %v1560_v18 = vunpack.c.h.s8.bf16 %v696_v12  ;;  %v1569_v20 = vunpack.c.l.s8.bf16 %v705_v41  ;;  %v1577_v25 = vunpack.c.h.s8.bf16 %v705_v41 }
 0x3bd   : >> { %2856 = vmatpush1.bf16.msra.mxu0 %v1488_v21  ;;  %3184 = vmatpush1.bf16.msra.mxu1 %v1490_v61  ;;  %v1571_v21 = vunpack.c.l.s8.bf16 %v707_v17  ;;  %v704_v61 = vld [vmem:[%s4279_s27 + $0xb20] sm:$0xff] }
 0x3be   : >> { %2857 = vmatprep.subr.bf16.mxu0 %v1497_v24  ;;  %3185 = vmatprep.subr.bf16.mxu1 %v1499_v52  ;;  %v706_v24 = vld [vmem:[%s4279_s27 + $0xb30] sm:$0xff]  ;;  %v1568_v52 = vunpack.c.l.s8.bf16 %v704_v61 }
 0x3bf   : >> { %v1570_v23 = vunpack.c.l.s8.bf16 %v706_v24  ;;  %v1578_v31 = vunpack.c.h.s8.bf16 %v706_v24 }
 0x3c1   : >> { %2858 = vmatpush1.bf16.msra.mxu0 %v1496_v37  ;;  %3186 = vmatpush1.bf16.msra.mxu1 %v1498_v28  ;;  %v1579_v37 = vunpack.c.h.s8.bf16 %v707_v17  ;;  %v713_v28 = vld [vmem:[%s4279_s27 + $0xb68] sm:$0xff] }
 0x3c2   : >> { %2868 = vmatprep.subr.bf16.mxu0 %v1505_v29  ;;  %3196 = vmatprep.subr.bf16.mxu1 %v1507_v30  ;;  %v715_v29 = vld [vmem:[%s4279_s27 + $0xb78] sm:$0xff]  ;;  %v1576_v30 = vunpack.c.h.s8.bf16 %v704_v61  ;;  %v1585_v33 = vunpack.c.l.s8.bf16 %v713_v28  ;;  %v1593_v43 = vunpack.c.h.s8.bf16 %v713_v28 }
 0x3c4   : >> { %2860 = vmatmul.mubr.bf16.vlgmr.msra.gmra.mrb[4].mxu0 %v4535_v62  ;;  %3188 = vmatmul.mubr.bf16.vlgmr.msra.gmra.mrb[4].mxu1 %v4535_v62  ;;  %v1522_v62 = vunpack.c.l.s8.bf16 %v682_v50 }
 0x3c5   : >> { %2869 = vmatpush1.bf16.msra.mxu0 %v1504_v34  ;;  %3197 = vmatpush1.bf16.msra.mxu1 %v1506_v35  ;;  %v1587_v34 = vunpack.c.l.s8.bf16 %v715_v29  ;;  %v712_v35 = vld [vmem:[%s4279_s27 + $0xb60] sm:$0xff] }
 0x3c6   : >> { %2870 = vmatprep.subr.bf16.mxu0 %v1513_v38  ;;  %3198 = vmatprep.subr.bf16.mxu1 %v1515_v39  ;;  %v714_v38 = vld [vmem:[%s4279_s27 + $0xb70] sm:$0xff]  ;;  %v1584_v39 = vunpack.c.l.s8.bf16 %v712_v35 }
 0x3c7   : >> { %2900 = vmatprep.mubr.bf16.mxu0 %v4541_v6  ;;  %3228 = vmatprep.mubr.bf16.mxu1 %v4541_v6  ;;  %v1537_v6 = vunpack.c.l.s8.bf16 %v689_v56  ;;  %v1586_v40 = vunpack.c.l.s8.bf16 %v714_v38  ;;  %v1594_v48 = vunpack.c.h.s8.bf16 %v714_v38  ;;  %v752_v38 = vld [vmem:[%s4279_s27 + $0xca0] sm:$0xff] }
 0x3c9   : >> { %2871 = vmatpush1.bf16.msra.mxu0 %v1512_v44  ;;  %3199 = vmatpush1.bf16.msra.mxu1 %v1514_v45  ;;  %v1595_v44 = vunpack.c.h.s8.bf16 %v715_v29  ;;  %v721_v45 = vld [vmem:[%s4279_s27 + $0xba8] sm:$0xff] }
 0x3ca   : >> { %2872 = vmatprep.subr.bf16.mxu0 %v1521_v46  ;;  %3200 = vmatprep.subr.bf16.mxu1 %v1523_v47  ;;  %v723_v46 = vld [vmem:[%s4279_s27 + $0xbb8] sm:$0xff]  ;;  %v1592_v47 = vunpack.c.h.s8.bf16 %v712_v35  ;;  %v1601_v50 = vunpack.c.l.s8.bf16 %v721_v45  ;;  %v1609_v57 = vunpack.c.h.s8.bf16 %v721_v45 }
 0x3cd   : >> { %2873 = vmatpush1.bf16.msra.mxu0 %v1520_v53  ;;  %3201 = vmatpush1.bf16.msra.mxu1 %v1522_v62  ;;  %v1603_v53 = vunpack.c.l.s8.bf16 %v723_v46  ;;  %v720_v62 = vld [vmem:[%s4279_s27 + $0xba0] sm:$0xff] }
 0x3ce   : >> { %2874 = vmatprep.subr.bf16.mxu0 %v1529_v51  ;;  %3202 = vmatprep.subr.bf16.mxu1 %v1531_v55  ;;  %v722_v51 = vld [vmem:[%s4279_s27 + $0xbb0] sm:$0xff]  ;;  %v1600_v55 = vunpack.c.l.s8.bf16 %v720_v62 }
 0x3cf   : >> { %v1602_v56 = vunpack.c.l.s8.bf16 %v722_v51  ;;  %v1610_v1 = vunpack.c.h.s8.bf16 %v722_v51  ;;  %v760_v51 = vld [vmem:[%s4279_s27 + $0xce0] sm:$0xff] }
 0x3d1   : >> { %2875 = vmatpush1.bf16.msra.mxu0 %v1528_v58  ;;  %3203 = vmatpush1.bf16.msra.mxu1 %v1530_v0  ;;  %v1611_v58 = vunpack.c.h.s8.bf16 %v723_v46  ;;  %v729_v0 = vld [vmem:[%s4279_s27 + $0xbe8] sm:$0xff] }
 0x3d2   : >> { %2876 = vmatprep.subr.bf16.mxu0 %v1537_v6  ;;  %3204 = vmatprep.subr.bf16.mxu1 %v1539_v15  ;;  %v731_v6 = vld [vmem:[%s4279_s27 + $0xbf8] sm:$0xff]  ;;  %v1608_v15 = vunpack.c.h.s8.bf16 %v720_v62  ;;  %v1617_v2 = vunpack.c.l.s8.bf16 %v729_v0  ;;  %v1625_v4 = vunpack.c.h.s8.bf16 %v729_v0  ;;  %v761_v46 = vld [vmem:[%s4279_s27 + $0xce8] sm:$0xff] }
 0x3d5   : >> { %2877 = vmatpush1.bf16.msra.mxu0 %v1536_v3  ;;  %3205 = vmatpush1.bf16.msra.mxu1 %v1538_v60  ;;  %v1619_v3 = vunpack.c.l.s8.bf16 %v731_v6  ;;  %v728_v60 = vld [vmem:[%s4279_s27 + $0xbe0] sm:$0xff] }
 0x3d6   : >> { %2878 = vmatprep.subr.bf16.mxu0 %v1545_v36  ;;  %3206 = vmatprep.subr.bf16.mxu1 %v1547_v49  ;;  %v730_v36 = vld [vmem:[%s4279_s27 + $0xbf0] sm:$0xff]  ;;  %v1616_v49 = vunpack.c.l.s8.bf16 %v728_v60 }
 0x3d7   : >> { %v1618_v22 = vunpack.c.l.s8.bf16 %v730_v36  ;;  %v1626_v12 = vunpack.c.h.s8.bf16 %v730_v36  ;;  %v768_v36 = vld [vmem:[%s4279_s27 + $0xd20] sm:$0xff] }
 0x3d9   : >> { %2879 = vmatpush1.bf16.msra.mxu0 %v1544_v8  ;;  %3207 = vmatpush1.bf16.msra.mxu1 %v1546_v9  ;;  %v1627_v8 = vunpack.c.h.s8.bf16 %v731_v6  ;;  %v737_v9 = vld [vmem:[%s4279_s27 + $0xc28] sm:$0xff] }
 0x3da   : >> { %2880 = vmatprep.subr.bf16.mxu0 %v1553_v32  ;;  %3208 = vmatprep.subr.bf16.mxu1 %v1555_v10  ;;  %v739_v32 = vld [vmem:[%s4279_s27 + $0xc38] sm:$0xff]  ;;  %v1624_v10 = vunpack.c.h.s8.bf16 %v728_v60  ;;  %v1633_v13 = vunpack.c.l.s8.bf16 %v737_v9  ;;  %v1641_v17 = vunpack.c.h.s8.bf16 %v737_v9  ;;  %v769_v6 = vld [vmem:[%s4279_s27 + $0xd28] sm:$0xff] }
 0x3dd   : >> { %2881 = vmatpush1.bf16.msra.mxu0 %v1552_v11  ;;  %3209 = vmatpush1.bf16.msra.mxu1 %v1554_v14  ;;  %v1635_v11 = vunpack.c.l.s8.bf16 %v739_v32  ;;  %v736_v14 = vld [vmem:[%s4279_s27 + $0xc20] sm:$0xff] }
 0x3de   : >> { %2882 = vmatprep.subr.bf16.mxu0 %v1561_v54  ;;  %3210 = vmatprep.subr.bf16.mxu1 %v1563_v16  ;;  %v738_v54 = vld [vmem:[%s4279_s27 + $0xc30] sm:$0xff]  ;;  %v1632_v16 = vunpack.c.l.s8.bf16 %v736_v14 }
 0x3df   : >> { %v1634_v41 = vunpack.c.l.s8.bf16 %v738_v54  ;;  %v1642_v61 = vunpack.c.h.s8.bf16 %v738_v54  ;;  %v776_v54 = vld [vmem:[%s4279_s27 + $0xd60] sm:$0xff] }
 0x3e1   : >> { %2883 = vmatpush1.bf16.msra.mxu0 %v1560_v18  ;;  %3211 = vmatpush1.bf16.msra.mxu1 %v1562_v19  ;;  %v1643_v18 = vunpack.c.h.s8.bf16 %v739_v32  ;;  %v745_v19 = vld [vmem:[%s4279_s27 + $0xc68] sm:$0xff] }
 0x3e2   : >> { %2884 = vmatprep.subr.bf16.mxu0 %v1569_v20  ;;  %3212 = vmatprep.subr.bf16.mxu1 %v1571_v21  ;;  %v747_v20 = vld [vmem:[%s4279_s27 + $0xc78] sm:$0xff]  ;;  %v1640_v21 = vunpack.c.h.s8.bf16 %v736_v14  ;;  %v1649_v24 = vunpack.c.l.s8.bf16 %v745_v19  ;;  %v1657_v28 = vunpack.c.h.s8.bf16 %v745_v19  ;;  %v777_v32 = vld [vmem:[%s4279_s27 + $0xd68] sm:$0xff] }
 0x3e3   : >> { %v1659_v29 = vunpack.c.h.s8.bf16 %v747_v20 }
 0x3e5   : >> { %2885 = vmatpush1.bf16.msra.mxu0 %v1568_v52  ;;  %3213 = vmatpush1.bf16.msra.mxu1 %v1570_v23  ;;  %v1651_v52 = vunpack.c.l.s8.bf16 %v747_v20  ;;  %v744_v23 = vld [vmem:[%s4279_s27 + $0xc60] sm:$0xff]  ;;  %v785_v20 = vld [vmem:[%s4279_s27 + $0xda8] sm:$0xff] }
 0x3e6   : >> { %2886 = vmatprep.subr.bf16.mxu0 %v1577_v25  ;;  %3214 = vmatprep.subr.bf16.mxu1 %v1579_v37  ;;  %v746_v25 = vld [vmem:[%s4279_s27 + $0xc70] sm:$0xff]  ;;  %v1648_v37 = vunpack.c.l.s8.bf16 %v744_v23 }
 0x3e9   : >> { %2887 = vmatpush1.bf16.msra.mxu0 %v1576_v30  ;;  %3215 = vmatpush1.bf16.msra.mxu1 %v1578_v31  ;;  %v753_v30 = vld [vmem:[%s4279_s27 + $0xca8] sm:$0xff]  ;;  %v755_v31 = vld [vmem:[%s4279_s27 + $0xcb8] sm:$0xff] }
 0x3ea   : >> { %2888 = vmatprep.subr.bf16.mxu0 %v1585_v33  ;;  %3216 = vmatprep.subr.bf16.mxu1 %v1587_v34  ;;  %v1656_v33 = vunpack.c.h.s8.bf16 %v744_v23  ;;  %v1658_v34 = vunpack.c.h.s8.bf16 %v746_v25  ;;  %v1667_v35 = vunpack.c.l.s8.bf16 %v755_v31  ;;  %v1675_v45 = vunpack.c.h.s8.bf16 %v755_v31  ;;  %v793_v31 = vld [vmem:[%s4279_s27 + $0xde8] sm:$0xff] }
 0x3ed   : >> { %2889 = vmatpush1.bf16.msra.mxu0 %v1584_v39  ;;  %3217 = vmatpush1.bf16.msra.mxu1 %v1586_v40  ;;  %v754_v39 = vld [vmem:[%s4279_s27 + $0xcb0] sm:$0xff]  ;;  %v1664_v40 = vunpack.c.l.s8.bf16 %v752_v38 }
 0x3ee   : >> { %2890 = vmatprep.subr.bf16.mxu0 %v1593_v43  ;;  %3218 = vmatprep.subr.bf16.mxu1 %v1595_v44  ;;  %v1666_v43 = vunpack.c.l.s8.bf16 %v754_v39  ;;  %v1673_v44 = vunpack.c.h.s8.bf16 %v753_v30 }
 0x3f1   : >> { %2891 = vmatpush1.bf16.msra.mxu0 %v1592_v47  ;;  %3219 = vmatpush1.bf16.msra.mxu1 %v1594_v48  ;;  %v763_v47 = vld [vmem:[%s4279_s27 + $0xcf8] sm:$0xff]  ;;  %v1672_v48 = vunpack.c.h.s8.bf16 %v752_v38 }
 0x3f2   : >> { %2892 = vmatprep.subr.bf16.mxu0 %v1601_v50  ;;  %3220 = vmatprep.subr.bf16.mxu1 %v1603_v53  ;;  %v1674_v50 = vunpack.c.h.s8.bf16 %v754_v39  ;;  %v1681_v53 = vunpack.c.l.s8.bf16 %v761_v46  ;;  %v1683_v62 = vunpack.c.l.s8.bf16 %v763_v47  ;;  %v1691_v0 = vunpack.c.h.s8.bf16 %v763_v47  ;;  %v792_v39 = vld [vmem:[%s4279_s27 + $0xde0] sm:$0xff]  ;;  %v801_v47 = vld [vmem:[%s4279_s27 + $0xe28] sm:$0xff] }
 0x3f5   : >> { %2893 = vmatpush1.bf16.msra.mxu0 %v1600_v55  ;;  %3221 = vmatpush1.bf16.msra.mxu1 %v1602_v56  ;;  %v762_v55 = vld [vmem:[%s4279_s27 + $0xcf0] sm:$0xff]  ;;  %v1680_v56 = vunpack.c.l.s8.bf16 %v760_v51 }
 0x3f6   : >> { %2894 = vmatprep.subr.bf16.mxu0 %v1609_v57  ;;  %3222 = vmatprep.subr.bf16.mxu1 %v1611_v58  ;;  %v1682_v57 = vunpack.c.l.s8.bf16 %v762_v55  ;;  %v1689_v58 = vunpack.c.h.s8.bf16 %v761_v46 }
 0x3f9   : >> { %2895 = vmatpush1.bf16.msra.mxu0 %v1608_v15  ;;  %3223 = vmatpush1.bf16.msra.mxu1 %v1610_v1  ;;  %v771_v15 = vld [vmem:[%s4279_s27 + $0xd38] sm:$0xff]  ;;  %v1688_v1 = vunpack.c.h.s8.bf16 %v760_v51 }
 0x3fa   : >> { %2896 = vmatprep.subr.bf16.mxu0 %v1617_v2  ;;  %3224 = vmatprep.subr.bf16.mxu1 %v1619_v3  ;;  %v1690_v2 = vunpack.c.h.s8.bf16 %v762_v55  ;;  %v1697_v3 = vunpack.c.l.s8.bf16 %v769_v6  ;;  %v1699_v60 = vunpack.c.l.s8.bf16 %v771_v15  ;;  %v1707_v9 = vunpack.c.h.s8.bf16 %v771_v15  ;;  %v800_v55 = vld [vmem:[%s4279_s27 + $0xe20] sm:$0xff]  ;;  %v809_v15 = vld [vmem:[%s4279_s27 + $0xe68] sm:$0xff] }
 0x3fd   : >> { %2897 = vmatpush1.bf16.msra.mxu0 %v1616_v49  ;;  %3225 = vmatpush1.bf16.msra.mxu1 %v1618_v22  ;;  %v770_v49 = vld [vmem:[%s4279_s27 + $0xd30] sm:$0xff]  ;;  %v1696_v22 = vunpack.c.l.s8.bf16 %v768_v36 }
 0x3fe   : >> { %2898 = vmatprep.subr.bf16.mxu0 %v1625_v4  ;;  %3226 = vmatprep.subr.bf16.mxu1 %v1627_v8  ;;  %v1698_v4 = vunpack.c.l.s8.bf16 %v770_v49  ;;  %v1705_v8 = vunpack.c.h.s8.bf16 %v769_v6 }
 0x401   : >> { %2899 = vmatpush1.bf16.msra.mxu0 %v1624_v10  ;;  %3227 = vmatpush1.bf16.msra.mxu1 %v1626_v12  ;;  %v779_v10 = vld [vmem:[%s4279_s27 + $0xd78] sm:$0xff]  ;;  %v1704_v12 = vunpack.c.h.s8.bf16 %v768_v36 }
 0x402   : >> { %2909 = vmatprep.subr.bf16.mxu0 %v1633_v13  ;;  %3237 = vmatprep.subr.bf16.mxu1 %v1635_v11  ;;  %v1706_v13 = vunpack.c.h.s8.bf16 %v770_v49  ;;  %v1713_v11 = vunpack.c.l.s8.bf16 %v777_v32  ;;  %v1715_v14 = vunpack.c.l.s8.bf16 %v779_v10  ;;  %v1723_v19 = vunpack.c.h.s8.bf16 %v779_v10  ;;  %v808_v49 = vld [vmem:[%s4279_s27 + $0xe60] sm:$0xff]  ;;  %v819_v10 = vld [vmem:[%s4279_s27 + $0xeb8] sm:$0xff] }
 0x404   : >> { %2901 = vmatmul.mubr.bf16.vlgmr.msra.gmra.mrb[4].mxu0 %v4586_v59  ;;  %3229 = vmatmul.mubr.bf16.vlgmr.msra.gmra.mrb[4].mxu1 %v4586_v59  ;;  %v1650_v59 = vunpack.c.l.s8.bf16 %v746_v25  ;;  %v784_v25 = vld [vmem:[%s4279_s27 + $0xda0] sm:$0xff] }
 0x405   : >> { %2910 = vmatpush1.bf16.msra.mxu0 %v1632_v16  ;;  %3238 = vmatpush1.bf16.msra.mxu1 %v1634_v41  ;;  %v778_v16 = vld [vmem:[%s4279_s27 + $0xd70] sm:$0xff]  ;;  %v1712_v41 = vunpack.c.l.s8.bf16 %v776_v54 }
 0x406   : >> { %2911 = vmatprep.subr.bf16.mxu0 %v1641_v17  ;;  %3239 = vmatprep.subr.bf16.mxu1 %v1643_v18  ;;  %v1714_v17 = vunpack.c.l.s8.bf16 %v778_v16  ;;  %v1721_v18 = vunpack.c.h.s8.bf16 %v777_v32  ;;  %v817_v32 = vld [vmem:[%s4279_s27 + $0xea8] sm:$0xff] }
 0x407   : >> { %2941 = vmatprep.mubr.bf16.mxu0 %v4591_v5  ;;  %3269 = vmatprep.mubr.bf16.mxu1 %v4591_v5  ;;  %v1665_v5 = vunpack.c.l.s8.bf16 %v753_v30 }
 0x409   : >> { %2912 = vmatpush1.bf16.msra.mxu0 %v1640_v21  ;;  %3240 = vmatpush1.bf16.msra.mxu1 %v1642_v61  ;;  %v787_v21 = vld [vmem:[%s4279_s27 + $0xdb8] sm:$0xff]  ;;  %v1720_v61 = vunpack.c.h.s8.bf16 %v776_v54  ;;  %v818_v54 = vld [vmem:[%s4279_s27 + $0xeb0] sm:$0xff] }
 0x40a   : >> { %2913 = vmatprep.subr.bf16.mxu0 %v1649_v24  ;;  %3241 = vmatprep.subr.bf16.mxu1 %v1651_v52  ;;  %v1722_v24 = vunpack.c.h.s8.bf16 %v778_v16  ;;  %v1729_v52 = vunpack.c.l.s8.bf16 %v785_v20  ;;  %v1731_v23 = vunpack.c.l.s8.bf16 %v787_v21  ;;  %v1739_v30 = vunpack.c.h.s8.bf16 %v787_v21 }
 0x40d   : >> { %2914 = vmatpush1.bf16.msra.mxu0 %v1648_v37  ;;  %3242 = vmatpush1.bf16.msra.mxu1 %v1650_v59  ;;  %v786_v37 = vld [vmem:[%s4279_s27 + $0xdb0] sm:$0xff]  ;;  %v1728_v59 = vunpack.c.l.s8.bf16 %v784_v25 }
 0x40e   : >> { %2915 = vmatprep.subr.bf16.mxu0 %v1657_v28  ;;  %3243 = vmatprep.subr.bf16.mxu1 %v1659_v29  ;;  %v1730_v28 = vunpack.c.l.s8.bf16 %v786_v37  ;;  %v1737_v29 = vunpack.c.h.s8.bf16 %v785_v20  ;;  %v827_v20 = vld [vmem:[%s4279_s27 + $0xef8] sm:$0xff] }
 0x411   : >> { %2916 = vmatpush1.bf16.msra.mxu0 %v1656_v33  ;;  %3244 = vmatpush1.bf16.msra.mxu1 %v1658_v34  ;;  %v795_v33 = vld [vmem:[%s4279_s27 + $0xdf8] sm:$0xff]  ;;  %v1736_v34 = vunpack.c.h.s8.bf16 %v784_v25  ;;  %v826_v25 = vld [vmem:[%s4279_s27 + $0xef0] sm:$0xff] }
 0x412   : >> { %2917 = vmatprep.subr.bf16.mxu0 %v1665_v5  ;;  %3245 = vmatprep.subr.bf16.mxu1 %v1667_v35  ;;  %v1738_v5 = vunpack.c.h.s8.bf16 %v786_v37  ;;  %v1745_v35 = vunpack.c.l.s8.bf16 %v793_v31  ;;  %v1747_v38 = vunpack.c.l.s8.bf16 %v795_v33  ;;  %v1755_v46 = vunpack.c.h.s8.bf16 %v795_v33 }
 0x415   : >> { %2918 = vmatpush1.bf16.msra.mxu0 %v1664_v40  ;;  %3246 = vmatpush1.bf16.msra.mxu1 %v1666_v43  ;;  %v794_v40 = vld [vmem:[%s4279_s27 + $0xdf0] sm:$0xff]  ;;  %v1744_v43 = vunpack.c.l.s8.bf16 %v792_v39 }
 0x416   : >> { %2919 = vmatprep.subr.bf16.mxu0 %v1673_v44  ;;  %3247 = vmatprep.subr.bf16.mxu1 %v1675_v45  ;;  %v1746_v44 = vunpack.c.l.s8.bf16 %v794_v40  ;;  %v1753_v45 = vunpack.c.h.s8.bf16 %v793_v31  ;;  %v835_v31 = vld [vmem:[%s4279_s27 + $0xf38] sm:$0xff] }
 0x419   : >> { %2920 = vmatpush1.bf16.msra.mxu0 %v1672_v48  ;;  %3248 = vmatpush1.bf16.msra.mxu1 %v1674_v50  ;;  %v803_v48 = vld [vmem:[%s4279_s27 + $0xe38] sm:$0xff]  ;;  %v1752_v50 = vunpack.c.h.s8.bf16 %v792_v39  ;;  %v834_v39 = vld [vmem:[%s4279_s27 + $0xf30] sm:$0xff] }
 0x41a   : >> { %2921 = vmatprep.subr.bf16.mxu0 %v1681_v53  ;;  %3249 = vmatprep.subr.bf16.mxu1 %v1683_v62  ;;  %v1754_v53 = vunpack.c.h.s8.bf16 %v794_v40  ;;  %v1761_v62 = vunpack.c.l.s8.bf16 %v801_v47  ;;  %v1763_v51 = vunpack.c.l.s8.bf16 %v803_v48  ;;  %v1771_v6 = vunpack.c.h.s8.bf16 %v803_v48 }
 0x41d   : >> { %2922 = vmatpush1.bf16.msra.mxu0 %v1680_v56  ;;  %3250 = vmatpush1.bf16.msra.mxu1 %v1682_v57  ;;  %v802_v56 = vld [vmem:[%s4279_s27 + $0xe30] sm:$0xff]  ;;  %v1760_v57 = vunpack.c.l.s8.bf16 %v800_v55 }
 0x41e   : >> { %2923 = vmatprep.subr.bf16.mxu0 %v1689_v58  ;;  %3251 = vmatprep.subr.bf16.mxu1 %v1691_v0  ;;  %v1762_v58 = vunpack.c.l.s8.bf16 %v802_v56  ;;  %v1769_v0 = vunpack.c.h.s8.bf16 %v801_v47  ;;  %v843_v47 = vld [vmem:[%s4279_s27 + $0xf78] sm:$0xff] }
 0x421   : >> { %2924 = vmatpush1.bf16.msra.mxu0 %v1688_v1  ;;  %3252 = vmatpush1.bf16.msra.mxu1 %v1690_v2  ;;  %v811_v1 = vld [vmem:[%s4279_s27 + $0xe78] sm:$0xff]  ;;  %v1768_v2 = vunpack.c.h.s8.bf16 %v800_v55  ;;  %v842_v55 = vld [vmem:[%s4279_s27 + $0xf70] sm:$0xff] }
 0x422   : >> { %2925 = vmatprep.subr.bf16.mxu0 %v1697_v3  ;;  %3253 = vmatprep.subr.bf16.mxu1 %v1699_v60  ;;  %v1770_v3 = vunpack.c.h.s8.bf16 %v802_v56  ;;  %v1777_v60 = vunpack.c.l.s8.bf16 %v809_v15  ;;  %v1779_v36 = vunpack.c.l.s8.bf16 %v811_v1 }
 0x425   : >> { %2926 = vmatpush1.bf16.msra.mxu0 %v1696_v22  ;;  %3254 = vmatpush1.bf16.msra.mxu1 %v1698_v4  ;;  %v810_v22 = vld [vmem:[%s4279_s27 + $0xe70] sm:$0xff]  ;;  %v1776_v4 = vunpack.c.l.s8.bf16 %v808_v49 }
 0x426   : >> { %2927 = vmatprep.subr.bf16.mxu0 %v1705_v8  ;;  %3255 = vmatprep.subr.bf16.mxu1 %v1707_v9  ;;  %v1785_v8 = vunpack.c.h.s8.bf16 %v809_v15  ;;  %v1787_v9 = vunpack.c.h.s8.bf16 %v811_v1  ;;  %v851_v15 = vld [vmem:[%s4279_s27 + $0xfb8] sm:$0xff] }
 0x429   : >> { %2928 = vmatpush1.bf16.msra.mxu0 %v1704_v12  ;;  %3256 = vmatpush1.bf16.msra.mxu1 %v1706_v13  ;;  %v1784_v12 = vunpack.c.h.s8.bf16 %v808_v49  ;;  %v1786_v13 = vunpack.c.h.s8.bf16 %v810_v22  ;;  %v850_v49 = vld [vmem:[%s4279_s27 + $0xfb0] sm:$0xff] }
 0x42a   : >> { %2929 = vmatprep.subr.bf16.mxu0 %v1713_v11  ;;  %3257 = vmatprep.subr.bf16.mxu1 %v1715_v14  ;;  %v1795_v11 = vunpack.c.l.s8.bf16 %v819_v10  ;;  %v816_v14 = vld [vmem:[%s4279_s27 + $0xea0] sm:$0xff] }
 0x42b   : >> { %v1792_v16 = vunpack.c.l.s8.bf16 %v816_v14  ;;  %v1800_v21 = vunpack.c.h.s8.bf16 %v816_v14  ;;  %v858_v14 = vld [vmem:[%s4279_s27 + $0xff0] sm:$0xff] }
 0x42d   : >> { %2930 = vmatpush1.bf16.msra.mxu0 %v1712_v41  ;;  %3258 = vmatpush1.bf16.msra.mxu1 %v1714_v17  ;;  %v1794_v41 = vunpack.c.l.s8.bf16 %v818_v54  ;;  %v1801_v17 = vunpack.c.h.s8.bf16 %v817_v32 }
 0x42e   : >> { %2931 = vmatprep.subr.bf16.mxu0 %v1721_v18  ;;  %3259 = vmatprep.subr.bf16.mxu1 %v1723_v19  ;;  %v1803_v18 = vunpack.c.h.s8.bf16 %v819_v10  ;;  %v825_v19 = vld [vmem:[%s4279_s27 + $0xee8] sm:$0xff] }
 0x431   : >> { %2932 = vmatpush1.bf16.msra.mxu0 %v1720_v61  ;;  %3260 = vmatpush1.bf16.msra.mxu1 %v1722_v24  ;;  %v1802_v61 = vunpack.c.h.s8.bf16 %v818_v54  ;;  %v1809_v24 = vunpack.c.l.s8.bf16 %v825_v19 }
 0x432   : >> { %2933 = vmatprep.subr.bf16.mxu0 %v1729_v52  ;;  %3261 = vmatprep.subr.bf16.mxu1 %v1731_v23  ;;  %v1811_v52 = vunpack.c.l.s8.bf16 %v827_v20  ;;  %v824_v23 = vld [vmem:[%s4279_s27 + $0xee0] sm:$0xff] }
 0x433   : >> { %v1808_v37 = vunpack.c.l.s8.bf16 %v824_v23  ;;  %v1816_v33 = vunpack.c.h.s8.bf16 %v824_v23 }
 0x435   : >> { %2934 = vmatpush1.bf16.msra.mxu0 %v1728_v59  ;;  %3262 = vmatpush1.bf16.msra.mxu1 %v1730_v28  ;;  %v1810_v59 = vunpack.c.l.s8.bf16 %v826_v25  ;;  %v1817_v28 = vunpack.c.h.s8.bf16 %v825_v19  ;;  %v1882_v19 = vunpack.c.h.s8.bf16 %v858_v14 }
 0x436   : >> { %2935 = vmatprep.subr.bf16.mxu0 %v1737_v29  ;;  %3263 = vmatprep.subr.bf16.mxu1 %v1739_v30  ;;  %v1819_v29 = vunpack.c.h.s8.bf16 %v827_v20  ;;  %v833_v30 = vld [vmem:[%s4279_s27 + $0xf28] sm:$0xff] }
 0x439   : >> { %2936 = vmatpush1.bf16.msra.mxu0 %v1736_v34  ;;  %3264 = vmatpush1.bf16.msra.mxu1 %v1738_v5  ;;  %v1818_v34 = vunpack.c.h.s8.bf16 %v826_v25  ;;  %v1825_v5 = vunpack.c.l.s8.bf16 %v833_v30 }
 0x43a   : >> { %2937 = vmatprep.subr.bf16.mxu0 %v1745_v35  ;;  %3265 = vmatprep.subr.bf16.mxu1 %v1747_v38  ;;  %v1827_v35 = vunpack.c.l.s8.bf16 %v835_v31  ;;  %v832_v38 = vld [vmem:[%s4279_s27 + $0xf20] sm:$0xff] }
 0x43b   : >> { %v1824_v40 = vunpack.c.l.s8.bf16 %v832_v38  ;;  %v1832_v48 = vunpack.c.h.s8.bf16 %v832_v38  ;;  %v3381_v38 = vsub.s32 (%p338_p1), 2, %v4291_v27 }
 0x43d   : >> { %2938 = vmatpush1.bf16.msra.mxu0 %v1744_v43  ;;  %3266 = vmatpush1.bf16.msra.mxu1 %v1746_v44  ;;  %v1826_v43 = vunpack.c.l.s8.bf16 %v834_v39  ;;  %v1833_v44 = vunpack.c.h.s8.bf16 %v833_v30 }
 0x43e   : >> { %2939 = vmatprep.subr.bf16.mxu0 %v1753_v45  ;;  %3267 = vmatprep.subr.bf16.mxu1 %v1755_v46  ;;  %v1835_v45 = vunpack.c.h.s8.bf16 %v835_v31  ;;  %v841_v46 = vld [vmem:[%s4279_s27 + $0xf68] sm:$0xff] }
 0x43f   : >> { %v1890_v31 = vld [vmem:[#allocation2 + $0x8] sm:$0xff] }
 0x441   : >> { %2940 = vmatpush1.bf16.msra.mxu0 %v1752_v50  ;;  %3268 = vmatpush1.bf16.msra.mxu1 %v1754_v53  ;;  %v1834_v50 = vunpack.c.h.s8.bf16 %v834_v39  ;;  %v1841_v53 = vunpack.c.l.s8.bf16 %v841_v46  ;;  %v3385_v39 = vsub.s32 (%p338_p1), 3, %v4291_v27 }
 0x442   : >> { %2950 = vmatprep.subr.bf16.mxu0 %v1761_v62  ;;  %3278 = vmatprep.subr.bf16.mxu1 %v1763_v51  ;;  %v1843_v62 = vunpack.c.l.s8.bf16 %v843_v47  ;;  %v840_v51 = vld [vmem:[%s4279_s27 + $0xf60] sm:$0xff] }
 0x443   : >> { %v1840_v56 = vunpack.c.l.s8.bf16 %v840_v51  ;;  %v1848_v1 = vunpack.c.h.s8.bf16 %v840_v51 }
 0x444   : >> { %2942 = vmatmul.mubr.bf16.vlgmr.msra.gmra.mrb[4].mxu0 %v4629_v42  ;;  %3270 = vmatmul.mubr.bf16.vlgmr.msra.gmra.mrb[4].mxu1 %v4629_v42  ;;  %v1778_v42 = vunpack.c.l.s8.bf16 %v810_v22 }
 0x445   : >> { %2951 = vmatpush1.bf16.msra.mxu0 %v1760_v57  ;;  %3279 = vmatpush1.bf16.msra.mxu1 %v1762_v58  ;;  %v1842_v57 = vunpack.c.l.s8.bf16 %v842_v55  ;;  %v1849_v58 = vunpack.c.h.s8.bf16 %v841_v46  ;;  %v3401_v46 = vsub.s32 (%p338_p1), 7, %v4291_v27 }
 0x446   : >> { %2952 = vmatprep.subr.bf16.mxu0 %v1769_v0  ;;  %3280 = vmatprep.subr.bf16.mxu1 %v1771_v6  ;;  %v1851_v0 = vunpack.c.h.s8.bf16 %v843_v47  ;;  %v849_v6 = vld [vmem:[%s4279_s27 + $0xfa8] sm:$0xff] }
 0x447   : >> { %2982 = vmatprep.mubr.bf16.mxu0 %v4635_v7  ;;  %3310 = vmatprep.mubr.bf16.mxu1 %v4635_v7  ;;  %v1793_v7 = vunpack.c.l.s8.bf16 %v817_v32  ;;  %v859_v32 = vld [vmem:[%s4279_s27 + $0xff8] sm:$0xff] }
 0x449   : >> { %2953 = vmatpush1.bf16.msra.mxu0 %v1768_v2  ;;  %3281 = vmatpush1.bf16.msra.mxu1 %v1770_v3  ;;  %v1850_v2 = vunpack.c.h.s8.bf16 %v842_v55  ;;  %v1857_v3 = vunpack.c.l.s8.bf16 %v849_v6 }
 0x44a   : >> { %2954 = vmatprep.subr.bf16.mxu0 %v1777_v60  ;;  %3282 = vmatprep.subr.bf16.mxu1 %v1779_v36  ;;  %v1859_v60 = vunpack.c.l.s8.bf16 %v851_v15  ;;  %v848_v36 = vld [vmem:[%s4279_s27 + $0xfa0] sm:$0xff] }
 0x44b   : >> { %v1856_v22 = vunpack.c.l.s8.bf16 %v848_v36  ;;  %v1864_v10 = vunpack.c.h.s8.bf16 %v848_v36 }
 0x44d   : >> { %2955 = vmatpush1.bf16.msra.mxu0 %v1776_v4  ;;  %3283 = vmatpush1.bf16.msra.mxu1 %v1778_v42  ;;  %v1858_v4 = vunpack.c.l.s8.bf16 %v850_v49  ;;  %v1865_v42 = vunpack.c.h.s8.bf16 %v849_v6 }
 0x44e   : >> { %2956 = vmatprep.subr.bf16.mxu0 %v1785_v8  ;;  %3284 = vmatprep.subr.bf16.mxu1 %v1787_v9  ;;  %v1867_v8 = vunpack.c.h.s8.bf16 %v851_v15  ;;  %v857_v9 = vld [vmem:[%s4279_s27 + $0xfe8] sm:$0xff] }
 0x451   : >> { %2957 = vmatpush1.bf16.msra.mxu0 %v1784_v12  ;;  %3285 = vmatpush1.bf16.msra.mxu1 %v1786_v13  ;;  %v1866_v12 = vunpack.c.h.s8.bf16 %v850_v49  ;;  %v1873_v13 = vunpack.c.l.s8.bf16 %v857_v9 }
 0x452   : >> { %2958 = vmatprep.subr.bf16.mxu0 %v1793_v7  ;;  %3286 = vmatprep.subr.bf16.mxu1 %v1795_v11  ;;  %v1875_v7 = vunpack.c.l.s8.bf16 %v859_v32  ;;  %v856_v11 = vld [vmem:[%s4279_s27 + $0xfe0] sm:$0xff] }
 0x453   : >> { %v1872_v54 = vunpack.c.l.s8.bf16 %v856_v11 }
 0x455   : >> { %2959 = vmatpush1.bf16.msra.mxu0 %v1792_v16  ;;  %3287 = vmatpush1.bf16.msra.mxu1 %v1794_v41  ;;  %v1874_v16 = vunpack.c.l.s8.bf16 %v858_v14  ;;  %v1881_v41 = vunpack.c.h.s8.bf16 %v857_v9 }
 0x456   : >> { %2960 = vmatprep.subr.bf16.mxu0 %v1801_v17  ;;  %3288 = vmatprep.subr.bf16.mxu1 %v1803_v18  ;;  %v1883_v17 = vunpack.c.h.s8.bf16 %v859_v32  ;;  %v1880_v18 = vunpack.c.h.s8.bf16 %v856_v11 }
 0x459   : >> { %2961 = vmatpush1.bf16.msra.mxu0 %v1800_v21  ;;  %3289 = vmatpush1.bf16.msra.mxu1 %v1802_v61 }
 0x45a   : >> { %2962 = vmatprep.subr.bf16.mxu0 %v1809_v24  ;;  %3290 = vmatprep.subr.bf16.mxu1 %v1811_v52 }
 0x45d   : >> { %2963 = vmatpush1.bf16.msra.mxu0 %v1808_v37  ;;  %3291 = vmatpush1.bf16.msra.mxu1 %v1810_v59 }
 0x45e   : >> { %2964 = vmatprep.subr.bf16.mxu0 %v1817_v28  ;;  %3292 = vmatprep.subr.bf16.mxu1 %v1819_v29 }
 0x461   : >> { %2965 = vmatpush1.bf16.msra.mxu0 %v1816_v33  ;;  %3293 = vmatpush1.bf16.msra.mxu1 %v1818_v34 }
 0x462   : >> { %2966 = vmatprep.subr.bf16.mxu0 %v1825_v5  ;;  %3294 = vmatprep.subr.bf16.mxu1 %v1827_v35  ;;  %v3373_v5 = vsub.s32 (%p338_p1), 0, %v4291_v27  ;;  %v3377_v35 = vsub.s32 (%p338_p1), 1, %v4291_v27 }
 0x465   : >> { %2967 = vmatpush1.bf16.msra.mxu0 %v1824_v40  ;;  %3295 = vmatpush1.bf16.msra.mxu1 %v1826_v43  ;;  %v3441_v40 = vld [vmem:[%s4268_s14] sm:$0xff] (%p338_p1)  ;;  %v3389_v43 = vsub.s32 (%p338_p1), 4, %v4291_v27 }
 0x466   : >> { %2968 = vmatprep.subr.bf16.mxu0 %v1833_v44  ;;  %3296 = vmatprep.subr.bf16.mxu1 %v1835_v45  ;;  %v3393_v44 = vsub.s32 (%p338_p1), 5, %v4291_v27  ;;  %v3397_v45 = vsub.s32 (%p338_p1), 6, %v4291_v27  ;;  %v3450_v51 = vrot.slane (%p338_p1), %v3441_v40, %v3377_v35  ;;  %v3454_v55 = vrot.slane (%p338_p1), %v3441_v40, %v3381_v38 }
 0x467   : > { %v3462_v49 = vrot.slane (%p338_p1), %v3441_v40, %v3389_v43 }
 0x468   : > { %v3466_v9 = vrot.slane (%p338_p1), %v3441_v40, %v3393_v44 }
 0x469   : >> { %2969 = vmatpush1.bf16.msra.mxu0 %v1832_v48  ;;  %3297 = vmatpush1.bf16.msra.mxu1 %v1834_v50 }
 0x46a   : >> { %2970 = vmatprep.subr.bf16.mxu0 %v1841_v53  ;;  %3298 = vmatprep.subr.bf16.mxu1 %v1843_v62  ;;  %v3446_v62 = vrot.slane (%p338_p1), %v3441_v40, %v3373_v5  ;;  %v3492_v14 = vcombine.low (%p338_p1), %v3462_v49, %v3466_v9 }
 0x46c   : > { %v3475_v15 = vcombine.low (%p338_p1), %v3446_v62, %v3450_v51 }
 0x46d   : >> { %2971 = vmatpush1.bf16.msra.mxu0 %v1840_v56  ;;  %3299 = vmatpush1.bf16.msra.mxu1 %v1842_v57  ;;  %v3458_v56 = vrot.slane (%p338_p1), %v3441_v40, %v3385_v39 }
 0x46e   : >> { %2972 = vmatprep.subr.bf16.mxu0 %v1849_v58  ;;  %3300 = vmatprep.subr.bf16.mxu1 %v1851_v0 }
 0x471   : >> { %2973 = vmatpush1.bf16.msra.mxu0 %v1848_v1  ;;  %3301 = vmatpush1.bf16.msra.mxu1 %v1850_v2  ;;  %v3476_v1 = vcombine.low (%p338_p1), %v3454_v55, %v3458_v56 }
 0x472   : >> { %2974 = vmatprep.subr.bf16.mxu0 %v1857_v3  ;;  %3302 = vmatprep.subr.bf16.mxu1 %v1859_v60 }
 0x475   : >> { %2975 = vmatpush1.bf16.msra.mxu0 %v1856_v22  ;;  %3303 = vmatpush1.bf16.msra.mxu1 %v1858_v4  ;;  %v3367_v22 = vld [vmem:[#allocation2] sm:$0xff] (%p338_p1)  ;;  %v3483_v4 = vrot.slane (%p338_p1), %v3475_v15, %v4800_v26 }
 0x476   : >> { %2976 = vmatprep.subr.bf16.mxu0 %v1865_v42  ;;  %3304 = vmatprep.subr.bf16.mxu1 %v1867_v8  ;;  %v3490_v42 = vrot.slane (%p338_p1), %v3476_v1, %v4800_v26 }
 0x479   : >> { %2977 = vmatpush1.bf16.msra.mxu0 %v1864_v10  ;;  %3305 = vmatpush1.bf16.msra.mxu1 %v1866_v12  ;;  %v3470_v12 = vrot.slane (%p338_p1), %v3441_v40, %v3397_v45 }
 0x47a   : >> { %2978 = vmatprep.subr.bf16.mxu0 %v1873_v13  ;;  %3306 = vmatprep.subr.bf16.mxu1 %v1875_v7  ;;  %v3474_v13 = vrot.slane (%p338_p1), %v3441_v40, %v3401_v46  ;;  %v3491_v7 = vcombine.low (%p338_p1), %v3483_v4, %v3490_v42 }
 0x47d   : >> { %2979 = vmatpush1.bf16.msra.mxu0 %v1872_v54  ;;  %3307 = vmatpush1.bf16.msra.mxu1 %v1874_v16 }
 0x47e   : >> { %2980 = vmatprep.subr.bf16.mxu0 %v1881_v41  ;;  %3308 = vmatprep.subr.bf16.mxu1 %v1883_v17  ;;  %v3493_v41 = vcombine.low (%p338_p1), %v3470_v12, %v3474_v13 }
 0x481   : >> { %2981 = vmatpush1.bf16.msra.mxu0 %v1880_v18  ;;  %3309 = vmatpush1.bf16.msra.mxu1 %v1882_v19  ;;  %v3500_v18 = vrot.slane (%p338_p1), %v3492_v14, %v4800_v26 }
 0x484   : >> { %2983 = vmatmul.mubr.bf16.vlgmr.msra.gmra.mrb[4].mxu0 %v4673_v63  ;;  %3311 = vmatmul.mubr.bf16.vlgmr.msra.gmra.mrb[4].mxu1 %v4673_v63  ;;  %v3369_v63 = vld [vmem:[%s4256_s12] sm:$0xff] (%p338_p1) }
 0x485   : > { %v3374_v47 = vrot.slane (%p338_p1), %v3369_v63, %v3373_v5  ;;  %v3378_v48 = vrot.slane (%p338_p1), %v3369_v63, %v3377_v35  ;;  %v3382_v50 = vrot.slane (%p338_p1), %v3369_v63, %v3381_v38  ;;  %v3386_v53 = vrot.slane (%p338_p1), %v3369_v63, %v3385_v39 }
 0x486   : > { %v3390_v0 = vrot.slane (%p338_p1), %v3369_v63, %v3389_v43  ;;  %v3394_v6 = vrot.slane (%p338_p1), %v3369_v63, %v3393_v44  ;;  %v3398_v2 = vrot.slane (%p338_p1), %v3369_v63, %v3397_v45  ;;  %v3402_v3 = vrot.slane (%p338_p1), %v3369_v63, %v3401_v46 }
 0x487   : > { %v3403_v57 = vcombine.low (%p338_p1), %v3374_v47, %v3378_v48  ;;  %v3404_v58 = vcombine.low (%p338_p1), %v3382_v50, %v3386_v53 }
 0x488   : > { %v3420_v36 = vcombine.low (%p338_p1), %v3390_v0, %v3394_v6  ;;  %v3421_v8 = vcombine.low (%p338_p1), %v3398_v2, %v3402_v3 }
 0x489   : > { %v3411_v60 = vrot.slane (%p338_p1), %v3403_v57, %v4800_v26  ;;  %v3418_v27 = vrot.slane (%p338_p1), %v3404_v58, %v4800_v26 }
 0x48a   : > { %v3428_v10 = vrot.slane (%p338_p1), %v3420_v36, %v4800_v26  ;;  %v3435_v11 = vrot.slane (%p338_p1), %v3421_v8, %v4800_v26 }
 0x48b   : > { %v3419_v32 = vcombine.low (%p338_p1), %v3411_v60, %v3418_v27 }
 0x48c   : > { %v3436_v17 = vcombine.low (%p338_p1), %v3428_v10, %v3435_v11 }
 0x48d   : > { %v3439_v54 = vmul.f32 (%p338_p1), %v3419_v32, %v3367_v22 }
 0x48f   : > { %v3511_v19 = vadd.f32 (%p338_p1), %v3491_v7, %v3439_v54 }
 0x491   : > { %3513 = vst [vmem:[%s4266_s29] sm:$0xff] (%p338_p1), %v3511_v19 }
 0x557   : >> { %v2984_v20 = vpop.f32.mrb[4].mxu0  ;;  %v3312_v21 = vpop.f32.mrb[4].mxu1 }
 0x558   : >> { %v2986_v61 = vpop.f32.mrb[5].mxu0  ;;  %v3314_v24 = vpop.f32.mrb[5].mxu1 }
 0x559   : >> { %v3344_v52 = vcombine.low %v2984_v20, %v2986_v61  ;;  %v3345_v23 = vcombine.low %v3312_v21, %v3314_v24  ;;  %v2988_v25 = vpop.f32.mrb[6].mxu0  ;;  %v3316_v37 = vpop.f32.mrb[6].mxu1  ;;  %v3507_v20 = vrot.slane (%p338_p1), %v3493_v41, %v4800_v26 }
 0x55a   : >> { %v2989_v59 = vpop.f32.mrb[7].mxu0  ;;  %v3317_v28 = vpop.f32.mrb[7].mxu1 }
 0x55b   : >> { %v3352_v29 = vrot.slane %v3344_v52, %v4800_v26  ;;  %v3359_v30 = vrot.slane %v3345_v23, %v4800_v26  ;;  %340 = sbr.rel (!%p338_p1) target bundleno = 125 (0x7d), region = 112  ;;  %v3508_v61 = vcombine.low (%p338_p1), %v3500_v18, %v3507_v20 }
 0x55d   : >> { %v3360_v33 = vcombine.low %v3352_v29, %v3359_v30 }
 0x55f   : >> { %v3364_v34 = vadd.f32 %v3360_v33, %v1890_v31 }
 0x561   : >> { %3366 = vst [vmem:[#allocation2 + $0x8] sm:$0xff] %v3364_v34 }
 0x568   : > { %v3368_v16 = vld [vmem:[#allocation2 + $0x8] sm:$0xff] }
 0x569   : > { %v3440_v21 = vmul.f32 %v3436_v17, %v3368_v16 }
 0x56b   : > { %v3512_v24 = vadd.f32 %v3508_v61, %v3440_v21 }
 0x56d   : > { %3514 = vst [vmem:[%s4266_s29 + $0x8] sm:$0xff] %v3512_v24 }
 0x56e PF: > { %s20_s20 = sadd.s32 1, %s4043_s20   ;;  %s5033_s2 = sld [smem:[#allocation10_spill]] }
 0x56f   : > { %p17_p13 = scmp.ge.s32.totalorder %s20_s20, 7   ;;  %s5034_s15 = smov %s4027_s16 }
 0x570   : > { %s5035_s16 = smov %s4031_s17  ;;  %s5036_s17 = smov %s4130_s26 }
 0x571   : > { %s5037_s18 = smov %s4039_s19  ;;  %19 = sbr.rel (!%p17_p13) target bundleno = 9 (0x9), region = 123 }
 0x574   : > { %s5038_s19 = smov %s5033_s2 }
 0x578   :  { %3545 = vsyncpa [#allocation4], 1 }
 0x579   :  { %3547 = vsyncpa [#allocation4 + $0x1], 1 }
 0x57a   :  { %3548 = vsyncpa [#allocation6], 1 }
 0x57b   :  { %3550 = vsyncpa [#allocation6 + $0x1], 1 }

</bundles_post_ra>
